<compile_context>
chip_gen: v6e
topology: v6e:2x2x1
jax: 0.10.0
libtpu: 0.0.40
codegen_flags: <defaults>
</compile_context>

<pallas_src>
import jax
import jax.numpy as jnp
from jax.experimental import pallas as pl
from jax.experimental.pallas import tpu as pltpu

BATCH = 2
IN_CH = 3          # input_shape
HIDDEN = 8         # hidden_units
OUT_CLASSES = 3    # output_shape
IMG = 64           # 64 ->62->60->(pool)30->28->26->(pool)13 ; Linear(hidden*13*13)


# ---------------------------------------------------------------------------
# In-kernel helpers (pure jnp, traced inside the Pallas kernel)
# ---------------------------------------------------------------------------
def _conv_taps(yb, w_ref, hout, n_out):
    """Sum of 3 banded matmuls (one per kernel row dy) on a bf16 slab."""
    acc = jnp.zeros((hout, n_out), jnp.float32)
    for dy in range(3):
        acc = acc + jnp.dot(yb[dy:dy + hout, :], w_ref[dy],
                            preferred_element_type=jnp.float32)
    return acc


def _conv_bn_relu(y, w_ref, s_ref):
    """3x3 valid conv + BN shift + ReLU on a (Hin, Win*Cin) slab.

    w_ref: (3, Win*Cin, Wout*Cout) bf16 band matrices (BN scale pre-folded).
    s_ref: (1, Wout*Cout) f32 BN shift tiled over output columns.
    Returns (Hout, Wout*Cout) f32.
    """
    hout = y.shape[0] - 2
    yb = y.astype(jnp.bfloat16)
    acc = _conv_taps(yb, w_ref, hout, s_ref.shape[1])
    return jnp.maximum(acc + s_ref[...], 0.0)


def _conv_bn_relu_pool(y, we_ref, wo_ref, s_ref, re_ref, ro_ref):
    """conv + BN + ReLU + 2x2/stride-2 max pool, with the column half of the
    pool pre-folded into the even/odd band weights.

    we_ref/wo_ref: (3, Win*Cin, (Wout//2)*Cout) bf16 (even / odd w-groups).
    s_ref:         (1, (Wout//2)*Cout) f32 shift (per-channel, even==odd).
    re_ref/ro_ref: (Hout//2, Hout) bf16 0/1 row-selection matrices.
    Returns (Hout//2, (Wout//2)*Cout) f32.
    """
    hout = y.shape[0] - 2
    n_out = s_ref.shape[1]
    yb = y.astype(jnp.bfloat16)
    shift = s_ref[...]
    col_e = jnp.maximum(_conv_taps(yb, we_ref, hout, n_out) + shift, 0.0)
    col_o = jnp.maximum(_conv_taps(yb, wo_ref, hout, n_out) + shift, 0.0)
    colmax = jnp.maximum(col_e, col_o).astype(jnp.bfloat16)       # column pool
    row_e = jnp.dot(re_ref[...], colmax, preferred_element_type=jnp.float32)
    row_o = jnp.dot(ro_ref[...], colmax, preferred_element_type=jnp.float32)
    return jnp.maximum(row_e, row_o)                              # row pool


# ---------------------------------------------------------------------------
# Fused TinyVGG kernel: one image per grid step, everything resident in VMEM.
# ---------------------------------------------------------------------------
def tiny_vgg_kernel(x_ref,
                    w1_ref, s1_ref,
                    w2e_ref, w2o_ref, s2_ref, r1e_ref, r1o_ref,
                    w3_ref, s3_ref,
                    w4e_ref, w4o_ref, s4_ref, r2e_ref, r2o_ref,
                    wfc_ref, bfc_ref,
                    o_ref):
    y = _conv_bn_relu(x_ref[...], w1_ref, s1_ref)                   # (62, 496)
    y = _conv_bn_relu_pool(y, w2e_ref, w2o_ref, s2_ref,
                           r1e_ref, r1o_ref)                        # (30, 240)
    y = _conv_bn_relu(y, w3_ref, s3_ref)                            # (28, 224)
    y = _conv_bn_relu_pool(y, w4e_ref, w4o_ref, s4_ref,
                           r2e_ref, r2o_ref)                        # (13, 104)

    # Classifier: Flatten + Linear, computed on the VPU/XLU (no serialized
    # M=1 MXU tail).  wfc is pre-permuted to (OUT, h, w*C) so nn.Flatten's
    # NCHW ordering is baked into the weights.
    parts = []
    for o in range(OUT_CLASSES):
        t = jnp.sum(y * wfc_ref[o], axis=1, keepdims=True)          # (13, 1)
        t = jnp.sum(t, axis=0, keepdims=True)                       # (1, 1)
        parts.append(t)
    logits = jnp.concatenate(parts, axis=1) + bfc_ref[...]          # (1, OUT)
    o_ref[...] = logits.astype(o_ref.dtype)


# ---------------------------------------------------------------------------
# pallas_call wrapper
# ---------------------------------------------------------------------------
_KP_ORDER = ("w1", "s1", "w2e", "w2o", "s2", "r1e", "r1o",
             "w3", "s3", "w4e", "w4o", "s4", "r2e", "r2o", "wfc", "bfc")


def _resident(arr):
    """Whole-array block with a constant index map (stays resident over grid)."""
    if arr.ndim == 2:
        return pl.BlockSpec(arr.shape, lambda i: (0, 0))
    return pl.BlockSpec(arr.shape, lambda i: (0, 0, 0))


def tiny_vgg_forward_impl(x_nchw, kp):
    n, c, h, w = x_nchw.shape
    # NCHW -> lane-dense per-image slab (H, W*C), channels innermost on lanes.
    x = jnp.transpose(x_nchw, (0, 2, 3, 1)).reshape(n, h, w * c).astype(jnp.float32)
    weights = [kp[k] for k in _KP_ORDER]
    out = pl.pallas_call(
        tiny_vgg_kernel,
        out_shape=jax.ShapeDtypeStruct((n, 1, OUT_CLASSES), jnp.float32),
        grid=(n,),
        in_specs=[pl.BlockSpec((None, h, w * c), lambda i: (i, 0, 0))]
                 + [_resident(a) for a in weights],
        out_specs=pl.BlockSpec((None, 1, OUT_CLASSES), lambda i: (i, 0, 0)),
        compiler_params=pltpu.CompilerParams(
            dimension_semantics=("parallel",)),   # v7x: one image per TensorCore
    )(x, *weights)
    return out.reshape(n, OUT_CLASSES)


tiny_vgg_forward = jax.jit(tiny_vgg_forward_impl)


# ---------------------------------------------------------------------------
# Parameters: torch-layout init + one-time re-layout into kernel-ready arrays
# ---------------------------------------------------------------------------
def _fold_bn(gamma, beta, mean, var, eps=1e-5):
    scale = gamma * jax.lax.rsqrt(var + eps)
    shift = beta - mean * scale
    return scale, shift


def _banded_conv_weight(w_oihw, scale, win):
    """Torch (Cout,Cin,3,3) conv weight (+BN scale) -> (3, win*Cin, wout*Cout) bf16.

    band[dy][wi*Cin+ci, wo*Cout+co] = scale[co] * w[co,ci,dy,wi-wo] if 0<=wi-wo<3.
    """
    cout, cin, kh, kw = w_oihw.shape
    wout = win - kw + 1
    w = w_oihw * scale[:, None, None, None]          # fold BN scale into the conv
    taps = jnp.transpose(w, (2, 3, 1, 0))            # (kh, kw, cin, cout)
    wi = jnp.arange(win)[:, None]
    wo = jnp.arange(wout)[None, :]
    band = jnp.zeros((kh, win, cin, wout, cout), jnp.float32)
    for dx in range(kw):
        mask = (wi - wo == dx).astype(jnp.float32)   # (win, wout)
        band = band + (mask[None, :, None, :, None]
                       * taps[:, dx][:, None, :, None, :])
    return band.reshape(kh, win * cin, wout * cout).astype(jnp.bfloat16)


def init_params(key, input_shape=IN_CH, hidden_units=HIDDEN,
                output_shape=OUT_CLASSES):
    """Synthetic deterministic parameters in PyTorch layouts."""
    ks = jax.random.split(key, 10)

    def conv_w(k, cin, cout):
        return (jax.random.normal(k, (cout, cin, 3, 3), jnp.float32)
                * (1.0 / jnp.sqrt(cin * 9.0)))

    def bn(k, ch):
        k1, k2, k3, k4 = jax.random.split(k, 4)
        gamma = 1.0 + 0.1 * jax.random.normal(k1, (ch,), jnp.float32)
        beta = 0.1 * jax.random.normal(k2, (ch,), jnp.float32)
        mean = 0.1 * jax.random.normal(k3, (ch,), jnp.float32)
        var = 1.0 + 0.1 * jax.random.uniform(k4, (ch,), jnp.float32)
        return _fold_bn(gamma, beta, mean, var)      # (scale, shift)

    p = {
        "w1": conv_w(ks[0], input_shape, hidden_units), "bn1": bn(ks[1], hidden_units),
        "w2": conv_w(ks[2], hidden_units, hidden_units), "bn2": bn(ks[3], hidden_units),
        "w3": conv_w(ks[4], hidden_units, hidden_units), "bn3": bn(ks[5], hidden_units),
        "w4": conv_w(ks[6], hidden_units, hidden_units), "bn4": bn(ks[7], hidden_units),
    }
    fin = hidden_units * 13 * 13
    p["w_fc"] = (jax.random.normal(ks[8], (fin, output_shape), jnp.float32)
                 * (1.0 / jnp.sqrt(float(fin))))
    p["b_fc"] = 0.01 * jax.random.normal(ks[9], (output_shape,), jnp.float32)
    return p


def prepare_params(p, hidden_units=HIDDEN, img=IMG, output_shape=OUT_CLASSES):
    """One-time re-layout of torch-style params into kernel-ready arrays."""

    def pack_plain(w, bn_pair, win):
        scale, shift = bn_pair
        wout = win - 2
        band = _banded_conv_weight(w, scale, win)
        srow = jnp.tile(shift, wout).reshape(1, wout * hidden_units)
        return band, srow.astype(jnp.float32)

    def pack_pooled(w, bn_pair, win):
        """Band weights with the pool column selection folded in (even/odd w)."""
        scale, shift = bn_pair
        wout = win - 2
        band = _banded_conv_weight(w, scale, win)            # (3, K, wout*C)
        kh, kdim, _ = band.shape
        b4 = band.reshape(kh, kdim, wout, hidden_units)
        be = b4[:, :, 0::2, :].reshape(kh, kdim, (wout // 2) * hidden_units)
        bo = b4[:, :, 1::2, :].reshape(kh, kdim, (wout // 2) * hidden_units)
        srow = jnp.tile(shift, wout // 2).reshape(1, (wout // 2) * hidden_units)
        return be, bo, srow.astype(jnp.float32)

    def row_sel(hout):
        """(hout//2, hout) bf16 0/1 matrices picking even / odd rows."""
        ho = hout // 2
        ri = jnp.arange(ho)[:, None]
        rj = jnp.arange(hout)[None, :]
        re = (rj == 2 * ri).astype(jnp.bfloat16)
        ro = (rj == 2 * ri + 1).astype(jnp.bfloat16)
        return re, ro

    s1_in = img                 # 64
    s2_in = img - 2             # 62
    s3_in = (img - 4) // 2      # 30
    s4_in = s3_in - 2           # 28
    side = (s3_in - 4) // 2     # 13

    w1, s1 = pack_plain(p["w1"], p["bn1"], s1_in)
    w2e, w2o, s2 = pack_pooled(p["w2"], p["bn2"], s2_in)
    r1e, r1o = row_sel(s2_in - 2)                    # conv2 output rows = 60
    w3, s3 = pack_plain(p["w3"], p["bn3"], s3_in)
    w4e, w4o, s4 = pack_pooled(p["w4"], p["bn4"], s4_in)
    r2e, r2o = row_sel(s4_in - 2)                    # conv4 output rows = 26

    # nn.Flatten on NCHW yields feature order (c, h, w); pre-permute FC rows to
    # (out, h, w*C+c) so the kernel's classifier is a plain VPU multiply+reduce.
    wfc = p["w_fc"].reshape(hidden_units, side, side, output_shape)   # (c,h,w,o)
    wfc = jnp.transpose(wfc, (3, 1, 2, 0))                            # (o,h,w,c)
    wfc = wfc.reshape(output_shape, side, side * hidden_units).astype(jnp.float32)
    bfc = p["b_fc"].reshape(1, output_shape).astype(jnp.float32)

    return {"w1": w1, "s1": s1, "w2e": w2e, "w2o": w2o, "s2": s2,
            "r1e": r1e, "r1o": r1o, "w3": w3, "s3": s3,
            "w4e": w4e, "w4o": w4o, "s4": s4, "r2e": r2e, "r2o": r2o,
            "wfc": wfc, "bfc": bfc}


# ---------------------------------------------------------------------------
# Pure-JAX reference (eval-mode BN), used only for a loose correctness check.
# ---------------------------------------------------------------------------
def tiny_vgg_reference(x_nchw, p):
    def conv_bn_relu(x, w, bn_pair):
        scale, shift = bn_pair
        y = jax.lax.conv_general_dilated(
            x, w, window_strides=(1, 1), padding="VALID",
            dimension_numbers=("NCHW", "OIHW", "NCHW"))
        y = y * scale[None, :, None, None] + shift[None, :, None, None]
        return jnp.maximum(y, 0.0)

    def maxpool2(x):
        return jax.lax.reduce_window(x, -jnp.inf, jax.lax.max,
                                     (1, 1, 2, 2), (1, 1, 2, 2), "VALID")

    y = conv_bn_relu(x_nchw, p["w1"], p["bn1"])
    y = conv_bn_relu(y, p["w2"], p["bn2"])
    y = maxpool2(y)
    y = conv_bn_relu(y, p["w3"], p["bn3"])
    y = conv_bn_relu(y, p["w4"], p["bn4"])
    y = maxpool2(y)
    y = y.reshape(y.shape[0], -1)                    # NCHW flatten == nn.Flatten
    return y @ p["w_fc"] + p["b_fc"]


if __name__ == "__main__":
    key = jax.random.PRNGKey(0)
    kx, kparam = jax.random.split(key)
    x = jax.random.normal(kx, (BATCH, IN_CH, IMG, IMG), jnp.float32)
    torch_params = init_params(kparam)
    kernel_params = prepare_params(torch_params)     # weight re-layout done once

    out = tiny_vgg_forward(x, kernel_params)
    jax.block_until_ready(out)
    assert out.shape == (BATCH, OUT_CLASSES), out.shape
    assert bool(jnp.all(jnp.isfinite(out))), "non-finite logits"

    # Loose tolerance: MXU operands are bf16 across 4 stacked convs.
    ref = tiny_vgg_reference(x, torch_params)
    err = float(jnp.max(jnp.abs(out - ref)))
    tol = 0.1 + 0.02 * float(jnp.max(jnp.abs(ref)))
    assert err <= tol, f"max abs err {err} > tol {tol}"
    print("KERNEL_OK")
</pallas_src>

<mosaic_0001>
module attributes {stable_mosaic.version = 11 : i64} {
  func.func @tiny_vgg_kernel(%arg0: i32, %arg1: memref<1x64x192xf32, #tpu.memory_space<vmem>>, %arg2: memref<3x192x496xbf16, #tpu.memory_space<vmem>>, %arg3: memref<1x496xf32, #tpu.memory_space<vmem>>, %arg4: memref<3x496x240xbf16, #tpu.memory_space<vmem>>, %arg5: memref<3x496x240xbf16, #tpu.memory_space<vmem>>, %arg6: memref<1x240xf32, #tpu.memory_space<vmem>>, %arg7: memref<30x60xbf16, #tpu.memory_space<vmem>>, %arg8: memref<30x60xbf16, #tpu.memory_space<vmem>>, %arg9: memref<3x240x224xbf16, #tpu.memory_space<vmem>>, %arg10: memref<1x224xf32, #tpu.memory_space<vmem>>, %arg11: memref<3x224x104xbf16, #tpu.memory_space<vmem>>, %arg12: memref<3x224x104xbf16, #tpu.memory_space<vmem>>, %arg13: memref<1x104xf32, #tpu.memory_space<vmem>>, %arg14: memref<13x26xbf16, #tpu.memory_space<vmem>>, %arg15: memref<13x26xbf16, #tpu.memory_space<vmem>>, %arg16: memref<3x13x104xf32, #tpu.memory_space<vmem>>, %arg17: memref<1x3xf32, #tpu.memory_space<vmem>>, %arg18: memref<1x1x3xf32, #tpu.memory_space<vmem>>) attributes {dimension_semantics = [#tpu.dimension_semantics<parallel>], iteration_bounds = array<i64: 2>, scalar_prefetch = 0 : i64, scratch_operands = 0 : i64, tpu.core_type = #tpu.core_type<tc>, window_params = [{transform_indices = @transform_0, window_bounds = array<i64: 1, 64, 192>}, {pipeline_mode = #tpu.pipeline_mode<synchronous>, transform_indices = @transform_1, window_bounds = array<i64: 3, 192, 496>}, {pipeline_mode = #tpu.pipeline_mode<synchronous>, transform_indices = @transform_2, window_bounds = array<i64: 1, 496>}, {pipeline_mode = #tpu.pipeline_mode<synchronous>, transform_indices = @transform_3, window_bounds = array<i64: 3, 496, 240>}, {pipeline_mode = #tpu.pipeline_mode<synchronous>, transform_indices = @transform_4, window_bounds = array<i64: 3, 496, 240>}, {pipeline_mode = #tpu.pipeline_mode<synchronous>, transform_indices = @transform_5, window_bounds = array<i64: 1, 240>}, {pipeline_mode = #tpu.pipeline_mode<synchronous>, transform_indices = @transform_6, window_bounds = array<i64: 30, 60>}, {pipeline_mode = #tpu.pipeline_mode<synchronous>, transform_indices = @transform_7, window_bounds = array<i64: 30, 60>}, {pipeline_mode = #tpu.pipeline_mode<synchronous>, transform_indices = @transform_8, window_bounds = array<i64: 3, 240, 224>}, {pipeline_mode = #tpu.pipeline_mode<synchronous>, transform_indices = @transform_9, window_bounds = array<i64: 1, 224>}, {pipeline_mode = #tpu.pipeline_mode<synchronous>, transform_indices = @transform_10, window_bounds = array<i64: 3, 224, 104>}, {pipeline_mode = #tpu.pipeline_mode<synchronous>, transform_indices = @transform_11, window_bounds = array<i64: 3, 224, 104>}, {pipeline_mode = #tpu.pipeline_mode<synchronous>, transform_indices = @transform_12, window_bounds = array<i64: 1, 104>}, {pipeline_mode = #tpu.pipeline_mode<synchronous>, transform_indices = @transform_13, window_bounds = array<i64: 13, 26>}, {pipeline_mode = #tpu.pipeline_mode<synchronous>, transform_indices = @transform_14, window_bounds = array<i64: 13, 26>}, {pipeline_mode = #tpu.pipeline_mode<synchronous>, transform_indices = @transform_15, window_bounds = array<i64: 3, 13, 104>}, {pipeline_mode = #tpu.pipeline_mode<synchronous>, transform_indices = @transform_16, window_bounds = array<i64: 1, 3>}, {transform_indices = @transform_17, window_bounds = array<i64: 1, 1, 3>}]} {
    %c0 = arith.constant 0 : index
    %c0_0 = arith.constant 0 : index
    %c0_1 = arith.constant 0 : index
    %0 = vector.load %arg1[%c0, %c0_0, %c0_1] : memref<1x64x192xf32, #tpu.memory_space<vmem>>, vector<1x64x192xf32>
    %1 = vector.shape_cast %0 : vector<1x64x192xf32> to vector<64x192xf32>
    %2 = arith.truncf %1 : vector<64x192xf32> to vector<64x192xbf16>
    %cst = arith.constant 0.000000e+00 : f32
    %3 = vector.broadcast %cst : f32 to vector<62x496xf32>
    %4 = vector.extract_strided_slice %2 {offsets = [0, 0], sizes = [62, 192], strides = [1, 1]} : vector<64x192xbf16> to vector<62x192xbf16>
    %c0_2 = arith.constant 0 : index
    %c0_3 = arith.constant 0 : index
    %c0_4 = arith.constant 0 : index
    %5 = vector.load %arg2[%c0_2, %c0_3, %c0_4] : memref<3x192x496xbf16, #tpu.memory_space<vmem>>, vector<1x192x496xbf16>
    %6 = vector.shape_cast %5 : vector<1x192x496xbf16> to vector<192x496xbf16>
    %cst_5 = arith.constant dense<0.000000e+00> : vector<62x496xf32>
    %7 = tpu.matmul %4, %6, %cst_5 {dimension_numbers = #tpu.dot_dimension_numbers<[1], [0], [0], [1], [0, 0, 1, 1], [], []>} : vector<62x192xbf16>, vector<192x496xbf16>, vector<62x496xf32> -> vector<62x496xf32>
    %8 = arith.addf %3, %7 : vector<62x496xf32>
    %9 = vector.extract_strided_slice %2 {offsets = [1, 0], sizes = [62, 192], strides = [1, 1]} : vector<64x192xbf16> to vector<62x192xbf16>
    %c1 = arith.constant 1 : index
    %c0_6 = arith.constant 0 : index
    %c0_7 = arith.constant 0 : index
    %10 = vector.load %arg2[%c1, %c0_6, %c0_7] : memref<3x192x496xbf16, #tpu.memory_space<vmem>>, vector<1x192x496xbf16>
    %11 = vector.shape_cast %10 : vector<1x192x496xbf16> to vector<192x496xbf16>
    %cst_8 = arith.constant dense<0.000000e+00> : vector<62x496xf32>
    %12 = tpu.matmul %9, %11, %cst_8 {dimension_numbers = #tpu.dot_dimension_numbers<[1], [0], [0], [1], [0, 0, 1, 1], [], []>} : vector<62x192xbf16>, vector<192x496xbf16>, vector<62x496xf32> -> vector<62x496xf32>
    %13 = arith.addf %8, %12 : vector<62x496xf32>
    %14 = vector.extract_strided_slice %2 {offsets = [2, 0], sizes = [62, 192], strides = [1, 1]} : vector<64x192xbf16> to vector<62x192xbf16>
    %c2 = arith.constant 2 : index
    %c0_9 = arith.constant 0 : index
    %c0_10 = arith.constant 0 : index
    %15 = vector.load %arg2[%c2, %c0_9, %c0_10] : memref<3x192x496xbf16, #tpu.memory_space<vmem>>, vector<1x192x496xbf16>
    %16 = vector.shape_cast %15 : vector<1x192x496xbf16> to vector<192x496xbf16>
    %cst_11 = arith.constant dense<0.000000e+00> : vector<62x496xf32>
    %17 = tpu.matmul %14, %16, %cst_11 {dimension_numbers = #tpu.dot_dimension_numbers<[1], [0], [0], [1], [0, 0, 1, 1], [], []>} : vector<62x192xbf16>, vector<192x496xbf16>, vector<62x496xf32> -> vector<62x496xf32>
    %18 = arith.addf %13, %17 : vector<62x496xf32>
    %c0_12 = arith.constant 0 : index
    %c0_13 = arith.constant 0 : index
    %19 = vector.load %arg3[%c0_12, %c0_13] : memref<1x496xf32, #tpu.memory_space<vmem>>, vector<1x496xf32>
    %20 = vector.broadcast %19 : vector<1x496xf32> to vector<62x496xf32>
    %21 = arith.addf %18, %20 : vector<62x496xf32>
    %cst_14 = arith.constant 0.000000e+00 : f32
    %22 = vector.broadcast %cst_14 : f32 to vector<62x496xf32>
    %23 = arith.maximumf %21, %22 : vector<62x496xf32>
    %24 = arith.truncf %23 : vector<62x496xf32> to vector<62x496xbf16>
    %c0_15 = arith.constant 0 : index
    %c0_16 = arith.constant 0 : index
    %25 = vector.load %arg6[%c0_15, %c0_16] : memref<1x240xf32, #tpu.memory_space<vmem>>, vector<1x240xf32>
    %cst_17 = arith.constant 0.000000e+00 : f32
    %26 = vector.broadcast %cst_17 : f32 to vector<60x240xf32>
    %27 = vector.extract_strided_slice %24 {offsets = [0, 0], sizes = [60, 496], strides = [1, 1]} : vector<62x496xbf16> to vector<60x496xbf16>
    %c0_18 = arith.constant 0 : index
    %c0_19 = arith.constant 0 : index
    %c0_20 = arith.constant 0 : index
    %28 = vector.load %arg4[%c0_18, %c0_19, %c0_20] : memref<3x496x240xbf16, #tpu.memory_space<vmem>>, vector<1x496x240xbf16>
    %29 = vector.shape_cast %28 : vector<1x496x240xbf16> to vector<496x240xbf16>
    %cst_21 = arith.constant dense<0.000000e+00> : vector<60x240xf32>
    %30 = tpu.matmul %27, %29, %cst_21 {dimension_numbers = #tpu.dot_dimension_numbers<[1], [0], [0], [1], [0, 0, 1, 1], [], []>} : vector<60x496xbf16>, vector<496x240xbf16>, vector<60x240xf32> -> vector<60x240xf32>
    %31 = arith.addf %26, %30 : vector<60x240xf32>
    %32 = vector.extract_strided_slice %24 {offsets = [1, 0], sizes = [60, 496], strides = [1, 1]} : vector<62x496xbf16> to vector<60x496xbf16>
    %c1_22 = arith.constant 1 : index
    %c0_23 = arith.constant 0 : index
    %c0_24 = arith.constant 0 : index
    %33 = vector.load %arg4[%c1_22, %c0_23, %c0_24] : memref<3x496x240xbf16, #tpu.memory_space<vmem>>, vector<1x496x240xbf16>
    %34 = vector.shape_cast %33 : vector<1x496x240xbf16> to vector<496x240xbf16>
    %cst_25 = arith.constant dense<0.000000e+00> : vector<60x240xf32>
    %35 = tpu.matmul %32, %34, %cst_25 {dimension_numbers = #tpu.dot_dimension_numbers<[1], [0], [0], [1], [0, 0, 1, 1], [], []>} : vector<60x496xbf16>, vector<496x240xbf16>, vector<60x240xf32> -> vector<60x240xf32>
    %36 = arith.addf %31, %35 : vector<60x240xf32>
    %37 = vector.extract_strided_slice %24 {offsets = [2, 0], sizes = [60, 496], strides = [1, 1]} : vector<62x496xbf16> to vector<60x496xbf16>
    %c2_26 = arith.constant 2 : index
    %c0_27 = arith.constant 0 : index
    %c0_28 = arith.constant 0 : index
    %38 = vector.load %arg4[%c2_26, %c0_27, %c0_28] : memref<3x496x240xbf16, #tpu.memory_space<vmem>>, vector<1x496x240xbf16>
    %39 = vector.shape_cast %38 : vector<1x496x240xbf16> to vector<496x240xbf16>
    %cst_29 = arith.constant dense<0.000000e+00> : vector<60x240xf32>
    %40 = tpu.matmul %37, %39, %cst_29 {dimension_numbers = #tpu.dot_dimension_numbers<[1], [0], [0], [1], [0, 0, 1, 1], [], []>} : vector<60x496xbf16>, vector<496x240xbf16>, vector<60x240xf32> -> vector<60x240xf32>
    %41 = arith.addf %36, %40 : vector<60x240xf32>
    %42 = vector.broadcast %25 : vector<1x240xf32> to vector<60x240xf32>
    %43 = arith.addf %41, %42 : vector<60x240xf32>
    %cst_30 = arith.constant 0.000000e+00 : f32
    %44 = vector.broadcast %cst_30 : f32 to vector<60x240xf32>
    %45 = arith.maximumf %43, %44 : vector<60x240xf32>
    %cst_31 = arith.constant 0.000000e+00 : f32
    %46 = vector.broadcast %cst_31 : f32 to vector<60x240xf32>
    %47 = vector.extract_strided_slice %24 {offsets = [0, 0], sizes = [60, 496], strides = [1, 1]} : vector<62x496xbf16> to vector<60x496xbf16>
    %c0_32 = arith.constant 0 : index
    %c0_33 = arith.constant 0 : index
    %c0_34 = arith.constant 0 : index
    %48 = vector.load %arg5[%c0_32, %c0_33, %c0_34] : memref<3x496x240xbf16, #tpu.memory_space<vmem>>, vector<1x496x240xbf16>
    %49 = vector.shape_cast %48 : vector<1x496x240xbf16> to vector<496x240xbf16>
    %cst_35 = arith.constant dense<0.000000e+00> : vector<60x240xf32>
    %50 = tpu.matmul %47, %49, %cst_35 {dimension_numbers = #tpu.dot_dimension_numbers<[1], [0], [0], [1], [0, 0, 1, 1], [], []>} : vector<60x496xbf16>, vector<496x240xbf16>, vector<60x240xf32> -> vector<60x240xf32>
    %51 = arith.addf %46, %50 : vector<60x240xf32>
    %52 = vector.extract_strided_slice %24 {offsets = [1, 0], sizes = [60, 496], strides = [1, 1]} : vector<62x496xbf16> to vector<60x496xbf16>
    %c1_36 = arith.constant 1 : index
    %c0_37 = arith.constant 0 : index
    %c0_38 = arith.constant 0 : index
    %53 = vector.load %arg5[%c1_36, %c0_37, %c0_38] : memref<3x496x240xbf16, #tpu.memory_space<vmem>>, vector<1x496x240xbf16>
    %54 = vector.shape_cast %53 : vector<1x496x240xbf16> to vector<496x240xbf16>
    %cst_39 = arith.constant dense<0.000000e+00> : vector<60x240xf32>
    %55 = tpu.matmul %52, %54, %cst_39 {dimension_numbers = #tpu.dot_dimension_numbers<[1], [0], [0], [1], [0, 0, 1, 1], [], []>} : vector<60x496xbf16>, vector<496x240xbf16>, vector<60x240xf32> -> vector<60x240xf32>
    %56 = arith.addf %51, %55 : vector<60x240xf32>
    %57 = vector.extract_strided_slice %24 {offsets = [2, 0], sizes = [60, 496], strides = [1, 1]} : vector<62x496xbf16> to vector<60x496xbf16>
    %c2_40 = arith.constant 2 : index
    %c0_41 = arith.constant 0 : index
    %c0_42 = arith.constant 0 : index
    %58 = vector.load %arg5[%c2_40, %c0_41, %c0_42] : memref<3x496x240xbf16, #tpu.memory_space<vmem>>, vector<1x496x240xbf16>
    %59 = vector.shape_cast %58 : vector<1x496x240xbf16> to vector<496x240xbf16>
    %cst_43 = arith.constant dense<0.000000e+00> : vector<60x240xf32>
    %60 = tpu.matmul %57, %59, %cst_43 {dimension_numbers = #tpu.dot_dimension_numbers<[1], [0], [0], [1], [0, 0, 1, 1], [], []>} : vector<60x496xbf16>, vector<496x240xbf16>, vector<60x240xf32> -> vector<60x240xf32>
    %61 = arith.addf %56, %60 : vector<60x240xf32>
    %62 = vector.broadcast %25 : vector<1x240xf32> to vector<60x240xf32>
    %63 = arith.addf %61, %62 : vector<60x240xf32>
    %cst_44 = arith.constant 0.000000e+00 : f32
    %64 = vector.broadcast %cst_44 : f32 to vector<60x240xf32>
    %65 = arith.maximumf %63, %64 : vector<60x240xf32>
    %66 = arith.maximumf %45, %65 : vector<60x240xf32>
    %67 = arith.truncf %66 : vector<60x240xf32> to vector<60x240xbf16>
    %c0_45 = arith.constant 0 : index
    %c0_46 = arith.constant 0 : index
    %68 = vector.load %arg7[%c0_45, %c0_46] : memref<30x60xbf16, #tpu.memory_space<vmem>>, vector<30x60xbf16>
    %cst_47 = arith.constant dense<0.000000e+00> : vector<30x240xf32>
    %69 = tpu.matmul %68, %67, %cst_47 {dimension_numbers = #tpu.dot_dimension_numbers<[1], [0], [0], [1], [0, 0, 1, 1], [], []>} : vector<30x60xbf16>, vector<60x240xbf16>, vector<30x240xf32> -> vector<30x240xf32>
    %c0_48 = arith.constant 0 : index
    %c0_49 = arith.constant 0 : index
    %70 = vector.load %arg8[%c0_48, %c0_49] : memref<30x60xbf16, #tpu.memory_space<vmem>>, vector<30x60xbf16>
    %cst_50 = arith.constant dense<0.000000e+00> : vector<30x240xf32>
    %71 = tpu.matmul %70, %67, %cst_50 {dimension_numbers = #tpu.dot_dimension_numbers<[1], [0], [0], [1], [0, 0, 1, 1], [], []>} : vector<30x60xbf16>, vector<60x240xbf16>, vector<30x240xf32> -> vector<30x240xf32>
    %72 = arith.maximumf %69, %71 : vector<30x240xf32>
    %73 = arith.truncf %72 : vector<30x240xf32> to vector<30x240xbf16>
    %cst_51 = arith.constant 0.000000e+00 : f32
    %74 = vector.broadcast %cst_51 : f32 to vector<28x224xf32>
    %75 = vector.extract_strided_slice %73 {offsets = [0, 0], sizes = [28, 240], strides = [1, 1]} : vector<30x240xbf16> to vector<28x240xbf16>
    %c0_52 = arith.constant 0 : index
    %c0_53 = arith.constant 0 : index
    %c0_54 = arith.constant 0 : index
    %76 = vector.load %arg9[%c0_52, %c0_53, %c0_54] : memref<3x240x224xbf16, #tpu.memory_space<vmem>>, vector<1x240x224xbf16>
    %77 = vector.shape_cast %76 : vector<1x240x224xbf16> to vector<240x224xbf16>
    %cst_55 = arith.constant dense<0.000000e+00> : vector<28x224xf32>
    %78 = tpu.matmul %75, %77, %cst_55 {dimension_numbers = #tpu.dot_dimension_numbers<[1], [0], [0], [1], [0, 0, 1, 1], [], []>} : vector<28x240xbf16>, vector<240x224xbf16>, vector<28x224xf32> -> vector<28x224xf32>
    %79 = arith.addf %74, %78 : vector<28x224xf32>
    %80 = vector.extract_strided_slice %73 {offsets = [1, 0], sizes = [28, 240], strides = [1, 1]} : vector<30x240xbf16> to vector<28x240xbf16>
    %c1_56 = arith.constant 1 : index
    %c0_57 = arith.constant 0 : index
    %c0_58 = arith.constant 0 : index
    %81 = vector.load %arg9[%c1_56, %c0_57, %c0_58] : memref<3x240x224xbf16, #tpu.memory_space<vmem>>, vector<1x240x224xbf16>
    %82 = vector.shape_cast %81 : vector<1x240x224xbf16> to vector<240x224xbf16>
    %cst_59 = arith.constant dense<0.000000e+00> : vector<28x224xf32>
    %83 = tpu.matmul %80, %82, %cst_59 {dimension_numbers = #tpu.dot_dimension_numbers<[1], [0], [0], [1], [0, 0, 1, 1], [], []>} : vector<28x240xbf16>, vector<240x224xbf16>, vector<28x224xf32> -> vector<28x224xf32>
    %84 = arith.addf %79, %83 : vector<28x224xf32>
    %85 = vector.extract_strided_slice %73 {offsets = [2, 0], sizes = [28, 240], strides = [1, 1]} : vector<30x240xbf16> to vector<28x240xbf16>
    %c2_60 = arith.constant 2 : index
    %c0_61 = arith.constant 0 : index
    %c0_62 = arith.constant 0 : index
    %86 = vector.load %arg9[%c2_60, %c0_61, %c0_62] : memref<3x240x224xbf16, #tpu.memory_space<vmem>>, vector<1x240x224xbf16>
    %87 = vector.shape_cast %86 : vector<1x240x224xbf16> to vector<240x224xbf16>
    %cst_63 = arith.constant dense<0.000000e+00> : vector<28x224xf32>
    %88 = tpu.matmul %85, %87, %cst_63 {dimension_numbers = #tpu.dot_dimension_numbers<[1], [0], [0], [1], [0, 0, 1, 1], [], []>} : vector<28x240xbf16>, vector<240x224xbf16>, vector<28x224xf32> -> vector<28x224xf32>
    %89 = arith.addf %84, %88 : vector<28x224xf32>
    %c0_64 = arith.constant 0 : index
    %c0_65 = arith.constant 0 : index
    %90 = vector.load %arg10[%c0_64, %c0_65] : memref<1x224xf32, #tpu.memory_space<vmem>>, vector<1x224xf32>
    %91 = vector.broadcast %90 : vector<1x224xf32> to vector<28x224xf32>
    %92 = arith.addf %89, %91 : vector<28x224xf32>
    %cst_66 = arith.constant 0.000000e+00 : f32
    %93 = vector.broadcast %cst_66 : f32 to vector<28x224xf32>
    %94 = arith.maximumf %92, %93 : vector<28x224xf32>
    %95 = arith.truncf %94 : vector<28x224xf32> to vector<28x224xbf16>
    %c0_67 = arith.constant 0 : index
    %c0_68 = arith.constant 0 : index
    %96 = vector.load %arg13[%c0_67, %c0_68] : memref<1x104xf32, #tpu.memory_space<vmem>>, vector<1x104xf32>
    %cst_69 = arith.constant 0.000000e+00 : f32
    %97 = vector.broadcast %cst_69 : f32 to vector<26x104xf32>
    %98 = vector.extract_strided_slice %95 {offsets = [0, 0], sizes = [26, 224], strides = [1, 1]} : vector<28x224xbf16> to vector<26x224xbf16>
    %c0_70 = arith.constant 0 : index
    %c0_71 = arith.constant 0 : index
    %c0_72 = arith.constant 0 : index
    %99 = vector.load %arg11[%c0_70, %c0_71, %c0_72] : memref<3x224x104xbf16, #tpu.memory_space<vmem>>, vector<1x224x104xbf16>
    %100 = vector.shape_cast %99 : vector<1x224x104xbf16> to vector<224x104xbf16>
    %cst_73 = arith.constant dense<0.000000e+00> : vector<26x104xf32>
    %101 = tpu.matmul %98, %100, %cst_73 {dimension_numbers = #tpu.dot_dimension_numbers<[1], [0], [0], [1], [0, 0, 1, 1], [], []>} : vector<26x224xbf16>, vector<224x104xbf16>, vector<26x104xf32> -> vector<26x104xf32>
    %102 = arith.addf %97, %101 : vector<26x104xf32>
    %103 = vector.extract_strided_slice %95 {offsets = [1, 0], sizes = [26, 224], strides = [1, 1]} : vector<28x224xbf16> to vector<26x224xbf16>
    %c1_74 = arith.constant 1 : index
    %c0_75 = arith.constant 0 : index
    %c0_76 = arith.constant 0 : index
    %104 = vector.load %arg11[%c1_74, %c0_75, %c0_76] : memref<3x224x104xbf16, #tpu.memory_space<vmem>>, vector<1x224x104xbf16>
    %105 = vector.shape_cast %104 : vector<1x224x104xbf16> to vector<224x104xbf16>
    %cst_77 = arith.constant dense<0.000000e+00> : vector<26x104xf32>
    %106 = tpu.matmul %103, %105, %cst_77 {dimension_numbers = #tpu.dot_dimension_numbers<[1], [0], [0], [1], [0, 0, 1, 1], [], []>} : vector<26x224xbf16>, vector<224x104xbf16>, vector<26x104xf32> -> vector<26x104xf32>
    %107 = arith.addf %102, %106 : vector<26x104xf32>
    %108 = vector.extract_strided_slice %95 {offsets = [2, 0], sizes = [26, 224], strides = [1, 1]} : vector<28x224xbf16> to vector<26x224xbf16>
    %c2_78 = arith.constant 2 : index
    %c0_79 = arith.constant 0 : index
    %c0_80 = arith.constant 0 : index
    %109 = vector.load %arg11[%c2_78, %c0_79, %c0_80] : memref<3x224x104xbf16, #tpu.memory_space<vmem>>, vector<1x224x104xbf16>
    %110 = vector.shape_cast %109 : vector<1x224x104xbf16> to vector<224x104xbf16>
    %cst_81 = arith.constant dense<0.000000e+00> : vector<26x104xf32>
    %111 = tpu.matmul %108, %110, %cst_81 {dimension_numbers = #tpu.dot_dimension_numbers<[1], [0], [0], [1], [0, 0, 1, 1], [], []>} : vector<26x224xbf16>, vector<224x104xbf16>, vector<26x104xf32> -> vector<26x104xf32>
    %112 = arith.addf %107, %111 : vector<26x104xf32>
    %113 = vector.broadcast %96 : vector<1x104xf32> to vector<26x104xf32>
    %114 = arith.addf %112, %113 : vector<26x104xf32>
    %cst_82 = arith.constant 0.000000e+00 : f32
    %115 = vector.broadcast %cst_82 : f32 to vector<26x104xf32>
    %116 = arith.maximumf %114, %115 : vector<26x104xf32>
    %cst_83 = arith.constant 0.000000e+00 : f32
    %117 = vector.broadcast %cst_83 : f32 to vector<26x104xf32>
    %118 = vector.extract_strided_slice %95 {offsets = [0, 0], sizes = [26, 224], strides = [1, 1]} : vector<28x224xbf16> to vector<26x224xbf16>
    %c0_84 = arith.constant 0 : index
    %c0_85 = arith.constant 0 : index
    %c0_86 = arith.constant 0 : index
    %119 = vector.load %arg12[%c0_84, %c0_85, %c0_86] : memref<3x224x104xbf16, #tpu.memory_space<vmem>>, vector<1x224x104xbf16>
    %120 = vector.shape_cast %119 : vector<1x224x104xbf16> to vector<224x104xbf16>
    %cst_87 = arith.constant dense<0.000000e+00> : vector<26x104xf32>
    %121 = tpu.matmul %118, %120, %cst_87 {dimension_numbers = #tpu.dot_dimension_numbers<[1], [0], [0], [1], [0, 0, 1, 1], [], []>} : vector<26x224xbf16>, vector<224x104xbf16>, vector<26x104xf32> -> vector<26x104xf32>
    %122 = arith.addf %117, %121 : vector<26x104xf32>
    %123 = vector.extract_strided_slice %95 {offsets = [1, 0], sizes = [26, 224], strides = [1, 1]} : vector<28x224xbf16> to vector<26x224xbf16>
    %c1_88 = arith.constant 1 : index
    %c0_89 = arith.constant 0 : index
    %c0_90 = arith.constant 0 : index
    %124 = vector.load %arg12[%c1_88, %c0_89, %c0_90] : memref<3x224x104xbf16, #tpu.memory_space<vmem>>, vector<1x224x104xbf16>
    %125 = vector.shape_cast %124 : vector<1x224x104xbf16> to vector<224x104xbf16>
    %cst_91 = arith.constant dense<0.000000e+00> : vector<26x104xf32>
    %126 = tpu.matmul %123, %125, %cst_91 {dimension_numbers = #tpu.dot_dimension_numbers<[1], [0], [0], [1], [0, 0, 1, 1], [], []>} : vector<26x224xbf16>, vector<224x104xbf16>, vector<26x104xf32> -> vector<26x104xf32>
    %127 = arith.addf %122, %126 : vector<26x104xf32>
    %128 = vector.extract_strided_slice %95 {offsets = [2, 0], sizes = [26, 224], strides = [1, 1]} : vector<28x224xbf16> to vector<26x224xbf16>
    %c2_92 = arith.constant 2 : index
    %c0_93 = arith.constant 0 : index
    %c0_94 = arith.constant 0 : index
    %129 = vector.load %arg12[%c2_92, %c0_93, %c0_94] : memref<3x224x104xbf16, #tpu.memory_space<vmem>>, vector<1x224x104xbf16>
    %130 = vector.shape_cast %129 : vector<1x224x104xbf16> to vector<224x104xbf16>
    %cst_95 = arith.constant dense<0.000000e+00> : vector<26x104xf32>
    %131 = tpu.matmul %128, %130, %cst_95 {dimension_numbers = #tpu.dot_dimension_numbers<[1], [0], [0], [1], [0, 0, 1, 1], [], []>} : vector<26x224xbf16>, vector<224x104xbf16>, vector<26x104xf32> -> vector<26x104xf32>
    %132 = arith.addf %127, %131 : vector<26x104xf32>
    %133 = vector.broadcast %96 : vector<1x104xf32> to vector<26x104xf32>
    %134 = arith.addf %132, %133 : vector<26x104xf32>
    %cst_96 = arith.constant 0.000000e+00 : f32
    %135 = vector.broadcast %cst_96 : f32 to vector<26x104xf32>
    %136 = arith.maximumf %134, %135 : vector<26x104xf32>
    %137 = arith.maximumf %116, %136 : vector<26x104xf32>
    %138 = arith.truncf %137 : vector<26x104xf32> to vector<26x104xbf16>
    %c0_97 = arith.constant 0 : index
    %c0_98 = arith.constant 0 : index
    %139 = vector.load %arg14[%c0_97, %c0_98] : memref<13x26xbf16, #tpu.memory_space<vmem>>, vector<13x26xbf16>
    %cst_99 = arith.constant dense<0.000000e+00> : vector<13x104xf32>
    %140 = tpu.matmul %139, %138, %cst_99 {dimension_numbers = #tpu.dot_dimension_numbers<[1], [0], [0], [1], [0, 0, 1, 1], [], []>} : vector<13x26xbf16>, vector<26x104xbf16>, vector<13x104xf32> -> vector<13x104xf32>
    %c0_100 = arith.constant 0 : index
    %c0_101 = arith.constant 0 : index
    %141 = vector.load %arg15[%c0_100, %c0_101] : memref<13x26xbf16, #tpu.memory_space<vmem>>, vector<13x26xbf16>
    %cst_102 = arith.constant dense<0.000000e+00> : vector<13x104xf32>
    %142 = tpu.matmul %141, %138, %cst_102 {dimension_numbers = #tpu.dot_dimension_numbers<[1], [0], [0], [1], [0, 0, 1, 1], [], []>} : vector<13x26xbf16>, vector<26x104xbf16>, vector<13x104xf32> -> vector<13x104xf32>
    %143 = arith.maximumf %140, %142 : vector<13x104xf32>
    %c0_103 = arith.constant 0 : index
    %c0_104 = arith.constant 0 : index
    %c0_105 = arith.constant 0 : index
    %144 = vector.load %arg16[%c0_103, %c0_104, %c0_105] : memref<3x13x104xf32, #tpu.memory_space<vmem>>, vector<1x13x104xf32>
    %145 = vector.shape_cast %144 : vector<1x13x104xf32> to vector<13x104xf32>
    %146 = arith.mulf %143, %145 : vector<13x104xf32>
    %cst_106 = arith.constant dense<0.000000e+00> : vector<13xf32>
    %147 = vector.multi_reduction <add>, %146, %cst_106 [1] : vector<13x104xf32> to vector<13xf32>
    %148 = vector.shape_cast %147 : vector<13xf32> to vector<13x1xf32>
    %cst_107 = arith.constant dense<0.000000e+00> : vector<1xf32>
    %149 = vector.multi_reduction <add>, %148, %cst_107 [0] : vector<13x1xf32> to vector<1xf32>
    %150 = vector.shape_cast %149 : vector<1xf32> to vector<1x1xf32>
    %c1_108 = arith.constant 1 : index
    %c0_109 = arith.constant 0 : index
    %c0_110 = arith.constant 0 : index
    %151 = vector.load %arg16[%c1_108, %c0_109, %c0_110] : memref<3x13x104xf32, #tpu.memory_space<vmem>>, vector<1x13x104xf32>
    %152 = vector.shape_cast %151 : vector<1x13x104xf32> to vector<13x104xf32>
    %153 = arith.mulf %143, %152 : vector<13x104xf32>
    %cst_111 = arith.constant dense<0.000000e+00> : vector<13xf32>
    %154 = vector.multi_reduction <add>, %153, %cst_111 [1] : vector<13x104xf32> to vector<13xf32>
    %155 = vector.shape_cast %154 : vector<13xf32> to vector<13x1xf32>
    %cst_112 = arith.constant dense<0.000000e+00> : vector<1xf32>
    %156 = vector.multi_reduction <add>, %155, %cst_112 [0] : vector<13x1xf32> to vector<1xf32>
    %157 = vector.shape_cast %156 : vector<1xf32> to vector<1x1xf32>
    %c2_113 = arith.constant 2 : index
    %c0_114 = arith.constant 0 : index
    %c0_115 = arith.constant 0 : index
    %158 = vector.load %arg16[%c2_113, %c0_114, %c0_115] : memref<3x13x104xf32, #tpu.memory_space<vmem>>, vector<1x13x104xf32>
    %159 = vector.shape_cast %158 : vector<1x13x104xf32> to vector<13x104xf32>
    %160 = arith.mulf %143, %159 : vector<13x104xf32>
    %cst_116 = arith.constant dense<0.000000e+00> : vector<13xf32>
    %161 = vector.multi_reduction <add>, %160, %cst_116 [1] : vector<13x104xf32> to vector<13xf32>
    %162 = vector.shape_cast %161 : vector<13xf32> to vector<13x1xf32>
    %cst_117 = arith.constant dense<0.000000e+00> : vector<1xf32>
    %163 = vector.multi_reduction <add>, %162, %cst_117 [0] : vector<13x1xf32> to vector<1xf32>
    %164 = vector.shape_cast %163 : vector<1xf32> to vector<1x1xf32>
    %165 = tpu.concatenate %150, %157, %164 in 1 : vector<1x1xf32>, vector<1x1xf32>, vector<1x1xf32> -> vector<1x3xf32>
    %c0_118 = arith.constant 0 : index
    %c0_119 = arith.constant 0 : index
    %166 = vector.load %arg17[%c0_118, %c0_119] : memref<1x3xf32, #tpu.memory_space<vmem>>, vector<1x3xf32>
    %167 = arith.addf %165, %166 : vector<1x3xf32>
    %c0_120 = arith.constant 0 : index
    %c0_121 = arith.constant 0 : index
    %c0_122 = arith.constant 0 : index
    %168 = vector.load %arg18[%c0_120, %c0_121, %c0_122] : memref<1x1x3xf32, #tpu.memory_space<vmem>>, vector<1x1x3xf32>
    %169 = vector.shape_cast %168 : vector<1x1x3xf32> to vector<1x3xf32>
    %170 = vector.shape_cast %167 : vector<1x3xf32> to vector<1x1x3xf32>
    tpu.vector_store %arg18[%c0_120, %c0_121, %c0_122], %170 {strides = array<i32>} : memref<1x1x3xf32, #tpu.memory_space<vmem>>, vector<1x1x3xf32>,
    return
  }
  func.func @transform_0(%arg0: i32) -> (i32, i32, i32) {
    %c0_i32 = arith.constant 0 : i32
    %c0_i32_0 = arith.constant 0 : i32
    %c0_i32_1 = arith.constant 0 : i32
    return %arg0, %c0_i32, %c0_i32_0 : i32, i32, i32
  }
  func.func @transform_1(%arg0: i32) -> (i32, i32, i32) {
    %c0_i32 = arith.constant 0 : i32
    %c0_i32_0 = arith.constant 0 : i32
    %c0_i32_1 = arith.constant 0 : i32
    %c0_i32_2 = arith.constant 0 : i32
    return %c0_i32, %c0_i32_0, %c0_i32_1 : i32, i32, i32
  }
  func.func @transform_2(%arg0: i32) -> (i32, i32) {
    %c0_i32 = arith.constant 0 : i32
    %c0_i32_0 = arith.constant 0 : i32
    %c0_i32_1 = arith.constant 0 : i32
    return %c0_i32, %c0_i32_0 : i32, i32
  }
  func.func @transform_3(%arg0: i32) -> (i32, i32, i32) {
    %c0_i32 = arith.constant 0 : i32
    %c0_i32_0 = arith.constant 0 : i32
    %c0_i32_1 = arith.constant 0 : i32
    %c0_i32_2 = arith.constant 0 : i32
    return %c0_i32, %c0_i32_0, %c0_i32_1 : i32, i32, i32
  }
  func.func @transform_4(%arg0: i32) -> (i32, i32, i32) {
    %c0_i32 = arith.constant 0 : i32
    %c0_i32_0 = arith.constant 0 : i32
    %c0_i32_1 = arith.constant 0 : i32
    %c0_i32_2 = arith.constant 0 : i32
    return %c0_i32, %c0_i32_0, %c0_i32_1 : i32, i32, i32
  }
  func.func @transform_5(%arg0: i32) -> (i32, i32) {
    %c0_i32 = arith.constant 0 : i32
    %c0_i32_0 = arith.constant 0 : i32
    %c0_i32_1 = arith.constant 0 : i32
    return %c0_i32, %c0_i32_0 : i32, i32
  }
  func.func @transform_6(%arg0: i32) -> (i32, i32) {
    %c0_i32 = arith.constant 0 : i32
    %c0_i32_0 = arith.constant 0 : i32
    %c0_i32_1 = arith.constant 0 : i32
    return %c0_i32, %c0_i32_0 : i32, i32
  }
  func.func @transform_7(%arg0: i32) -> (i32, i32) {
    %c0_i32 = arith.constant 0 : i32
    %c0_i32_0 = arith.constant 0 : i32
    %c0_i32_1 = arith.constant 0 : i32
    return %c0_i32, %c0_i32_0 : i32, i32
  }
  func.func @transform_8(%arg0: i32) -> (i32, i32, i32) {
    %c0_i32 = arith.constant 0 : i32
    %c0_i32_0 = arith.constant 0 : i32
    %c0_i32_1 = arith.constant 0 : i32
    %c0_i32_2 = arith.constant 0 : i32
    return %c0_i32, %c0_i32_0, %c0_i32_1 : i32, i32, i32
  }
  func.func @transform_9(%arg0: i32) -> (i32, i32) {
    %c0_i32 = arith.constant 0 : i32
    %c0_i32_0 = arith.constant 0 : i32
    %c0_i32_1 = arith.constant 0 : i32
    return %c0_i32, %c0_i32_0 : i32, i32
  }
  func.func @transform_10(%arg0: i32) -> (i32, i32, i32) {
    %c0_i32 = arith.constant 0 : i32
    %c0_i32_0 = arith.constant 0 : i32
    %c0_i32_1 = arith.constant 0 : i32
    %c0_i32_2 = arith.constant 0 : i32
    return %c0_i32, %c0_i32_0, %c0_i32_1 : i32, i32, i32
  }
  func.func @transform_11(%arg0: i32) -> (i32, i32, i32) {
    %c0_i32 = arith.constant 0 : i32
    %c0_i32_0 = arith.constant 0 : i32
    %c0_i32_1 = arith.constant 0 : i32
    %c0_i32_2 = arith.constant 0 : i32
    return %c0_i32, %c0_i32_0, %c0_i32_1 : i32, i32, i32
  }
  func.func @transform_12(%arg0: i32) -> (i32, i32) {
    %c0_i32 = arith.constant 0 : i32
    %c0_i32_0 = arith.constant 0 : i32
    %c0_i32_1 = arith.constant 0 : i32
    return %c0_i32, %c0_i32_0 : i32, i32
  }
  func.func @transform_13(%arg0: i32) -> (i32, i32) {
    %c0_i32 = arith.constant 0 : i32
    %c0_i32_0 = arith.constant 0 : i32
    %c0_i32_1 = arith.constant 0 : i32
    return %c0_i32, %c0_i32_0 : i32, i32
  }
  func.func @transform_14(%arg0: i32) -> (i32, i32) {
    %c0_i32 = arith.constant 0 : i32
    %c0_i32_0 = arith.constant 0 : i32
    %c0_i32_1 = arith.constant 0 : i32
    return %c0_i32, %c0_i32_0 : i32, i32
  }
  func.func @transform_15(%arg0: i32) -> (i32, i32, i32) {
    %c0_i32 = arith.constant 0 : i32
    %c0_i32_0 = arith.constant 0 : i32
    %c0_i32_1 = arith.constant 0 : i32
    %c0_i32_2 = arith.constant 0 : i32
    return %c0_i32, %c0_i32_0, %c0_i32_1 : i32, i32, i32
  }
  func.func @transform_16(%arg0: i32) -> (i32, i32) {
    %c0_i32 = arith.constant 0 : i32
    %c0_i32_0 = arith.constant 0 : i32
    %c0_i32_1 = arith.constant 0 : i32
    return %c0_i32, %c0_i32_0 : i32, i32
  }
  func.func @transform_17(%arg0: i32) -> (i32, i32, i32) {
    %c0_i32 = arith.constant 0 : i32
    %c0_i32_0 = arith.constant 0 : i32
    %c0_i32_1 = arith.constant 0 : i32
    return %arg0, %c0_i32, %c0_i32_0 : i32, i32, i32
  }
}

</mosaic_0001>

<bundles_post_ra>
// kernel: tiny_vgg_forward_impl.1
= control target key start
LH: loop header
LB: loop body
LE: loop exit
PB: predicated region body
PF: predicated region fallthrough
CT: control target
= control target key end

     0   :  { %s13886_s0 = inlined_call_operand.vmem [shape: f32[2,64,192], index: 0, kind: input, shape index: {}]   ;;  %s13887_s1 = inlined_call_operand.vmem [shape: bf16[3,192,496], index: 1, kind: input, shape index: {}]   ;;  %s13888_s2 = inlined_call_operand.vmem [shape: f32[1,496], index: 2, kind: input, shape index: {}]   ;;  %s13889_s3 = inlined_call_operand.vmem [shape: bf16[3,496,240], index: 3, kind: input, shape index: {}]   ;;  %s13890_s4 = inlined_call_operand.vmem [shape: bf16[3,496,240], index: 4, kind: input, shape index: {}]   ;;  %s13891_s5 = inlined_call_operand.vmem [shape: f32[1,240], index: 5, kind: input, shape index: {}]   ;;  %s13892_s6 = inlined_call_operand.vmem [shape: bf16[30,60], index: 6, kind: input, shape index: {}]   ;;  %s13893_s7 = inlined_call_operand.vmem [shape: bf16[30,60], index: 7, kind: input, shape index: {}]   ;;  %s13894_s8 = inlined_call_operand.vmem [shape: bf16[3,240,224], index: 8, kind: input, shape index: {}]   ;;  %s13895_s9 = inlined_call_operand.vmem [shape: f32[1,224], index: 9, kind: input, shape index: {}]   ;;  %s13896_s10 = inlined_call_operand.vmem [shape: bf16[3,224,104], index: 10, kind: input, shape index: {}]   ;;  %s13897_s11 = inlined_call_operand.vmem [shape: bf16[3,224,104], index: 11, kind: input, shape index: {}]   ;;  %s13898_s12 = inlined_call_operand.vmem [shape: f32[1,104], index: 12, kind: input, shape index: {}]   ;;  %s13899_s13 = inlined_call_operand.vmem [shape: bf16[13,26], index: 13, kind: input, shape index: {}]   ;;  %s13900_s14 = inlined_call_operand.vmem [shape: bf16[13,26], index: 14, kind: input, shape index: {}]   ;;  %s13901_s15 = inlined_call_operand.vmem [shape: f32[3,13,104], index: 15, kind: input, shape index: {}]   ;;  %s13902_s16 = inlined_call_operand.vmem [shape: f32[1,3], index: 16, kind: input, shape index: {}]   ;;  %s13903_s17 = inlined_call_operand.hbm [shape: f32[2,1,3], index: 17, kind: output, shape index: {}]  }
   0x1   :  { %13920 = sst [smem:[#allocation27_spill]] %s13886_s0 }
   0x2   :  { %13921 = sst [smem:[#allocation28_spill]] %s13887_s1 }
   0x3   :  { %13922 = sst [smem:[#allocation29_spill]] %s13888_s2 }
   0x4   :  { %13923 = sst [smem:[#allocation30_spill]] %s13902_s16 }
   0x5   :  { %13924 = sst [smem:[#allocation31_spill]] %s13903_s17 }
   0x6   :  { %22 = vsyncpa [#allocation3], 0 }
   0x7   :  { %24 = vsyncpa [#allocation3 + $0x1], 0  ;;  %s10403_s24 = smov 0   ;;  %s10405_s25 = smov 0  }
   0x8   :  { %s10407_s26 = smov 0   ;;  %s10409_s27 = smov 0  }
   0x9 LB: > { %13925 = sst [smem:[#allocation5_spill]] %s10295_s24  ;;  %s10424_s28 = sadd.s32 4294967295, %s10307_s27   ;;  %s10307_s27 = sphi %s10409_s27, %s14008_s27   ;;  %s10303_s26 = sphi %s10407_s26, %s14010_s26   ;;  %s10299_s25 = sphi %s10405_s25, %s14012_s25   ;;  %s10295_s24 = sphi %s10403_s24, %s14011_s24  }
   0xa   : > { %13926 = sst [smem:[#allocation6_spill]] %s10303_s26  ;;  %s7883_s29 = sadd.s32 4294967294, %s10307_s27  }
   0xb   : > { %13927 = sst [smem:[#allocation7_spill]] %s10307_s27  ;;  %s10428_s0 = sadd.s32 1, %s10307_s27  }
   0xc   : > { %13928 = sst [smem:[#allocation8_spill]] %s10428_s0  ;;  %s399_s30 = sadd.s32 1, %s10303_s26 }
   0xd   : > { %s396_s18 = ssub.s32 %s10307_s27, %s10428_s0  ;;  %p409_p0 = scmp.ne.s32.totalorder %s10303_s26, %s10299_s25 }
   0xe   : > { %p397_p1 = scmp.eq.s32.totalorder %s396_s18, 0  ;;  %p410_p2 = scmp.eq.s32.totalorder %s10424_s28, 1 }
   0xf   : > { %p415_p3 = scmp.ne.s32.totalorder %s10299_s25, %s10295_s24  ;;  %p416_p4 = scmp.eq.s32.totalorder %s7883_s29, 1 }
  0x10   : > { %s10439_s19 = scalar_select %p397_p1, %s10303_s26, %s399_s30  }
  0x11   : > { %p10441_p5 = por %p410_p2, %p409_p0  ;;  %p10445_p6 = por %p416_p4, %p415_p3 }
  0x12   : > { %13929 = sst [smem:[#allocation9_spill]] %s10439_s19  ;;  %p7886_p7 = scmp.ge.s32.totalorder %s10307_s27, 1 }
  0x13   : > { %s13931_s20 = scalar_select %p10445_p6, 1, 0 }
  0x14   : > { %p490_p8 = scmp.lt.s32.totalorder %s10307_s27, 3 }
  0x15   : > { %13932 = sst [smem:[#allocation10_spill]] %s13931_s20 }
  0x16   : > { %p491_p9 = pnand %p7886_p7, %p490_p8 }
  0x18   : > { %494 = sbr.rel (%p491_p9) target bundleno = 2261 (0x8d5), region = 88 }
  0x1d   : > { %s13933_s23 = sld [smem:[#allocation28_spill]]  ;;  %p541_p10 = scmp.lt.s32.totalorder %s10424_s28, 1  ;;  %vm668_vm0 = vsmask.f32 7424  ;;  %vm975_vm1 = vcmask 523264   ;;  %vm1585_vm2 = vcmask 1046528  }
  0x1e   : > { %s13934_s22 = sld [smem:[#allocation27_spill]]  ;;  %vm2708_vm3 = vcmask 916480   ;;  %vm5626_vm4 = vcmask 1045504   ;;  %vm5619_vm5 = vcmask 490496   ;;  %vm6746_vm6 = vcmask 785408   ;;  %s539_s17 = sand.u32 1, %s10299_s25  }
  0x1f   : > { %s542_s18 = scalar_select %p541_p10, %s10424_s28, 1  ;;  %vm10311_vm7 = vmmov 0   ;;  %vm7651_vm8 = vcmask 1044480   ;;  %vm7647_vm9 = vcmask 211968   ;;  %vm7753_vm10 = vcmask 850944  }
  0x20   : > { %s13949_s2 = sld [smem:[#allocation29_spill]]  ;;  %vm7757_vm11 = vcmask 847872   ;;  %vm7807_vm12 = vcmask 7168   ;;  %vm7809_vm13 = vcmask 15360   ;;  %s9180_s20 = sshll.u32 %s10424_s28, 4  ;;  %vm7813_vm14 = vcmask 16384  }
  0x21   : > { %s9183_s21 = sshll.u32 %s542_s18, 7  ;;  %s14002_s18 = sld [smem:[#allocation30_spill]] }
  0x22   : > { %s14003_s26 = sld [smem:[#allocation31_spill]]  ;;  %s7816_s16 = scalar_lea.sflag [#allocation3], %s539_s17 }
  0x23   : > { %v9248_v0 = vld [vmem:[%s13933_s23 + $0x264] ss:$16 sps:$4 sm:$0xff]   ;;  %v9250_v1 = vld [vmem:[%s13933_s23 + $0x26c] ss:$16 sps:$4 sm:$0xff]   ;;  %v9252_v2 = vld [vmem:[%s13933_s23 + $0x260] ss:$16 sps:$4 sm:$0xff]  }
  0x24   : > { %988 = vmatprep.subr.bf16.mxu0 %v9248_v0  ;;  %v9253_v3 = vld [vmem:[%s13933_s23 + $0x268] ss:$16 sps:$4 sm:$0xff]   ;;  %1061 = vmatprep.subr.bf16.mxu1 %v9250_v1  ;;  %v9254_v4 = vld [vmem:[%s13933_s23 + $0x244] ss:$16 sps:$4 sm:$0xff]   ;;  %v9256_v5 = vld [vmem:[%s13933_s23 + $0x24c] ss:$16 sps:$4 sm:$0xff]   ;;  %s10558_s29 = scalar_lea.vmem %s13934_s22, %s9183_s21 }
  0x25   : > { %989 = vmatpush1.bf16.msra.mxu0 %v9252_v2  ;;  %1062 = vmatpush1.bf16.msra.mxu1 %v9253_v3  ;;  %v9258_v6 = vld [vmem:[%s13933_s23 + $0x240] ss:$16 sps:$4 sm:$0xff]   ;;  %v9259_v7 = vld [vmem:[%s13933_s23 + $0x248] ss:$16 sps:$4 sm:$0xff]   ;;  %v9260_v8 = vld [vmem:[%s13933_s23 + $0x224] ss:$16 sps:$4 sm:$0xff]  }
  0x26   : > { %990 = vmatprep.subr.bf16.mxu0 %v9254_v4  ;;  %1063 = vmatprep.subr.bf16.mxu1 %v9256_v5  ;;  %v9262_v9 = vld [vmem:[%s13933_s23 + $0x22c] ss:$16 sps:$4 sm:$0xff]   ;;  %v9264_v10 = vld [vmem:[%s13933_s23 + $0x220] ss:$16 sps:$4 sm:$0xff]   ;;  %v9265_v11 = vld [vmem:[%s13933_s23 + $0x228] ss:$16 sps:$4 sm:$0xff]  }
  0x27   : > { %v9266_v12 = vld [vmem:[%s13933_s23 + $0x204] ss:$16 sps:$4 sm:$0xff]   ;;  %v9268_v13 = vld [vmem:[%s13933_s23 + $0x20c] ss:$16 sps:$4 sm:$0xff]   ;;  %v9270_v14 = vld [vmem:[%s13933_s23 + $0x200] ss:$16 sps:$4 sm:$0xff]  }
  0x28   : > { %v9271_v15 = vld [vmem:[%s13933_s23 + $0x208] ss:$16 sps:$4 sm:$0xff]   ;;  %v9272_v16 = vld [vmem:[%s13933_s23 + $0x1e4] ss:$16 sps:$4 sm:$0xff]   ;;  %v9274_v17 = vld [vmem:[%s13933_s23 + $0x1ec] ss:$16 sps:$4 sm:$0xff]   ;;  %s14004_s21 = smov %s14003_s26  ;;  %s7826_s0 = scalar_lea.hbm %s14003_s26, %s9180_s20 }
  0x29   : > { %991 = vmatpush1.bf16.msra.mxu0 %v9258_v6  ;;  %1064 = vmatpush1.bf16.msra.mxu1 %v9259_v7  ;;  %v9276_v18 = vld [vmem:[%s13933_s23 + $0x1e0] ss:$16 sps:$4 sm:$0xff]   ;;  %v9277_v19 = vld [vmem:[%s13933_s23 + $0x1e8] ss:$16 sps:$4 sm:$0xff]   ;;  %v9278_v20 = vld [vmem:[%s13933_s23 + $0x1c4] ss:$16 sps:$4 sm:$0xff]  }
  0x2a   : > { %992 = vmatprep.subr.bf16.mxu0 %v9260_v8  ;;  %1065 = vmatprep.subr.bf16.mxu1 %v9262_v9  ;;  %v9280_v21 = vld [vmem:[%s13933_s23 + $0x1cc] ss:$16 sps:$4 sm:$0xff]   ;;  %v9282_v22 = vld [vmem:[%s13933_s23 + $0x1c0] ss:$16 sps:$4 sm:$0xff]   ;;  %v9283_v23 = vld [vmem:[%s13933_s23 + $0x1c8] ss:$16 sps:$4 sm:$0xff]  }
  0x2b   : > { %v9284_v24 = vld [vmem:[%s13933_s23 + $0x1a4] ss:$16 sps:$4 sm:$0xff]   ;;  %v9286_v25 = vld [vmem:[%s13933_s23 + $0x1ac] ss:$16 sps:$4 sm:$0xff]   ;;  %v9288_v26 = vld [vmem:[%s13933_s23 + $0x1a0] ss:$16 sps:$4 sm:$0xff]  }
  0x2c   : > { %v9289_v27 = vld [vmem:[%s13933_s23 + $0x1a8] ss:$16 sps:$4 sm:$0xff]   ;;  %v9290_v28 = vld [vmem:[%s13933_s23 + $0x184] ss:$16 sps:$4 sm:$0xff]   ;;  %v9292_v29 = vld [vmem:[%s13933_s23 + $0x18c] ss:$16 sps:$4 sm:$0xff]  }
  0x2d   : > { %993 = vmatpush1.bf16.msra.mxu0 %v9264_v10  ;;  %1066 = vmatpush1.bf16.msra.mxu1 %v9265_v11  ;;  %v9294_v30 = vld [vmem:[%s13933_s23 + $0x180] ss:$16 sps:$4 sm:$0xff]   ;;  %v9295_v31 = vld [vmem:[%s13933_s23 + $0x188] ss:$16 sps:$4 sm:$0xff]   ;;  %v9296_v32 = vld [vmem:[%s13933_s23 + $0x2e4] ss:$16 sps:$4 sm:$0xff]  }
  0x2e   : > { %994 = vmatprep.subr.bf16.mxu0 %v9266_v12  ;;  %1067 = vmatprep.subr.bf16.mxu1 %v9268_v13  ;;  %v9298_v33 = vld [vmem:[%s13933_s23 + $0x2ec] ss:$16 sps:$4 sm:$0xff]   ;;  %v9300_v34 = vld [vmem:[%s13933_s23 + $0x2e0] ss:$16 sps:$4 sm:$0xff]   ;;  %v9301_v35 = vld [vmem:[%s13933_s23 + $0x2e8] ss:$16 sps:$4 sm:$0xff]  }
  0x2f   : > { %v9302_v36 = vld [vmem:[%s13933_s23 + $0x2c4] ss:$16 sps:$4 sm:$0xff]   ;;  %v9304_v37 = vld [vmem:[%s13933_s23 + $0x2cc] ss:$16 sps:$4 sm:$0xff]   ;;  %v9306_v49 = vld [vmem:[%s13933_s23 + $0x2c0] ss:$16 sps:$4 sm:$0xff]  }
  0x30   : > { %v548_v38 = vld [vmem:[%s10558_s29 + $0x8] sm:$0xff]  ;;  %v550_v39 = vld [vmem:[%s10558_s29 + $0x18] sm:$0xff]  ;;  %v547_v43 = vld [vmem:[%s10558_s29] sm:$0xff]  ;;  %s540_s22 = scalar_lea.vmem [#allocation2], %s539_s17 }
  0x31   : > { %995 = vmatpush1.bf16.msra.mxu0 %v9270_v14  ;;  %1068 = vmatpush1.bf16.msra.mxu1 %v9271_v15  ;;  %v552_v40 = vld [vmem:[%s10558_s29 + $0x28] sm:$0xff]  ;;  %v554_v41 = vld [vmem:[%s10558_s29 + $0x38] sm:$0xff]  ;;  %v10576_v42 = vpack.c.bf16 %v550_v39, %v548_v38  ;;  %v549_v44 = vld [vmem:[%s10558_s29 + $0x10] sm:$0xff]  ;;  %s7828_s27 = sshll.u32 %s540_s22, 4  ;;  %s7829_s27 = int_to_ptr.vmem [resolvable:$true] %s7828_s27 }
  0x32   : > { %996 = vmatprep.subr.bf16.mxu0 %v9272_v16  ;;  %1069 = vmatprep.subr.bf16.mxu1 %v9274_v17  ;;  %v10580_v45 = vpack.c.bf16 %v554_v41, %v552_v40  ;;  %v551_v46 = vld [vmem:[%s10558_s29 + $0x20] sm:$0xff]  ;;  %v553_v47 = vld [vmem:[%s10558_s29 + $0x30] sm:$0xff]  ;;  %v10584_v48 = vpack.c.bf16 %v549_v44, %v547_v43  ;;  %v9307_v52 = vld [vmem:[%s13933_s23 + $0x2c8] ss:$16 sps:$4 sm:$0xff]  }
  0x33   : > { %v682_v50 = vshrl.u32 %v10576_v42, 16  ;;  %v684_v51 = vshll.u32 %v10576_v42, 16  ;;  %v9308_v53 = vld [vmem:[%s13933_s23 + $0x2a4] ss:$16 sps:$4 sm:$0xff]   ;;  %v10598_v55 = vpack.c.bf16 %v553_v47, %v551_v46  ;;  %v9310_v57 = vld [vmem:[%s13933_s23 + $0x2ac] ss:$16 sps:$4 sm:$0xff]  }
  0x34   : > { %v689_v54 = vshll.u32 %v10580_v45, 16  ;;  %v672_v56 = vshll.u32 %v10584_v48, 16  ;;  %v9312_v60 = vld [vmem:[%s13933_s23 + $0x2a0] ss:$16 sps:$4 sm:$0xff]   ;;  %v9313_v62 = vld [vmem:[%s13933_s23 + $0x2a8] ss:$16 sps:$4 sm:$0xff]  }
  0x35   : > { %997 = vmatpush1.bf16.msra.mxu0 %v9276_v18  ;;  %1070 = vmatpush1.bf16.msra.mxu1 %v9277_v19  ;;  %v686_v58 = vrot.slane %v684_v51, 1  ;;  %v670_v63 = vshrl.u32 %v10584_v48, 16  ;;  %v677_v1 = vshll.u32 %v10598_v55, 16  ;;  %v9314_v2 = vld [vmem:[%s13933_s23 + $0x284] ss:$16 sps:$4 sm:$0xff]   ;;  %v701_v12 = vshrl.u32 %v10580_v45, 16 }
  0x36   : > { %998 = vmatprep.subr.bf16.mxu0 %v9278_v20  ;;  %1071 = vmatprep.subr.bf16.mxu1 %v9280_v21  ;;  %v691_v59 = vrot.slane %v689_v54, 1  ;;  %v674_v0 = vrot.slane %v672_v56, 1  ;;  %v9316_v3 = vld [vmem:[%s13933_s23 + $0x28c] ss:$16 sps:$4 sm:$0xff]   ;;  %v9318_v5 = vld [vmem:[%s13933_s23 + $0x280] ss:$16 sps:$4 sm:$0xff]  }
  0x37   : > { %v687_v61 = vor.u32 %v686_v58, %v682_v50  ;;  %v9319_v6 = vld [vmem:[%s13933_s23 + $0x288] ss:$16 sps:$4 sm:$0xff]   ;;  %v679_v8 = vrot.slane %v677_v1, 1  ;;  %v9322_v9 = vld [vmem:[%s13933_s23 + $0xe4] ss:$16 sps:$4 sm:$0xff]   ;;  %v693_v18 = vshrl.u32 %v10598_v55, 16 }
  0x38   : > { %v675_v7 = vor.u32 %v674_v0, %v670_v63  ;;  %v9325_v10 = vld [vmem:[%s13933_s23 + $0xec] ss:$16 sps:$4 sm:$0xff]   ;;  %v9320_v11 = vld [vmem:[%s13933_s23 + $0xe0] ss:$16 sps:$4 sm:$0xff]   ;;  %v9323_v13 = vld [vmem:[%s13933_s23 + $0xe8] ss:$16 sps:$4 sm:$0xff]  }
  0x39   : > { %999 = vmatpush1.bf16.msra.mxu0 %v9282_v22  ;;  %1072 = vmatpush1.bf16.msra.mxu1 %v9283_v23  ;;  %v692_v4 = vsel %vm668_vm0, %v687_v61, %v691_v59  ;;  %v9328_v15 = vld [vmem:[%s13933_s23 + $0xc4] ss:$16 sps:$4 sm:$0xff]   ;;  %v9331_v16 = vld [vmem:[%s13933_s23 + $0xcc] ss:$16 sps:$4 sm:$0xff]   ;;  %v9338_v51 = vld [vmem:[%s13933_s23 + $0x80] ss:$16 sps:$4 sm:$0xff]  }
  0x3a   : > { %1000 = vmatprep.subr.bf16.mxu0 %v9284_v24  ;;  %1073 = vmatprep.subr.bf16.mxu1 %v9286_v25  ;;  %v680_v14 = vsel %vm668_vm0, %v675_v7, %v679_v8  ;;  %v556_v17 = vld [vmem:[%s10558_s29 + $0x48] sm:$0xff]  ;;  %v558_v19 = vld [vmem:[%s10558_s29 + $0x58] sm:$0xff]  ;;  %v555_v20 = vld [vmem:[%s10558_s29 + $0x40] sm:$0xff]  ;;  %v703_v25 = vor.u32 %v701_v12, %v691_v59 }
  0x3b   : > { %7985 = vmatprep.mubr.msk.bf16.mxu0 %vm975_vm1, %v692_v4  ;;  %7989 = vmatprep.mubr.msk.bf16.mxu1 %vm975_vm1, %v692_v4  ;;  %v557_v21 = vld [vmem:[%s10558_s29 + $0x50] sm:$0xff]  ;;  %v10652_v22 = vpack.c.bf16 %v558_v19, %v556_v17  ;;  %v562_v41 = vld [vmem:[%s10558_s29 + $0x78] sm:$0xff]  ;;  %v559_v43 = vld [vmem:[%s10558_s29 + $0x60] sm:$0xff] }
  0x3c   : > { %v10654_v23 = vpack.c.bf16 %v557_v21, %v555_v20  ;;  %v9326_v24 = vld [vmem:[%s13933_s23 + $0xc0] ss:$16 sps:$4 sm:$0xff]   ;;  %v9343_v47 = vld [vmem:[%s13933_s23 + $0x8c] ss:$16 sps:$4 sm:$0xff]   ;;  %v9352_v4 = vld [vmem:[%s13933_s23 + $0x44] ss:$16 sps:$4 sm:$0xff]  }
  0x3d   : > { %1001 = vmatpush1.bf16.msra.mxu0 %v9288_v26  ;;  %1074 = vmatpush1.bf16.msra.mxu1 %v9289_v27  ;;  %v9329_v26 = vld [vmem:[%s13933_s23 + $0xc8] ss:$16 sps:$4 sm:$0xff]   ;;  %v9334_v27 = vld [vmem:[%s13933_s23 + $0xa4] ss:$16 sps:$4 sm:$0xff]   ;;  %v717_v38 = vshrl.u32 %v10652_v22, 16  ;;  %v1594_v63 = vrot.slane %v10652_v22, 1 }
  0x3e   : > { %1002 = vmatprep.subr.bf16.mxu0 %v9290_v28  ;;  %1075 = vmatprep.subr.bf16.mxu1 %v9292_v29  ;;  %v705_v28 = vshll.u32 %v10652_v22, 16  ;;  %v695_v29 = vor.u32 %v693_v18, %v679_v8  ;;  %v561_v44 = vld [vmem:[%s10558_s29 + $0x70] sm:$0xff]  ;;  %v709_v46 = vshrl.u32 %v10654_v23, 16  ;;  %v9349_v59 = vld [vmem:[%s13933_s23 + $0x6c] ss:$16 sps:$4 sm:$0xff]  }
  0x3f   : > { %v10692_v50 = vpack.c.bf16 %v561_v44, %v559_v43  ;;  %v9344_v1 = vld [vmem:[%s13933_s23 + $0x60] ss:$16 sps:$4 sm:$0xff]   ;;  %v9359_v18 = vld [vmem:[%s13933_s23 + $0x28] ss:$16 sps:$4 sm:$0xff]   ;;  %v9364_v20 = vld [vmem:[%s13933_s23 + $0x4] ss:$16 sps:$4 sm:$0xff]  }
  0x40   : > { %v9350_v12 = vld [vmem:[%s13933_s23 + $0x40] ss:$16 sps:$4 sm:$0xff]   ;;  %v9367_v21 = vld [vmem:[%s13933_s23 + $0xc] ss:$16 sps:$4 sm:$0xff]   ;;  %v9394_v43 = vld [vmem:[%s13933_s23 + $0x3e4] ss:$16 sps:$4 sm:$0xff]  }
  0x41   : > { %1003 = vmatpush1.bf16.msra.mxu0 %v9294_v30  ;;  %1076 = vmatpush1.bf16.msra.mxu1 %v9295_v31  ;;  %v697_v30 = vshll.u32 %v10654_v23, 16  ;;  %v9337_v31 = vld [vmem:[%s13933_s23 + $0xac] ss:$16 sps:$4 sm:$0xff]   ;;  %v713_v56 = vshll.u32 %v10692_v50, 16  ;;  %v10734_v8 = vrot.slane %v10692_v50, 1 }
  0x42   : > { %1012 = vmatprep.subr.bf16.mxu0 %v9296_v32  ;;  %1085 = vmatprep.subr.bf16.mxu1 %v9298_v33  ;;  %v9332_v32 = vld [vmem:[%s13933_s23 + $0xa0] ss:$16 sps:$4 sm:$0xff]   ;;  %v707_v33 = vrot.slane %v705_v28, 1  ;;  %v9397_v44 = vld [vmem:[%s13933_s23 + $0x3ec] ss:$16 sps:$4 sm:$0xff]  }
  0x43   : > { %v715_v61 = vrot.slane %v713_v56, 1  ;;  %v9356_v17 = vld [vmem:[%s13933_s23 + $0x20] ss:$16 sps:$4 sm:$0xff]   ;;  %v9406_v56 = vld [vmem:[%s13933_s23 + $0x3a4] ss:$16 sps:$4 sm:$0xff]  }
  0x44   : > { %v708_v39 = vsel %vm668_vm0, %v703_v25, %v707_v33  ;;  %v9365_v25 = vld [vmem:[%s13933_s23 + $0x8] ss:$16 sps:$4 sm:$0xff]   ;;  %v9368_v28 = vld [vmem:[%s13933_s23 + $0x160] ss:$16 sps:$4 sm:$0xff]  }
  0x45   : > { %1013 = vmatpush2.bf16.msra.mxu0 %v9300_v34  ;;  %1086 = vmatpush2.bf16.msra.mxu1 %v9301_v35  ;;  %v699_v34 = vrot.slane %v697_v30, 1  ;;  %v9335_v35 = vld [vmem:[%s13933_s23 + $0xa8] ss:$16 sps:$4 sm:$0xff]   ;;  %v9376_v30 = vld [vmem:[%s13933_s23 + $0x144] ss:$16 sps:$4 sm:$0xff]  }
  0x46   : > { %1014 = vmatprep.subr.bf16.mxu0 %v9302_v36  ;;  %1087 = vmatprep.subr.bf16.mxu1 %v9304_v37  ;;  %v9340_v36 = vld [vmem:[%s13933_s23 + $0x84] ss:$16 sps:$4 sm:$0xff]   ;;  %v560_v37 = vld [vmem:[%s10558_s29 + $0x68] sm:$0xff]  ;;  %s10312_s29 = smov [#allocation2]  }
  0x47   : > { %v700_v40 = vsel %vm668_vm0, %v695_v29, %v699_v34  ;;  %v711_v58 = vor.u32 %v709_v46, %v699_v34  ;;  %v9371_v29 = vld [vmem:[%s13933_s23 + $0x168] ss:$16 sps:$4 sm:$0xff]   ;;  %v9382_v34 = vld [vmem:[%s13933_s23 + $0x124] ss:$16 sps:$4 sm:$0xff]   ;;  %v9392_v46 = vld [vmem:[%s13933_s23 + $0x3e0] ss:$16 sps:$4 sm:$0xff]  }
  0x48   : > { %s10251_s28 = sshll.u32 %s10312_s29, 4  ;;  %s10252_s28 = int_to_ptr.vmem [resolvable:$false] %s10251_s28 }
  0x49   : > { %1015 = vmatpush2.bf16.msra.mxu0 %v9306_v49  ;;  %1088 = vmatpush2.bf16.msra.mxu1 %v9307_v52  ;;  %v10690_v49 = vpack.c.bf16 %v562_v41, %v560_v37  ;;  %v9341_v52 = vld [vmem:[%s13933_s23 + $0x88] ss:$16 sps:$4 sm:$0xff]   ;;  %s10253_s24 = scalar_lea.vmem %s10252_s28, 32  ;;  %p10254_p0 = scmp.lt.s32.totalorder %s7829_s27, %s10252_s28 }
  0x4a   : > { %1016 = vmatprep.subr.bf16.mxu0 %v9308_v53  ;;  %1089 = vmatprep.subr.bf16.mxu1 %v9310_v57  ;;  %v719_v53 = vor.u32 %v717_v38, %v707_v33  ;;  %v9346_v57 = vld [vmem:[%s13933_s23 + $0x64] ss:$16 sps:$4 sm:$0xff]   ;;  %v9377_v33 = vld [vmem:[%s13933_s23 + $0x148] ss:$16 sps:$4 sm:$0xff]  }
  0x4b   : > { %v721_v54 = vshll.u32 %v10690_v49, 16  ;;  %v10713_v0 = vrot.slane %v10690_v49, 1  ;;  %v9383_v37 = vld [vmem:[%s13933_s23 + $0x128] ss:$16 sps:$4 sm:$0xff]   ;;  %v9388_v38 = vld [vmem:[%s13933_s23 + $0x104] ss:$16 sps:$4 sm:$0xff]  }
  0x4c   : > { %v9389_v41 = vld [vmem:[%s13933_s23 + $0x108] ss:$16 sps:$4 sm:$0xff]  }
  0x4d   : > { %1017 = vmatpush2.bf16.msra.mxu0 %v9312_v60  ;;  %1090 = vmatpush2.bf16.msra.mxu1 %v9313_v62  ;;  %v723_v60 = vrot.slane %v721_v54, 1  ;;  %v728_v62 = vshrl.u32 %v10690_v49, 16  ;;  %v10731_v7 = vsel %vm1585_vm2, %v1594_v63, %v10713_v0  ;;  %v9401_v54 = vld [vmem:[%s13933_s23 + $0x3c8] ss:$16 sps:$4 sm:$0xff]  }
  0x4e   : > { %1018 = vmatprep.subr.bf16.mxu0 %v9314_v2  ;;  %1091 = vmatprep.subr.bf16.mxu1 %v9316_v3  ;;  %v9347_v2 = vld [vmem:[%s13933_s23 + $0x68] ss:$16 sps:$4 sm:$0xff]  }
  0x4f   : > { %v724_v3 = vsel %vm668_vm0, %v719_v53, %v723_v60  ;;  %v9398_v53 = vld [vmem:[%s13933_s23 + $0x3c0] ss:$16 sps:$4 sm:$0xff]  }
  0x51   : > { %1019 = vmatpush2.bf16.msra.mxu0 %v9318_v5  ;;  %1092 = vmatpush2.bf16.msra.mxu1 %v9319_v6  ;;  %v716_v5 = vsel %vm668_vm0, %v711_v58, %v715_v61  ;;  %v1592_v6 = vrot.slane %v10654_v23, 1  ;;  %v9404_v58 = vld [vmem:[%s13933_s23 + $0x3a0] ss:$16 sps:$4 sm:$0xff]  }
  0x52   : > { %1382 = vmatprep.subr.bf16.mxu0 %v9322_v9  ;;  %1455 = vmatprep.subr.bf16.mxu1 %v9325_v10  ;;  %v9355_v9 = vld [vmem:[%s13933_s23 + $0x4c] ss:$16 sps:$4 sm:$0xff]   ;;  %v730_v10 = vor.u32 %v728_v62, %v723_v60  ;;  %v9412_v60 = vld [vmem:[%s13933_s23 + $0x384] ss:$16 sps:$4 sm:$0xff]   ;;  %v9410_v62 = vld [vmem:[%s13933_s23 + $0x380] ss:$16 sps:$4 sm:$0xff]  }
  0x54   : > { %1021 = vmatmul.mubr.bf16.vlgmr.msra.gmra.mxu0 %v680_v14  ;;  %1094 = vmatmul.mubr.bf16.vlgmr.msra.gmra.mxu1 %v680_v14  ;;  %v725_v14 = vshrl.u32 %v10692_v50, 16 }
  0x55   : > { %1383 = vmatpush1.bf16.msra.mxu0 %v9320_v11  ;;  %1456 = vmatpush1.bf16.msra.mxu1 %v9323_v13  ;;  %v10745_v11 = vsel %vm1585_vm2, %v1592_v6, %v10734_v8  ;;  %v9353_v13 = vld [vmem:[%s13933_s23 + $0x48] ss:$16 sps:$4 sm:$0xff]  }
  0x56   : > { %1384 = vmatprep.subr.bf16.mxu0 %v9328_v15  ;;  %1457 = vmatprep.subr.bf16.mxu1 %v9331_v16  ;;  %v9358_v15 = vld [vmem:[%s13933_s23 + $0x24] ss:$16 sps:$4 sm:$0xff]   ;;  %v9361_v16 = vld [vmem:[%s13933_s23 + $0x2c] ss:$16 sps:$4 sm:$0xff]   ;;  %v727_v19 = vor.u32 %v725_v14, %v715_v61 }
  0x57   : > { %7990 = vmatprep.mubr.msk.bf16.mxu1 %vm975_vm1, %v708_v39  ;;  %7986 = vmatprep.mubr.msk.bf16.mxu0 %vm975_vm1, %v708_v39  ;;  %v9391_v39 = vld [vmem:[%s13933_s23 + $0x10c] ss:$16 sps:$4 sm:$0xff]   ;;  %v9430_v14 = vld [vmem:[%s13933_s23 + $0x324] ss:$16 sps:$4 sm:$0xff]  }
  0x58   : > { %v9415_v61 = vld [vmem:[%s13933_s23 + $0x38c] ss:$16 sps:$4 sm:$0xff]  }
  0x59   : > { %1385 = vmatpush1.bf16.msra.mxu0 %v9326_v24  ;;  %1458 = vmatpush1.bf16.msra.mxu1 %v9329_v26  ;;  %v9362_v24 = vld [vmem:[%s13933_s23] ss:$16 sps:$4 sm:$0xff]   ;;  %v9370_v26 = vld [vmem:[%s13933_s23 + $0x164] ss:$16 sps:$4 sm:$0xff]  }
  0x5a   : > { %1386 = vmatprep.subr.bf16.mxu0 %v9334_v27  ;;  %1459 = vmatprep.subr.bf16.mxu1 %v9337_v31  ;;  %v9373_v27 = vld [vmem:[%s13933_s23 + $0x16c] ss:$16 sps:$4 sm:$0xff]  }
  0x5b   : > { %v9379_v31 = vld [vmem:[%s13933_s23 + $0x14c] ss:$16 sps:$4 sm:$0xff]  }
  0x5c   : > { %1104 = vmatmul.mubr.bf16.gmra.mxu1 %v700_v40  ;;  %1031 = vmatmul.mubr.bf16.gmra.mxu0 %v700_v40  ;;  %v9386_v40 = vld [vmem:[%s13933_s23 + $0x100] ss:$16 sps:$4 sm:$0xff]  }
  0x5d   : > { %1387 = vmatpush1.bf16.msra.mxu0 %v9332_v32  ;;  %1460 = vmatpush1.bf16.msra.mxu1 %v9335_v35  ;;  %v9374_v32 = vld [vmem:[%s13933_s23 + $0x140] ss:$16 sps:$4 sm:$0xff]   ;;  %v9385_v35 = vld [vmem:[%s13933_s23 + $0x12c] ss:$16 sps:$4 sm:$0xff]  }
  0x5e   : > { %1388 = vmatprep.subr.bf16.mxu0 %v9340_v36  ;;  %1461 = vmatprep.subr.bf16.mxu1 %v9343_v47  ;;  %v9380_v36 = vld [vmem:[%s13933_s23 + $0x120] ss:$16 sps:$4 sm:$0xff]   ;;  %v9395_v47 = vld [vmem:[%s13933_s23 + $0x3e8] ss:$16 sps:$4 sm:$0xff]  }
  0x5f   : > { %7991 = vmatprep.mubr.msk.bf16.mxu1 %vm975_vm1, %v724_v3  ;;  %7987 = vmatprep.mubr.msk.bf16.mxu0 %vm975_vm1, %v724_v3  ;;  %v9421_v3 = vld [vmem:[%s13933_s23 + $0x36c] ss:$16 sps:$4 sm:$0xff]  }
  0x61   : > { %1389 = vmatpush1.bf16.msra.mxu0 %v9338_v51  ;;  %1462 = vmatpush1.bf16.msra.mxu1 %v9341_v52  ;;  %v9400_v51 = vld [vmem:[%s13933_s23 + $0x3c4] ss:$16 sps:$4 sm:$0xff]   ;;  %v9403_v52 = vld [vmem:[%s13933_s23 + $0x3cc] ss:$16 sps:$4 sm:$0xff]  }
  0x62   : > { %1390 = vmatprep.subr.bf16.mxu0 %v9346_v57  ;;  %1463 = vmatprep.subr.bf16.mxu1 %v9349_v59  ;;  %v9409_v57 = vld [vmem:[%s13933_s23 + $0x3ac] ss:$16 sps:$4 sm:$0xff]   ;;  %v9407_v59 = vld [vmem:[%s13933_s23 + $0x3a8] ss:$16 sps:$4 sm:$0xff]  }
  0x64   : > { %1114 = vmatmul.mubr.bf16.gmra.mxu1 %v716_v5  ;;  %1041 = vmatmul.mubr.bf16.gmra.mxu0 %v716_v5  ;;  %v9419_v5 = vld [vmem:[%s13933_s23 + $0x368] ss:$16 sps:$4 sm:$0xff]  }
  0x65   : > { %1391 = vmatpush1.bf16.msra.mxu0 %v9344_v1  ;;  %1464 = vmatpush1.bf16.msra.mxu1 %v9347_v2  ;;  %v9413_v1 = vld [vmem:[%s13933_s23 + $0x388] ss:$16 sps:$4 sm:$0xff]   ;;  %v9418_v2 = vld [vmem:[%s13933_s23 + $0x364] ss:$16 sps:$4 sm:$0xff]  }
  0x66   : > { %1392 = vmatprep.subr.bf16.mxu0 %v9352_v4  ;;  %1465 = vmatprep.subr.bf16.mxu1 %v9355_v9  ;;  %v9416_v4 = vld [vmem:[%s13933_s23 + $0x360] ss:$16 sps:$4 sm:$0xff]   ;;  %v9424_v9 = vld [vmem:[%s13933_s23 + $0x344] ss:$16 sps:$4 sm:$0xff]  }
  0x67   : > { %7992 = vmatprep.mubr.msk.bf16.mxu1 %vm975_vm1, %v730_v10  ;;  %7988 = vmatprep.mubr.msk.bf16.mxu0 %vm975_vm1, %v730_v10  ;;  %v9427_v10 = vld [vmem:[%s13933_s23 + $0x34c] ss:$16 sps:$4 sm:$0xff]  }
  0x69   : > { %1393 = vmatpush1.bf16.msra.mxu0 %v9350_v12  ;;  %1466 = vmatpush1.bf16.msra.mxu1 %v9353_v13  ;;  %v9422_v12 = vld [vmem:[%s13933_s23 + $0x340] ss:$16 sps:$4 sm:$0xff]   ;;  %v9425_v13 = vld [vmem:[%s13933_s23 + $0x348] ss:$16 sps:$4 sm:$0xff]  }
  0x6a   : > { %1394 = vmatprep.subr.bf16.mxu0 %v9358_v15  ;;  %1467 = vmatprep.subr.bf16.mxu1 %v9361_v16  ;;  %v9433_v15 = vld [vmem:[%s13933_s23 + $0x32c] ss:$16 sps:$4 sm:$0xff]   ;;  %v9428_v16 = vld [vmem:[%s13933_s23 + $0x320] ss:$16 sps:$4 sm:$0xff]  }
  0x6c   : > { %1124 = vmatmul.mubr.bf16.gmra.mxu1 %v727_v19  ;;  %1051 = vmatmul.mubr.bf16.gmra.mxu0 %v727_v19  ;;  %v9439_v19 = vld [vmem:[%s13933_s23 + $0x30c] ss:$16 sps:$4 sm:$0xff]  }
  0x6d   : > { %1395 = vmatpush1.bf16.msra.mxu0 %v9356_v17  ;;  %1468 = vmatpush1.bf16.msra.mxu1 %v9359_v18  ;;  %v9431_v17 = vld [vmem:[%s13933_s23 + $0x328] ss:$16 sps:$4 sm:$0xff]   ;;  %v9436_v18 = vld [vmem:[%s13933_s23 + $0x304] ss:$16 sps:$4 sm:$0xff]  }
  0x6e   : > { %1396 = vmatprep.subr.bf16.mxu0 %v9364_v20  ;;  %1469 = vmatprep.subr.bf16.mxu1 %v9367_v21  ;;  %v1589_v20 = vrot.slane %v10576_v42, 1  ;;  %v9434_v21 = vld [vmem:[%s13933_s23 + $0x300] ss:$16 sps:$4 sm:$0xff]  }
  0x6f   : > { %8041 = vmatprep.mubr.msk.bf16.mxu0 %vm975_vm1, %v10576_v42  ;;  %8045 = vmatprep.mubr.msk.bf16.mxu1 %vm975_vm1, %v10576_v42  ;;  %v9442_v42 = vld [vmem:[%s13933_s23 + $0x464] ss:$16 sps:$4 sm:$0xff]  }
  0x71   : > { %1397 = vmatpush1.bf16.msra.mxu0 %v9362_v24  ;;  %1470 = vmatpush1.bf16.msra.mxu1 %v9365_v25  ;;  %v9437_v24 = vld [vmem:[%s13933_s23 + $0x308] ss:$16 sps:$4 sm:$0xff]  }
  0x72   : > { %1406 = vmatprep.subr.bf16.mxu0 %v9370_v26  ;;  %1479 = vmatprep.subr.bf16.mxu1 %v9373_v27  ;;  %v9440_v26 = vld [vmem:[%s13933_s23 + $0x460] ss:$16 sps:$4 sm:$0xff]   ;;  %v9448_v27 = vld [vmem:[%s13933_s23 + $0x444] ss:$16 sps:$4 sm:$0xff]  }
  0x75   : > { %1407 = vmatpush2.bf16.msra.mxu0 %v9368_v28  ;;  %1480 = vmatpush2.bf16.msra.mxu1 %v9371_v29  ;;  %v9451_v28 = vld [vmem:[%s13933_s23 + $0x44c] ss:$16 sps:$4 sm:$0xff]   ;;  %v9446_v29 = vld [vmem:[%s13933_s23 + $0x440] ss:$16 sps:$4 sm:$0xff]  }
  0x76   : > { %1408 = vmatprep.subr.bf16.mxu0 %v9376_v30  ;;  %1481 = vmatprep.subr.bf16.mxu1 %v9379_v31  ;;  %v9449_v30 = vld [vmem:[%s13933_s23 + $0x448] ss:$16 sps:$4 sm:$0xff]   ;;  %v9454_v31 = vld [vmem:[%s13933_s23 + $0x424] ss:$16 sps:$4 sm:$0xff]  }
  0x79   : > { %1409 = vmatpush2.bf16.msra.mxu0 %v9374_v32  ;;  %1482 = vmatpush2.bf16.msra.mxu1 %v9377_v33  ;;  %v9457_v32 = vld [vmem:[%s13933_s23 + $0x42c] ss:$16 sps:$4 sm:$0xff]   ;;  %v9452_v33 = vld [vmem:[%s13933_s23 + $0x420] ss:$16 sps:$4 sm:$0xff]  }
  0x7a   : > { %1410 = vmatprep.subr.bf16.mxu0 %v9382_v34  ;;  %1483 = vmatprep.subr.bf16.mxu1 %v9385_v35  ;;  %v9455_v34 = vld [vmem:[%s13933_s23 + $0x428] ss:$16 sps:$4 sm:$0xff]   ;;  %v9460_v35 = vld [vmem:[%s13933_s23 + $0x404] ss:$16 sps:$4 sm:$0xff]  }
  0x7d   : > { %1411 = vmatpush2.bf16.msra.mxu0 %v9380_v36  ;;  %1484 = vmatpush2.bf16.msra.mxu1 %v9383_v37  ;;  %v9463_v36 = vld [vmem:[%s13933_s23 + $0x40c] ss:$16 sps:$4 sm:$0xff]   ;;  %v9458_v37 = vld [vmem:[%s13933_s23 + $0x400] ss:$16 sps:$4 sm:$0xff]  }
  0x7e   : > { %1412 = vmatprep.subr.bf16.mxu0 %v9388_v38  ;;  %1485 = vmatprep.subr.bf16.mxu1 %v9391_v39  ;;  %v9461_v38 = vld [vmem:[%s13933_s23 + $0x408] ss:$16 sps:$4 sm:$0xff]   ;;  %v1586_v39 = vrot.slane %v10584_v48, 1 }
  0x81   : > { %1413 = vmatpush2.bf16.msra.mxu0 %v9386_v40  ;;  %1486 = vmatpush2.bf16.msra.mxu1 %v9389_v41  ;;  %v1587_v40 = vrot.slane %v10598_v55, 1 }
  0x82   : > { %1856 = vmatprep.subr.bf16.mxu0 %v9394_v43  ;;  %1929 = vmatprep.subr.bf16.mxu1 %v9397_v44  ;;  %v9476_v44 = vld [vmem:[%s13889_s3 + $0x350] ss:$8 sps:$4 sm:$0xff]  }
  0x83   : > { %v1588_v41 = vsel %vm1585_vm2, %v1586_v39, %v1587_v40  ;;  %v9556_v39 = vld [vmem:[%s13889_s3 + $0x374] ss:$8 sps:$4 sm:$0xff]  }
  0x84   : > { %1415 = vmatmul.mubr.bf16.vlgmr.msra.gmra.mxu0 %v10584_v48  ;;  %1488 = vmatmul.mubr.bf16.vlgmr.msra.gmra.mxu1 %v10584_v48  ;;  %v1593_v48 = vsel %vm1585_vm2, %v1587_v40, %v1592_v6  ;;  %v9470_v6 = vld [vmem:[%s13889_s3 + $0x360] ss:$8 sps:$4 sm:$0xff]   ;;  %v9551_v40 = vld [vmem:[%s13889_s3 + $0x270] ss:$8 sps:$4 sm:$0xff]  }
  0x85   : > { %1857 = vmatpush1.bf16.msra.mxu0 %v9392_v46  ;;  %1930 = vmatpush1.bf16.msra.mxu1 %v9395_v47  ;;  %v9481_v46 = vld [vmem:[%s13889_s3 + $0x234] ss:$8 sps:$4 sm:$0xff]   ;;  %v9484_v47 = vld [vmem:[%s13889_s3 + $0x344] ss:$8 sps:$4 sm:$0xff]  }
  0x86   : > { %1858 = vmatprep.subr.bf16.mxu0 %v9400_v51  ;;  %1931 = vmatprep.subr.bf16.mxu1 %v9403_v52  ;;  %v9479_v51 = vld [vmem:[%s13889_s3 + $0x230] ss:$8 sps:$4 sm:$0xff]   ;;  %v9482_v52 = vld [vmem:[%s13889_s3 + $0x340] ss:$8 sps:$4 sm:$0xff]  }
  0x87   : > { %8042 = vmatprep.mubr.msk.bf16.mxu0 %vm975_vm1, %v10580_v45  ;;  %8046 = vmatprep.mubr.msk.bf16.mxu1 %vm975_vm1, %v10580_v45 }
  0x89   : > { %1859 = vmatpush1.bf16.msra.mxu0 %v9398_v53  ;;  %1932 = vmatpush1.bf16.msra.mxu1 %v9401_v54  ;;  %v9487_v53 = vld [vmem:[%s13889_s3 + $0x224] ss:$8 sps:$4 sm:$0xff]   ;;  %v9490_v54 = vld [vmem:[%s13889_s3 + $0x334] ss:$8 sps:$4 sm:$0xff]  }
  0x8a   : > { %1860 = vmatprep.subr.bf16.mxu0 %v9406_v56  ;;  %1933 = vmatprep.subr.bf16.mxu1 %v9409_v57  ;;  %v9485_v56 = vld [vmem:[%s13889_s3 + $0x220] ss:$8 sps:$4 sm:$0xff]   ;;  %v9488_v57 = vld [vmem:[%s13889_s3 + $0x330] ss:$8 sps:$4 sm:$0xff]  }
  0x8c   : > { %1425 = vmatmul.mubr.bf16.gmra.mxu0 %v10598_v55  ;;  %1498 = vmatmul.mubr.bf16.gmra.mxu1 %v10598_v55  ;;  %v9466_v55 = vld [vmem:[%s13889_s3 + $0x264] ss:$8 sps:$4 sm:$0xff]  }
  0x8d   : > { %1861 = vmatpush1.bf16.msra.mxu0 %v9404_v58  ;;  %1934 = vmatpush1.bf16.msra.mxu1 %v9407_v59  ;;  %v9493_v58 = vld [vmem:[%s13889_s3 + $0x214] ss:$8 sps:$4 sm:$0xff]   ;;  %v9496_v59 = vld [vmem:[%s13889_s3 + $0x324] ss:$8 sps:$4 sm:$0xff]  }
  0x8e   : > { %1862 = vmatprep.subr.bf16.mxu0 %v9412_v60  ;;  %1935 = vmatprep.subr.bf16.mxu1 %v9415_v61  ;;  %v9491_v60 = vld [vmem:[%s13889_s3 + $0x210] ss:$8 sps:$4 sm:$0xff]   ;;  %v9494_v61 = vld [vmem:[%s13889_s3 + $0x320] ss:$8 sps:$4 sm:$0xff]  }
  0x8f   : > { %8043 = vmatprep.mubr.msk.bf16.mxu0 %vm975_vm1, %v10652_v22  ;;  %8047 = vmatprep.mubr.msk.bf16.mxu1 %vm975_vm1, %v10652_v22  ;;  %v9464_v22 = vld [vmem:[%s13889_s3 + $0x260] ss:$8 sps:$4 sm:$0xff]  }
  0x91   : > { %1863 = vmatpush1.bf16.msra.mxu0 %v9410_v62  ;;  %1936 = vmatpush1.bf16.msra.mxu1 %v9413_v1  ;;  %v9499_v62 = vld [vmem:[%s13889_s3 + $0x204] ss:$8 sps:$4 sm:$0xff]   ;;  %v9502_v1 = vld [vmem:[%s13889_s3 + $0x314] ss:$8 sps:$4 sm:$0xff]  }
  0x92   : > { %1864 = vmatprep.subr.bf16.mxu0 %v9418_v2  ;;  %1937 = vmatprep.subr.bf16.mxu1 %v9421_v3  ;;  %v9497_v2 = vld [vmem:[%s13889_s3 + $0x200] ss:$8 sps:$4 sm:$0xff]   ;;  %v9500_v3 = vld [vmem:[%s13889_s3 + $0x310] ss:$8 sps:$4 sm:$0xff]  }
  0x94   : > { %1435 = vmatmul.mubr.bf16.gmra.mxu0 %v10654_v23  ;;  %1508 = vmatmul.mubr.bf16.gmra.mxu1 %v10654_v23  ;;  %v9469_v23 = vld [vmem:[%s13889_s3 + $0x254] ss:$8 sps:$4 sm:$0xff]  }
  0x95   : > { %1865 = vmatpush1.bf16.msra.mxu0 %v9416_v4  ;;  %1938 = vmatpush1.bf16.msra.mxu1 %v9419_v5  ;;  %v9505_v4 = vld [vmem:[%s13889_s3 + $0x1f4] ss:$8 sps:$4 sm:$0xff]   ;;  %v9508_v5 = vld [vmem:[%s13889_s3 + $0x304] ss:$8 sps:$4 sm:$0xff]  }
  0x96   : > { %1866 = vmatprep.subr.bf16.mxu0 %v9424_v9  ;;  %1939 = vmatprep.subr.bf16.mxu1 %v9427_v10  ;;  %v9503_v9 = vld [vmem:[%s13889_s3 + $0x1f0] ss:$8 sps:$4 sm:$0xff]   ;;  %v9506_v10 = vld [vmem:[%s13889_s3 + $0x300] ss:$8 sps:$4 sm:$0xff]  }
  0x97   : > { %8044 = vmatprep.mubr.msk.bf16.mxu0 %vm975_vm1, %v10690_v49  ;;  %8048 = vmatprep.mubr.msk.bf16.mxu1 %vm975_vm1, %v10690_v49  ;;  %v1590_v49 = vrot.slane %v10580_v45, 1  ;;  %v9445_v45 = vld [vmem:[%s13933_s23 + $0x46c] ss:$16 sps:$4 sm:$0xff]  }
  0x99   : > { %1867 = vmatpush1.bf16.msra.mxu0 %v9422_v12  ;;  %1940 = vmatpush1.bf16.msra.mxu1 %v9425_v13  ;;  %v1591_v25 = vsel %vm1585_vm2, %v1589_v20, %v1590_v49  ;;  %v1595_v43 = vsel %vm1585_vm2, %v1590_v49, %v1594_v63  ;;  %v9472_v63 = vld [vmem:[%s13889_s3 + $0x364] ss:$8 sps:$4 sm:$0xff]   ;;  %v9514_v13 = vld [vmem:[%s13889_s3 + $0x2f4] ss:$8 sps:$4 sm:$0xff]  }
  0x9a   : > { %1868 = vmatprep.subr.bf16.mxu0 %v9430_v14  ;;  %1941 = vmatprep.subr.bf16.mxu1 %v9433_v15  ;;  %v9511_v12 = vld [vmem:[%s13889_s3 + $0x2e4] ss:$8 sps:$4 sm:$0xff]   ;;  %v9509_v14 = vld [vmem:[%s13889_s3 + $0x2e0] ss:$8 sps:$4 sm:$0xff]   ;;  %v9512_v15 = vld [vmem:[%s13889_s3 + $0x2f0] ss:$8 sps:$4 sm:$0xff]  }
  0x9b   : > { %v9523_v20 = vld [vmem:[%s13889_s3 + $0x2c4] ss:$8 sps:$4 sm:$0xff]  }
  0x9c   : > { %1445 = vmatmul.mubr.bf16.gmra.mxu0 %v10692_v50  ;;  %1518 = vmatmul.mubr.bf16.gmra.mxu1 %v10692_v50  ;;  %v9443_v50 = vld [vmem:[%s13933_s23 + $0x468] ss:$16 sps:$4 sm:$0xff]   ;;  %v9526_v49 = vld [vmem:[%s13889_s3 + $0x3c4] ss:$8 sps:$4 sm:$0xff]  }
  0x9d   : > { %1869 = vmatpush1.bf16.msra.mxu0 %v9428_v16  ;;  %1942 = vmatpush1.bf16.msra.mxu1 %v9431_v17  ;;  %v9517_v16 = vld [vmem:[%s13889_s3 + $0x2d4] ss:$8 sps:$4 sm:$0xff]  }
  0x9e   : > { %1870 = vmatprep.subr.bf16.mxu0 %v9436_v18  ;;  %1943 = vmatprep.subr.bf16.mxu1 %v9439_v19  ;;  %v9520_v17 = vld [vmem:[%s13889_s3 + $0x3d4] ss:$8 sps:$4 sm:$0xff]   ;;  %v9515_v18 = vld [vmem:[%s13889_s3 + $0x2d0] ss:$8 sps:$4 sm:$0xff]  }
  0x9f   : > { %8145 = vmatprep.mubr.msk.bf16.mxu0 %vm975_vm1, %v1591_v25  ;;  %8149 = vmatprep.mubr.msk.bf16.mxu1 %vm975_vm1, %v1591_v25  ;;  %v9518_v19 = vld [vmem:[%s13889_s3 + $0x3d0] ss:$8 sps:$4 sm:$0xff]  }
  0xa0   : > { %v9527_v25 = vld [vmem:[%s13889_s3 + $0x2b0] ss:$8 sps:$4 sm:$0xff]  }
  0xa1   : > { %1871 = vmatpush1.bf16.msra.mxu0 %v9434_v21  ;;  %1944 = vmatpush1.bf16.msra.mxu1 %v9437_v24  ;;  %v9521_v21 = vld [vmem:[%s13889_s3 + $0x2c0] ss:$8 sps:$4 sm:$0xff]  }
  0xa2   : > { %1880 = vmatprep.subr.bf16.mxu0 %v9442_v42  ;;  %1953 = vmatprep.subr.bf16.mxu1 %v9445_v45  ;;  %v9524_v24 = vld [vmem:[%s13889_s3 + $0x3c0] ss:$8 sps:$4 sm:$0xff]   ;;  %v9529_v42 = vld [vmem:[%s13889_s3 + $0x2b4] ss:$8 sps:$4 sm:$0xff]  }
  0xa3   : > { %v9532_v45 = vld [vmem:[%s13889_s3 + $0x3b4] ss:$8 sps:$4 sm:$0xff]  }
  0xa5   : > { %1881 = vmatpush2.bf16.msra.mxu0 %v9440_v26  ;;  %1954 = vmatpush2.bf16.msra.mxu1 %v9443_v50  ;;  %v9530_v26 = vld [vmem:[%s13889_s3 + $0x3b0] ss:$8 sps:$4 sm:$0xff]   ;;  %v9535_v50 = vld [vmem:[%s13889_s3 + $0x2a4] ss:$8 sps:$4 sm:$0xff]  }
  0xa6   : > { %1882 = vmatprep.subr.bf16.mxu0 %v9448_v27  ;;  %1955 = vmatprep.subr.bf16.mxu1 %v9451_v28  ;;  %v9538_v27 = vld [vmem:[%s13889_s3 + $0x3a4] ss:$8 sps:$4 sm:$0xff]   ;;  %v9533_v28 = vld [vmem:[%s13889_s3 + $0x2a0] ss:$8 sps:$4 sm:$0xff]  }
  0xa9   : > { %1883 = vmatpush2.bf16.msra.mxu0 %v9446_v29  ;;  %1956 = vmatpush2.bf16.msra.mxu1 %v9449_v30  ;;  %v9536_v29 = vld [vmem:[%s13889_s3 + $0x3a0] ss:$8 sps:$4 sm:$0xff]   ;;  %v9541_v30 = vld [vmem:[%s13889_s3 + $0x294] ss:$8 sps:$4 sm:$0xff]  }
  0xaa   : > { %1884 = vmatprep.subr.bf16.mxu0 %v9454_v31  ;;  %1957 = vmatprep.subr.bf16.mxu1 %v9457_v32  ;;  %v9544_v31 = vld [vmem:[%s13889_s3 + $0x394] ss:$8 sps:$4 sm:$0xff]   ;;  %v9539_v32 = vld [vmem:[%s13889_s3 + $0x290] ss:$8 sps:$4 sm:$0xff]  }
  0xad   : > { %1885 = vmatpush2.bf16.msra.mxu0 %v9452_v33  ;;  %1958 = vmatpush2.bf16.msra.mxu1 %v9455_v34  ;;  %v9542_v33 = vld [vmem:[%s13889_s3 + $0x390] ss:$8 sps:$4 sm:$0xff]   ;;  %v9547_v34 = vld [vmem:[%s13889_s3 + $0x284] ss:$8 sps:$4 sm:$0xff]  }
  0xae   : > { %1886 = vmatprep.subr.bf16.mxu0 %v9460_v35  ;;  %1959 = vmatprep.subr.bf16.mxu1 %v9463_v36  ;;  %v9550_v35 = vld [vmem:[%s13889_s3 + $0x384] ss:$8 sps:$4 sm:$0xff]   ;;  %v9545_v36 = vld [vmem:[%s13889_s3 + $0x280] ss:$8 sps:$4 sm:$0xff]  }
  0xb1   : > { %1887 = vmatpush2.bf16.msra.mxu0 %v9458_v37  ;;  %1960 = vmatpush2.bf16.msra.mxu1 %v9461_v38  ;;  %v9548_v37 = vld [vmem:[%s13889_s3 + $0x380] ss:$8 sps:$4 sm:$0xff]   ;;  %v9553_v38 = vld [vmem:[%s13889_s3 + $0x274] ss:$8 sps:$4 sm:$0xff]  }
  0xb2   : > { %2721 = vmatprep.subr.bf16.mxu0 %v9466_v55  ;;  %2794 = vmatprep.subr.bf16.mxu1 %v9472_v63 }
  0xb4   : > { %1889 = vmatmul.mubr.bf16.vlgmr.msra.gmra.mxu0 %v1588_v41  ;;  %1962 = vmatmul.mubr.bf16.vlgmr.msra.gmra.mxu1 %v1588_v41  ;;  %v9554_v41 = vld [vmem:[%s13889_s3 + $0x370] ss:$8 sps:$4 sm:$0xff]  }
  0xb5   : > { %8146 = vmatprep.mubr.msk.bf16.mxu0 %vm975_vm1, %v1595_v43  ;;  %8150 = vmatprep.mubr.msk.bf16.mxu1 %vm975_vm1, %v1595_v43 }
  0xb6   : > { %2722 = vmatpush1.bf16.msra.mxu0 %v9464_v22  ;;  %2795 = vmatpush1.bf16.msra.mxu1 %v9470_v6  ;;  %v9562_v6 = vld [vmem:[%s13889_s3 + $0x174] ss:$8 sps:$4 sm:$0xff]  }
  0xb7   : > { %2723 = vmatprep.subr.bf16.mxu0 %v9469_v23 }
  0xbc   : > { %1899 = vmatmul.mubr.bf16.gmra.mxu0 %v1593_v48  ;;  %1972 = vmatmul.mubr.bf16.gmra.mxu1 %v1593_v48 }
  0xbd   : > { %8147 = vmatprep.mubr.msk.bf16.mxu0 %vm975_vm1, %v10731_v7  ;;  %8151 = vmatprep.mubr.msk.bf16.mxu1 %vm975_vm1, %v10731_v7  ;;  %v9475_v7 = vld [vmem:[%s13889_s3 + $0x244] ss:$8 sps:$4 sm:$0xff]  }
  0xc4   : > { %1909 = vmatmul.mubr.bf16.gmra.mxu0 %v10745_v11  ;;  %1982 = vmatmul.mubr.bf16.gmra.mxu1 %v10745_v11  ;;  %v9473_v11 = vld [vmem:[%s13889_s3 + $0x240] ss:$8 sps:$4 sm:$0xff]  }
  0xc5   : > { %8148 = vmatprep.mubr.msk.bf16.mxu0 %vm975_vm1, %v10713_v0  ;;  %8152 = vmatprep.mubr.msk.bf16.mxu1 %vm975_vm1, %v10713_v0  ;;  %v9467_v0 = vld [vmem:[%s13889_s3 + $0x250] ss:$8 sps:$4 sm:$0xff]  }
  0xc6   : > { %2724 = vmatpush1.bf16.msra.mxu0 %v9467_v0  ;;  %v9559_v0 = vld [vmem:[%s13889_s3 + $0x74] ss:$8 sps:$4 sm:$0xff]  }
  0xc7   : > { %2725 = vmatprep.subr.bf16.mxu0 %v9475_v7 }
  0xca   : > { %2726 = vmatpush1.bf16.msra.mxu0 %v9473_v11 }
  0xcb   : > { %2727 = vmatprep.subr.bf16.mxu0 %v9481_v46 }
  0xcc   : > { %1919 = vmatmul.mubr.bf16.gmra.mxu0 %v10734_v8  ;;  %1992 = vmatmul.mubr.bf16.gmra.mxu1 %v10734_v8  ;;  %v9478_v8 = vld [vmem:[%s13889_s3 + $0x354] ss:$8 sps:$4 sm:$0xff]  }
  0xcd   : > { %2796 = vmatprep.subr.bf16.mxu1 %v9478_v8 }
  0xce   : > { %2797 = vmatpush1.bf16.msra.mxu1 %v9476_v44  ;;  %2728 = vmatpush1.bf16.msra.mxu0 %v9479_v51 }
  0xcf   : > { %2798 = vmatprep.subr.bf16.mxu1 %v9484_v47  ;;  %2729 = vmatprep.subr.bf16.mxu0 %v9487_v53 }
  0xd2   : > { %2799 = vmatpush1.bf16.msra.mxu1 %v9482_v52  ;;  %2730 = vmatpush1.bf16.msra.mxu0 %v9485_v56 }
  0xd3   : > { %2800 = vmatprep.subr.bf16.mxu1 %v9490_v54  ;;  %2731 = vmatprep.subr.bf16.mxu0 %v9493_v58 }
  0xd6   : > { %2801 = vmatpush1.bf16.msra.mxu1 %v9488_v57  ;;  %2732 = vmatpush1.bf16.msra.mxu0 %v9491_v60 }
  0xd7   : > { %2802 = vmatprep.subr.bf16.mxu1 %v9496_v59  ;;  %2733 = vmatprep.subr.bf16.mxu0 %v9499_v62 }
  0xda   : > { %2803 = vmatpush1.bf16.msra.mxu1 %v9494_v61  ;;  %2734 = vmatpush1.bf16.msra.mxu0 %v9497_v2 }
  0xdb   : > { %2804 = vmatprep.subr.bf16.mxu1 %v9502_v1  ;;  %2735 = vmatprep.subr.bf16.mxu0 %v9505_v4 }
  0xde   : > { %2805 = vmatpush1.bf16.msra.mxu1 %v9500_v3  ;;  %2736 = vmatpush1.bf16.msra.mxu0 %v9503_v9 }
  0xdf   : > { %2806 = vmatprep.subr.bf16.mxu1 %v9508_v5  ;;  %2737 = vmatprep.subr.bf16.mxu0 %v9511_v12 }
  0xe2   : > { %2807 = vmatpush1.bf16.msra.mxu1 %v9506_v10  ;;  %2738 = vmatpush2.bf16.msra.mxu0 %v9509_v14 }
  0xe3   : > { %2808 = vmatprep.subr.bf16.mxu1 %v9514_v13  ;;  %2739 = vmatprep.subr.bf16.mxu0 %v9517_v16 }
  0xe6   : > { %2809 = vmatpush1.bf16.msra.mxu1 %v9512_v15  ;;  %2740 = vmatpush2.bf16.msra.mxu0 %v9515_v18 }
  0xe7   : > { %2812 = vmatprep.subr.bf16.mxu1 %v9520_v17  ;;  %2741 = vmatprep.subr.bf16.mxu0 %v9523_v20 }
  0xea   : > { %2813 = vmatpush2.bf16.msra.mxu1 %v9518_v19  ;;  %2742 = vmatpush2.bf16.msra.mxu0 %v9521_v21 }
  0xeb   : > { %2814 = vmatprep.subr.bf16.mxu1 %v9526_v49  ;;  %2743 = vmatprep.subr.bf16.mxu0 %v9529_v42 }
  0xee   : > { %2815 = vmatpush2.bf16.msra.mxu1 %v9524_v24  ;;  %2744 = vmatpush2.bf16.msra.mxu0 %v9527_v25 }
  0xef   : > { %2816 = vmatprep.subr.bf16.mxu1 %v9532_v45  ;;  %2745 = vmatprep.subr.bf16.mxu0 %v9535_v50 }
  0xf2   : > { %2817 = vmatpush2.bf16.msra.mxu1 %v9530_v26  ;;  %2746 = vmatpush2.bf16.msra.mxu0 %v9533_v28 }
  0xf3   : > { %2818 = vmatprep.subr.bf16.mxu1 %v9538_v27  ;;  %2747 = vmatprep.subr.bf16.mxu0 %v9541_v30 }
  0xf6   : > { %2819 = vmatpush2.bf16.msra.mxu1 %v9536_v29  ;;  %2748 = vmatpush2.bf16.msra.mxu0 %v9539_v32  ;;  %v2036_v32 = vlaneseq }
  0xf7   : > { %2820 = vmatprep.subr.bf16.mxu1 %v9544_v31  ;;  %2749 = vmatprep.subr.bf16.mxu0 %v9547_v34 }
  0xfa   : > { %2821 = vmatpush2.bf16.msra.mxu1 %v9542_v33  ;;  %2750 = vmatpush2.bf16.msra.mxu0 %v9545_v36 }
  0xfb   : > { %2822 = vmatprep.subr.bf16.mxu1 %v9550_v35  ;;  %2751 = vmatprep.subr.bf16.mxu0 %v9553_v38  ;;  %v2037_v35 = vshrl.u32 %v2036_v32, 7 }
  0xfe   : > { %2823 = vmatpush2.bf16.msra.mxu1 %v9548_v37  ;;  %2752 = vmatpush2.bf16.msra.mxu0 %v9551_v40  ;;  %v11280_v40 = vsub.s32 0, %v2037_v35 }
  0xff   : > { %2824 = vmatprep.subr.bf16.mxu1 %v9556_v39  ;;  %3258 = vmatprep.subr.bf16.mxu0 %v9562_v6 }
 0x100   : > { %13947 = vst [vmem:[#allocation23_spill] sm:$0xff] %v11280_v40 }
 0x102   : > { %2825 = vmatpush2.bf16.msra.mxu1 %v9554_v41  ;;  %v2046_v41 = vsub.s32 2, %v2037_v35 }
 0x103   : > { %3185 = vmatprep.subr.bf16.mxu1 %v9559_v0  ;;  %v11282_v0 = vsub.s32 1, %v2037_v35 }
 0x105   : > { %13948 = vst [vmem:[#allocation24_spill] sm:$0xff] %v11282_v0 }
 0x114   : > { %v11210_v43 = vpop.f32.mrf.mxu0  ;;  %v11212_v48 = vpop.f32.mrf.mxu1 }
 0x116   : > { %v11214_v55 = vpop.f32.mrf.mxu0  ;;  %v11216_v22 = vpop.f32.mrf.mxu1 }
 0x118   : > { %v11218_v23 = vpop.f32.mrf.mxu0  ;;  %v11220_v63 = vpop.f32.mrf.mxu1 }
 0x11a   : > { %v11228_v7 = vpop.f32.mrf.mxu0  ;;  %v11230_v8 = vpop.f32.mrf.mxu1 }
 0x11c   : > { %v11232_v11 = vpop.f32.mrf.mxu1  ;;  %v11234_v44 = vpop.f32.mrf.mxu0 }
 0x11e   : > { %v11236_v46 = vpop.f32.mrf.mxu1  ;;  %v11238_v47 = vpop.f32.mrf.mxu0 }
 0x120   : > { %v11240_v51 = vpop.f32.mrf.mxu1  ;;  %v11242_v52 = vpop.f32.mrf.mxu0 }
 0x122   : > { %v11244_v53 = vpop.f32.mrf.mxu1  ;;  %v11246_v54 = vpop.f32.mrf.mxu0 }
 0x124   : > { %v11248_v56 = vpop.f32.mrf.mxu0  ;;  %v11250_v57 = vpop.f32.mrf.mxu1 }
 0x126   : > { %v11252_v58 = vpop.f32.mrf.mxu0  ;;  %v11254_v59 = vpop.f32.mrf.mxu1 }
 0x128   : > { %v11256_v60 = vpop.f32.mrf.mxu0  ;;  %v11258_v61 = vpop.f32.mrf.mxu1 }
 0x129   : > { %13935 = vst [vmem:[#allocation11_spill] sm:$0xff] %v11256_v60  ;;  %13936 = vst [vmem:[#allocation12_spill] sm:$0xff] %v11258_v61 }
 0x12a   : > { %v11260_v62 = vpop.f32.mrf.mxu0  ;;  %v11262_v1 = vpop.f32.mrf.mxu1 }
 0x12b   : > { %13937 = vst [vmem:[#allocation13_spill] sm:$0xff] %v11260_v62  ;;  %13938 = vst [vmem:[#allocation14_spill] sm:$0xff] %v11262_v1 }
 0x12c   : > { %v11264_v2 = vpop.f32.mrf.mxu0  ;;  %v11266_v3 = vpop.f32.mrf.mxu1 }
 0x12d   : > { %13939 = vst [vmem:[#allocation15_spill] sm:$0xff] %v11264_v2  ;;  %13940 = vst [vmem:[#allocation16_spill] sm:$0xff] %v11266_v3 }
 0x12e   : > { %v11268_v4 = vpop.f32.mrf.mxu0  ;;  %v11270_v5 = vpop.f32.mrf.mxu1 }
 0x12f   : > { %13941 = vst [vmem:[#allocation17_spill] sm:$0xff] %v11268_v4  ;;  %13942 = vst [vmem:[#allocation18_spill] sm:$0xff] %v11270_v5 }
 0x130   : > { %v11272_v9 = vpop.f32.mrf.mxu0  ;;  %v11274_v10 = vpop.f32.mrf.mxu1 }
 0x131   : > { %13943 = vst [vmem:[#allocation19_spill] sm:$0xff] %v11272_v9  ;;  %13944 = vst [vmem:[#allocation20_spill] sm:$0xff] %v11274_v10  ;;  %v2050_v10 = vsub.s32 3, %v2037_v35 }
 0x132   : > { %v11276_v12 = vpop.f32.mrf.mxu0  ;;  %v11278_v13 = vpop.f32.mrf.mxu1 }
 0x133   : > { %13945 = vst [vmem:[#allocation21_spill] sm:$0xff] %v11276_v12  ;;  %13946 = vst [vmem:[#allocation22_spill] sm:$0xff] %v11278_v13  ;;  %v2034_v12 = vld [vmem:[%s13949_s2] sm:$0xf]  ;;  %s10247_s2 = scalar_lea.vmem %s7829_s27, 16 }
 0x134   : > { %v11288_v32 = vrot.slane %v2034_v12, %v11280_v40  ;;  %v11290_v4 = vrot.slane %v2034_v12, %v2046_v41  ;;  %v11293_v3 = vrot.slane %v2034_v12, %v11282_v0  ;;  %v11298_v61 = vrot.slane %v2034_v12, %v2050_v10  ;;  %p10248_p11 = scmp.ne.s32.totalorder %s7829_s27, %s10247_s2  ;;  %p10255_p1 = scmp.lt.s32.totalorder %s10253_s24, %s10247_s2 }
 0x136   : > { %13950 = vst [vmem:[#allocation25_spill] sm:$0xff] %v11288_v32  ;;  %13951 = vst [vmem:[#allocation26_spill] sm:$0xff] %v11290_v4  ;;  %p10249_p12 = pnand %p10248_p11, %p10441_p5  ;;  %p10256_p2 = por %p10255_p1, %p10254_p0 }
 0x138   : > { %p10250_p13 = pneg %p10249_p12 }
 0x13a   : > { %p10257_p3 = pnand %p10256_p2, %p10250_p13 }
 0x144   : > { %v1416_v14 = vpop.f32.mrf.mxu0  ;;  %v1489_v15 = vpop.f32.mrf.mxu1 }
 0x145   : > { %v1417_v2 = vadd.f32 %v1416_v14, %v11210_v43  ;;  %v1490_v1 = vadd.f32 %v1489_v15, %v11212_v48 }
 0x146   : > { %v1418_v16 = vpop.f32.mrf.mxu0  ;;  %v1491_v17 = vpop.f32.mrf.mxu1 }
 0x147   : > { %v1419_v62 = vadd.f32 %v1418_v16, %v11214_v55  ;;  %v1492_v35 = vadd.f32 %v1491_v17, %v11216_v22  ;;  %v13953_v16 = vld [vmem:[#allocation25_spill] sm:$0xff] }
 0x148   : > { %v1420_v18 = vpop.f32.mrf.mxu0  ;;  %v1493_v19 = vpop.f32.mrf.mxu1 }
 0x149   : > { %v1421_v60 = vadd.f32 %v1420_v18, %v11218_v23  ;;  %v1494_v40 = vadd.f32 %v1493_v19, %v11220_v63  ;;  %v13955_v19 = vld [vmem:[#allocation12_spill] sm:$0xff] }
 0x14a   : > { %v1422_v20 = vpop.f32.mrf.mxu0  ;;  %v1495_v49 = vpop.f32.mrf.mxu1 }
 0x14b   : > { %v1423_v41 = vadd.f32 %v1422_v20, %v11228_v7  ;;  %v1496_v0 = vadd.f32 %v1495_v49, %v11230_v8  ;;  %v13956_v20 = vld [vmem:[#allocation13_spill] sm:$0xff]  ;;  %v13957_v49 = vld [vmem:[#allocation14_spill] sm:$0xff] }
 0x14c   : > { %v1426_v21 = vpop.f32.mrf.mxu0  ;;  %v1499_v24 = vpop.f32.mrf.mxu1 }
 0x14d   : > { %v1427_v43 = vadd.f32 %v1426_v21, %v11234_v44  ;;  %v1500_v48 = vadd.f32 %v1499_v24, %v11232_v11  ;;  %v13958_v21 = vld [vmem:[#allocation15_spill] sm:$0xff] }
 0x14e   : > { %v1428_v42 = vpop.f32.mrf.mxu0  ;;  %v1501_v45 = vpop.f32.mrf.mxu1 }
 0x14f   : > { %v11310_v55 = vadd.f32 %v1428_v42, %v11238_v47  ;;  %v11313_v22 = vadd.f32 %v1501_v45, %v11236_v46 }
 0x150   : > { %v1430_v25 = vpop.f32.mrf.mxu0  ;;  %v1503_v26 = vpop.f32.mrf.mxu1 }
 0x151   : > { %v11316_v23 = vadd.f32 %v1430_v25, %v11242_v52  ;;  %v11319_v63 = vadd.f32 %v1503_v26, %v11240_v51  ;;  %v13959_v25 = vld [vmem:[#allocation16_spill] sm:$0xff] }
 0x152   : > { %v1432_v50 = vpop.f32.mrf.mxu0  ;;  %v1505_v27 = vpop.f32.mrf.mxu1 }
 0x153   : > { %v11322_v7 = vadd.f32 %v1432_v50, %v11246_v54  ;;  %v11325_v44 = vadd.f32 %v1505_v27, %v11244_v53  ;;  %v13952_v54 = vld [vmem:[#allocation11_spill] sm:$0xff]  ;;  %v13960_v50 = vld [vmem:[#allocation17_spill] sm:$0xff]  ;;  %v13961_v27 = vld [vmem:[#allocation18_spill] sm:$0xff] }
 0x154   : > { %v1436_v28 = vpop.f32.mrf.mxu0  ;;  %v1509_v29 = vpop.f32.mrf.mxu1 }
 0x155   : > { %v11328_v11 = vadd.f32 %v1436_v28, %v11248_v56  ;;  %v11331_v12 = vadd.f32 %v1509_v29, %v11250_v57  ;;  %v13954_v56 = vld [vmem:[#allocation26_spill] sm:$0xff]  ;;  %v13962_v29 = vld [vmem:[#allocation19_spill] sm:$0xff] }
 0x156   : > { %v1438_v30 = vpop.f32.mrf.mxu0  ;;  %v1511_v31 = vpop.f32.mrf.mxu1 }
 0x157   : > { %v11334_v52 = vadd.f32 %v1438_v30, %v11252_v58  ;;  %v11337_v51 = vadd.f32 %v1511_v31, %v11254_v59 }
 0x158   : > { %v1440_v33 = vpop.f32.mrf.mxu0  ;;  %v1513_v34 = vpop.f32.mrf.mxu1 }
 0x159   : > { %v11340_v14 = vadd.f32 %v1440_v33, %v13952_v54  ;;  %v11345_v57 = vadd.f32 %v1513_v34, %v13955_v19 }
 0x15a   : > { %v1442_v36 = vpop.f32.mrf.mxu0  ;;  %v1515_v37 = vpop.f32.mrf.mxu1 }
 0x15b   : > { %v11348_v58 = vadd.f32 %v1442_v36, %v13956_v20  ;;  %v11351_v59 = vadd.f32 %v1515_v37, %v13957_v49 }
 0x15c   : > { %v1446_v38 = vpop.f32.mrf.mxu0  ;;  %v1519_v39 = vpop.f32.mrf.mxu1 }
 0x15d   : > { %v11354_v24 = vadd.f32 %v1446_v38, %v13958_v21  ;;  %v11357_v26 = vadd.f32 %v1519_v39, %v13959_v25 }
 0x15e   : > { %v1448_v6 = vpop.f32.mrf.mxu0  ;;  %v1521_v13 = vpop.f32.mrf.mxu1 }
 0x15f   : > { %v11363_v28 = vadd.f32 %v1521_v13, %v13961_v27  ;;  %v13964_v13 = vld [vmem:[#allocation21_spill] sm:$0xff]  ;;  %v13965_v27 = vld [vmem:[#allocation22_spill] sm:$0xff] }
 0x160   : > { %v1450_v9 = vpop.f32.mrf.mxu0  ;;  %v1523_v5 = vpop.f32.mrf.mxu1 }
 0x161   : > { %v11366_v30 = vadd.f32 %v1450_v9, %v13962_v29 }
 0x162   : > { %v1452_v4 = vpop.f32.mrf.mxu0  ;;  %v11304_v32 = vpop.f32.mrf.mxu1 }
 0x163   : > { %v11390_v29 = vadd.f32 %v11304_v32, %v13965_v27 }
 0x174   : > { %v1890_v8 = vpop.f32.mrf.mxu0  ;;  %v1963_v10 = vpop.f32.mrf.mxu1 }
 0x175   : > { %v2002_v47 = vadd.f32 %v1890_v8, %v1417_v2  ;;  %v2004_v46 = vadd.f32 %v1963_v10, %v1490_v1 }
 0x176   : > { %v1892_v15 = vpop.f32.mrf.mxu0  ;;  %v1965_v53 = vpop.f32.mrf.mxu1 }
 0x177   : > { %v2056_v17 = vadd.f32 %v13953_v16, %v2002_v47  ;;  %v2058_v18 = vadd.f32 %v13954_v56, %v2004_v46  ;;  %v2003_v2 = vadd.f32 %v1892_v15, %v1419_v62  ;;  %v2005_v1 = vadd.f32 %v1965_v53, %v1492_v35 }
 0x178   : > { %v1894_v42 = vpop.f32.mrf.mxu0  ;;  %v1967_v45 = vpop.f32.mrf.mxu1  ;;  %v11360_v62 = vadd.f32 %v1448_v6, %v13960_v50  ;;  %v13963_v6 = vld [vmem:[#allocation20_spill] sm:$0xff]  ;;  %v11374_v46 = vadd.f32 %v1452_v4, %v13964_v13 }
 0x179   : > { %v2057_v31 = vadd.f32 %v11293_v3, %v2003_v2  ;;  %v2059_v33 = vadd.f32 %v11298_v61, %v2005_v1  ;;  %v2006_v34 = vadd.f32 %v1894_v42, %v1421_v60  ;;  %v2008_v36 = vadd.f32 %v1967_v45, %v1494_v40 }
 0x17a   : > { %v1896_v37 = vpop.f32.mrf.mxu0  ;;  %v1969_v38 = vpop.f32.mrf.mxu1  ;;  %v2088_v35 = vmax.f32 %v2056_v17, 0.0  ;;  %v2090_v39 = vmax.f32 %v2058_v18, 0.0  ;;  %v11371_v47 = vadd.f32 %v1523_v5, %v13963_v6 }
 0x17b   : > { %v2007_v8 = vadd.f32 %v1896_v37, %v1423_v41  ;;  %v2009_v10 = vadd.f32 %v1969_v38, %v1496_v0  ;;  %v2060_v9 = vadd.f32 %v13953_v16, %v2006_v34  ;;  %v2062_v54 = vadd.f32 %v13954_v56, %v2008_v36 }
 0x17c   : > { %v1900_v15 = vpop.f32.mrf.mxu0  ;;  %v1973_v53 = vpop.f32.mrf.mxu1  ;;  %v2089_v41 = vmax.f32 %v2057_v31, 0.0  ;;  %v2091_v0 = vmax.f32 %v2059_v33, 0.0 }
 0x17d   : > { %v2061_v60 = vadd.f32 %v11293_v3, %v2007_v8  ;;  %v2063_v40 = vadd.f32 %v11298_v61, %v2009_v10  ;;  %v2010_v17 = vadd.f32 %v1900_v15, %v1427_v43  ;;  %v2012_v18 = vadd.f32 %v1973_v53, %v1500_v48 }
 0x17e   : > { %v2092_v2 = vmax.f32 %v2060_v9, 0.0  ;;  %v2094_v5 = vmax.f32 %v2062_v54, 0.0  ;;  %v1902_v1 = vpop.f32.mrf.mxu0  ;;  %v1975_v19 = vpop.f32.mrf.mxu1 }
 0x17f   : > { %v2093_v4 = vmax.f32 %v2061_v60, 0.0  ;;  %v2095_v20 = vmax.f32 %v2063_v40, 0.0  ;;  %v2064_v49 = vadd.f32 %v13953_v16, %v2010_v17  ;;  %v2066_v21 = vadd.f32 %v13954_v56, %v2012_v18 }
 0x180   : > { %v11382_v42 = vpack.c.bf16 %v2092_v2, %v2088_v35  ;;  %v11384_v45 = vpack.c.bf16 %v2094_v5, %v2090_v39  ;;  %v2011_v25 = vadd.f32 %v1902_v1, %v11310_v55  ;;  %v2013_v43 = vadd.f32 %v1975_v19, %v11313_v22  ;;  %v1904_v48 = vpop.f32.mrf.mxu0  ;;  %v1977_v50 = vpop.f32.mrf.mxu1 }
 0x181   : > { %v11392_v31 = vpack.c.bf16 %v2093_v4, %v2089_v41  ;;  %v11394_v33 = vpack.c.bf16 %v2095_v20, %v2091_v0  ;;  %v2096_v34 = vmax.f32 %v2064_v49, 0.0  ;;  %v2014_v38 = vadd.f32 %v1904_v48, %v11316_v23 }
 0x182   : > { %v2065_v36 = vadd.f32 %v11293_v3, %v2011_v25  ;;  %v2067_v37 = vadd.f32 %v11298_v61, %v2013_v43  ;;  %v2016_v55 = vadd.f32 %v1977_v50, %v11319_v63  ;;  %v1906_v22 = vpop.f32.mrf.mxu0  ;;  %v1979_v35 = vpop.f32.mrf.mxu1  ;;  %v2098_v39 = vmax.f32 %v2066_v21, 0.0 }
 0x183   : > { %v2015_v8 = vadd.f32 %v1906_v22, %v11322_v7  ;;  %v2017_v32 = vadd.f32 %v1979_v35, %v11325_v44  ;;  %v2277_v10 = vshll.u32 %v11392_v31, 16  ;;  %v2068_v13 = vadd.f32 %v13953_v16, %v2014_v38 }
 0x184   : > { %v2097_v6 = vmax.f32 %v2065_v36, 0.0  ;;  %v2070_v9 = vadd.f32 %v13954_v56, %v2016_v55  ;;  %v1910_v54 = vpop.f32.mrf.mxu0  ;;  %v1983_v15 = vpop.f32.mrf.mxu1  ;;  %v2275_v23 = vshrl.u32 %v11392_v31, 16  ;;  %v2099_v44 = vmax.f32 %v2067_v37, 0.0 }
 0x185   : > { %v2069_v63 = vadd.f32 %v11293_v3, %v2015_v8  ;;  %v2071_v53 = vadd.f32 %v11298_v61, %v2017_v32  ;;  %v2018_v60 = vadd.f32 %v1910_v54, %v11328_v11  ;;  %v2020_v7 = vadd.f32 %v1983_v15, %v11331_v12 }
 0x186   : > { %v2100_v40 = vmax.f32 %v2068_v13, 0.0  ;;  %v2102_v17 = vmax.f32 %v2070_v9, 0.0  ;;  %v1912_v18 = vpop.f32.mrf.mxu0  ;;  %v1985_v41 = vpop.f32.mrf.mxu1  ;;  %v2279_v0 = vrot.slane %v2277_v10, 1  ;;  %v2299_v50 = vshrl.u32 %v11394_v33, 16 }
 0x187   : > { %v2101_v2 = vmax.f32 %v2069_v63, 0.0  ;;  %v2103_v5 = vmax.f32 %v2071_v53, 0.0  ;;  %v2072_v1 = vadd.f32 %v13953_v16, %v2018_v60  ;;  %v2074_v19 = vadd.f32 %v13954_v56, %v2020_v7 }
 0x188   : > { %v11412_v4 = vpack.c.bf16 %v2100_v40, %v2096_v34  ;;  %v11414_v20 = vpack.c.bf16 %v2102_v17, %v2098_v39  ;;  %v2019_v11 = vadd.f32 %v1912_v18, %v11334_v52  ;;  %v2021_v12 = vadd.f32 %v1985_v41, %v11337_v51  ;;  %v1914_v49 = vpop.f32.mrf.mxu0  ;;  %v1987_v21 = vpop.f32.mrf.mxu1 }
 0x189   : > { %v11418_v25 = vpack.c.bf16 %v2101_v2, %v2097_v6  ;;  %v11420_v43 = vpack.c.bf16 %v2103_v5, %v2099_v44  ;;  %v2104_v48 = vmax.f32 %v2072_v1, 0.0  ;;  %v2022_v36 = vadd.f32 %v1914_v49, %v11340_v14 }
 0x18a   : > { %v2073_v27 = vadd.f32 %v11293_v3, %v2019_v11  ;;  %v2075_v34 = vadd.f32 %v11298_v61, %v2021_v12  ;;  %v2024_v37 = vadd.f32 %v1987_v21, %v11345_v57  ;;  %v1916_v52 = vpop.f32.mrf.mxu0  ;;  %v1989_v38 = vpop.f32.mrf.mxu1  ;;  %v2106_v51 = vmax.f32 %v2074_v19, 0.0 }
 0x18b   : > { %v2023_v55 = vadd.f32 %v1916_v52, %v11348_v58  ;;  %v2025_v22 = vadd.f32 %v1989_v38, %v11351_v59  ;;  %v2282_v35 = vshll.u32 %v11418_v25, 16  ;;  %v2076_v32 = vadd.f32 %v13953_v16, %v2022_v36 }
 0x18c   : > { %v2105_v39 = vmax.f32 %v2073_v27, 0.0  ;;  %v2107_v8 = vmax.f32 %v2075_v34, 0.0  ;;  %v2078_v10 = vadd.f32 %v13954_v56, %v2024_v37  ;;  %v1920_v6 = vpop.f32.mrf.mxu0  ;;  %v1993_v13 = vpop.f32.mrf.mxu1  ;;  %v2301_v60 = vshll.u32 %v11394_v33, 16 }
 0x18d   : > { %v2077_v14 = vadd.f32 %v11293_v3, %v2023_v55  ;;  %v2079_v57 = vadd.f32 %v11298_v61, %v2025_v22  ;;  %v2026_v9 = vadd.f32 %v1920_v6, %v11354_v24  ;;  %v2028_v58 = vadd.f32 %v1993_v13, %v11357_v26 }
 0x18e   : > { %v2108_v59 = vmax.f32 %v2076_v32, 0.0  ;;  %v2110_v54 = vmax.f32 %v2078_v10, 0.0  ;;  %v1922_v15 = vpop.f32.mrf.mxu0  ;;  %v1995_v63 = vpop.f32.mrf.mxu1  ;;  %v11436_v53 = vrot.slane %v2282_v35, 1  ;;  %v2280_v12 = vor.u32 %v2279_v0, %v2275_v23 }
 0x18f   : > { %v2109_v7 = vmax.f32 %v2077_v14, 0.0  ;;  %v2111_v44 = vmax.f32 %v2079_v57, 0.0  ;;  %v2080_v40 = vadd.f32 %v13953_v16, %v2026_v9  ;;  %v2082_v17 = vadd.f32 %v13954_v56, %v2028_v58  ;;  %v9560_v58 = vld [vmem:[%s13889_s3 + $0x170] ss:$8 sps:$4 sm:$0xff]  }
 0x190   : > { %v11441_v18 = vpack.c.bf16 %v2108_v59, %v2104_v48  ;;  %v11443_v24 = vpack.c.bf16 %v2110_v54, %v2106_v51  ;;  %v2027_v26 = vadd.f32 %v1922_v15, %v11360_v62  ;;  %v2029_v41 = vadd.f32 %v1995_v63, %v11363_v28  ;;  %v1924_v2 = vpop.f32.mrf.mxu0  ;;  %v1997_v5 = vpop.f32.mrf.mxu1  ;;  %v9557_v63 = vld [vmem:[%s13889_s3 + $0x70] ss:$8 sps:$4 sm:$0xff]  }
 0x191   : > { %v11447_v1 = vpack.c.bf16 %v2109_v7, %v2105_v39  ;;  %v11449_v19 = vpack.c.bf16 %v2111_v44, %v2107_v8  ;;  %v2112_v11 = vmax.f32 %v2080_v40, 0.0  ;;  %v2114_v49 = vmax.f32 %v2082_v17, 0.0 }
 0x192   : > { %v11454_v21 = vadd.f32 %v11293_v3, %v2027_v26  ;;  %v2030_v48 = vadd.f32 %v1924_v2, %v11366_v30  ;;  %v2032_v62 = vadd.f32 %v1997_v5, %v11371_v47  ;;  %v11459_v28 = vadd.f32 %v11298_v61, %v2029_v41  ;;  %v1926_v55 = vpop.f32.mrf.mxu0  ;;  %v9565_v26 = vld [vmem:[%s13889_s3 + $0x64] ss:$8 sps:$4 sm:$0xff]  }
 0x193   : > { %v11463_v27 = vsel %vm668_vm0, %v2280_v12, %v11436_v53  ;;  %v2303_v34 = vrot.slane %v2301_v60, 1  ;;  %v2306_v36 = vshll.u32 %v11420_v43, 16  ;;  %v2263_v30 = vshrl.u32 %v11382_v42, 16 }
 0x194   : > { %v2113_v23 = vmax.f32 %v11454_v21, 0.0  ;;  %v2084_v0 = vadd.f32 %v13953_v16, %v2030_v48  ;;  %v2086_v37 = vadd.f32 %v13954_v56, %v2032_v62  ;;  %2753 = vmatprep.mubr.bf16.mxu0 %v11463_v27  ;;  %v2265_v38 = vshll.u32 %v11382_v42, 16  ;;  %v1999_v16 = vpop.f32.mrf.mxu1  ;;  %v9574_v21 = vld [vmem:[%s13889_s3 + $0x154] ss:$8 sps:$4 sm:$0xff]  }
 0x195   : > { %v2304_v47 = vor.u32 %v2303_v34, %v2299_v50  ;;  %v2308_v52 = vrot.slane %v2306_v36, 1  ;;  %v2270_v51 = vshll.u32 %v11412_v4, 16  ;;  %v2287_v39 = vshrl.u32 %v11384_v45, 16  ;;  %v9571_v34 = vld [vmem:[%s13889_s3 + $0x54] ss:$8 sps:$4 sm:$0xff]  }
 0x196   : > { %v2116_v22 = vmax.f32 %v2084_v0, 0.0  ;;  %v2118_v35 = vmax.f32 %v2086_v37, 0.0  ;;  %v2289_v8 = vshll.u32 %v11384_v45, 16  ;;  %v2267_v32 = vrot.slane %v2265_v38, 1 }
 0x197   : > { %v11476_v56 = vsel %vm668_vm0, %v2304_v47, %v2308_v52  ;;  %v2272_v10 = vrot.slane %v2270_v51, 1  ;;  %v2294_v50 = vshll.u32 %v11414_v20, 16  ;;  %v2031_v57 = vadd.f32 %v1926_v55, %v11374_v46  ;;  %v9568_v46 = vld [vmem:[%s13889_s3 + $0x164] ss:$8 sps:$4 sm:$0xff]  }
 0x198   : > { %v11479_v6 = vpack.c.bf16 %v2116_v22, %v2112_v11  ;;  %v11481_v13 = vpack.c.bf16 %v2118_v35, %v2114_v49  ;;  %8277 = vmatprep.mubr.msk.bf16.mxu1 %vm2708_vm3, %v11476_v56  ;;  %v2291_v14 = vrot.slane %v2289_v8, 1  ;;  %v2115_v9 = vmax.f32 %v11459_v28, 0.0  ;;  %v9563_v11 = vld [vmem:[%s13889_s3 + $0x60] ss:$8 sps:$4 sm:$0xff]   ;;  %v9572_v35 = vld [vmem:[%s13889_s3 + $0x150] ss:$8 sps:$4 sm:$0xff]  }
 0x199   : > { %v2268_v59 = vor.u32 %v2267_v32, %v2263_v30  ;;  %v2296_v54 = vrot.slane %v2294_v50, 1  ;;  %v2033_v15 = vadd.f32 %v1999_v16, %v11390_v29  ;;  %v2085_v7 = vadd.f32 %v11293_v3, %v2031_v57  ;;  %v9569_v32 = vld [vmem:[%s13889_s3 + $0x50] ss:$8 sps:$4 sm:$0xff]  }
 0x19a   : > { %v2292_v60 = vor.u32 %v2291_v14, %v2287_v39  ;;  %v2318_v44 = vshrl.u32 %v11418_v25, 16  ;;  %v2322_v40 = vshll.u32 %v11447_v1, 16  ;;  %v2334_v41 = vshrl.u32 %v11420_v43, 16  ;;  %v9580_v14 = vld [vmem:[%s13889_s3 + $0x144] ss:$8 sps:$4 sm:$0xff]  }
 0x19b   : > { %v11501_v17 = vsel %vm668_vm0, %v2268_v59, %v2272_v10  ;;  %v2087_v29 = vadd.f32 %v11298_v61, %v2033_v15  ;;  %v2338_v3 = vshll.u32 %v11449_v19, 16  ;;  %v2117_v5 = vmax.f32 %v2085_v7, 0.0  ;;  %v9566_v61 = vld [vmem:[%s13889_s3 + $0x160] ss:$8 sps:$4 sm:$0xff]  }
 0x19c   : > { %2754 = vmatmul.mubr.bf16.vlgmr.msra.gmra.mxu0 %v11501_v17  ;;  %v11511_v2 = vsel %vm668_vm0, %v2292_v60, %v2296_v54  ;;  %v2320_v12 = vor.u32 %v2318_v44, %v11436_v53  ;;  %v2324_v49 = vrot.slane %v2322_v40, 1  ;;  %v2336_v62 = vor.u32 %v2334_v41, %v2308_v52  ;;  %v9575_v60 = vld [vmem:[%s13889_s3 + $0x40] ss:$8 sps:$4 sm:$0xff]  }
 0x19d   : > { %2827 = vmatmul.mubr.bf16.vlgmr.msra.gmra.mxu1 %v11511_v2  ;;  %3259 = vmatpush1.bf16.msra.mxu0 %v9560_v58  ;;  %v2119_v48 = vmax.f32 %v2087_v29, 0.0  ;;  %v2340_v28 = vrot.slane %v2338_v3, 1  ;;  %v2314_v36 = vshll.u32 %v11441_v18, 16  ;;  %v11528_v0 = vpack.c.bf16 %v2117_v5, %v2113_v23  ;;  %v9577_v58 = vld [vmem:[%s13889_s3 + $0x44] ss:$8 sps:$4 sm:$0xff]  }
 0x19e   : > { %3186 = vmatpush1.bf16.msra.mxu1 %v9557_v63  ;;  %3260 = vmatprep.subr.bf16.mxu0 %v9568_v46  ;;  %v11531_v53 = vsel %vm668_vm0, %v2320_v12, %v2324_v49  ;;  %v2330_v37 = vshll.u32 %v11443_v24, 16  ;;  %v2310_v52 = vshrl.u32 %v11412_v4, 16  ;;  %v2326_v23 = vshrl.u32 %v11414_v20, 16  ;;  %v9578_v44 = vld [vmem:[%s13889_s3 + $0x140] ss:$8 sps:$4 sm:$0xff]  }
 0x19f   : > { %v11534_v30 = vpack.c.bf16 %v2119_v48, %v2115_v9  ;;  %3187 = vmatprep.subr.bf16.mxu1 %v9565_v26  ;;  %2763 = vmatprep.mubr.bf16.mxu0 %v11531_v53  ;;  %v11538_v47 = vsel %vm668_vm0, %v2336_v62, %v2340_v28  ;;  %v2316_v38 = vrot.slane %v2314_v36, 1  ;;  %v2350_v55 = vshrl.u32 %v11447_v1, 16  ;;  %v9583_v29 = vld [vmem:[%s13889_s3 + $0x34] ss:$8 sps:$4 sm:$0xff]   ;;  %v9584_v12 = vld [vmem:[%s13889_s3 + $0x130] ss:$8 sps:$4 sm:$0xff]  }
 0x1a0   : > { %8278 = vmatprep.mubr.msk.bf16.mxu1 %vm2708_vm3, %v11538_v47  ;;  %v2332_v51 = vrot.slane %v2330_v37, 1  ;;  %v2354_v22 = vshll.u32 %v11528_v0, 16  ;;  %v2312_v39 = vor.u32 %v2310_v52, %v2272_v10  ;;  %v2366_v8 = vshrl.u32 %v11449_v19, 16  ;;  %v9586_v26 = vld [vmem:[%s13889_s3 + $0x134] ss:$8 sps:$4 sm:$0xff]  }
 0x1a1   : > { %3261 = vmatpush1.bf16.msra.mxu0 %v9566_v61  ;;  %v2370_v16 = vshll.u32 %v11534_v30, 16  ;;  %v2328_v50 = vor.u32 %v2326_v23, %v2296_v54  ;;  %v2352_v57 = vor.u32 %v2350_v55, %v2324_v49  ;;  %v2346_v63 = vshll.u32 %v11479_v6, 16  ;;  %v9581_v48 = vld [vmem:[%s13889_s3 + $0x30] ss:$8 sps:$4 sm:$0xff]   ;;  %v9589_v37 = vld [vmem:[%s13889_s3 + $0x24] ss:$8 sps:$4 sm:$0xff]  }
 0x1a2   : > { %3188 = vmatpush1.bf16.msra.mxu1 %v9563_v11  ;;  %3262 = vmatprep.subr.bf16.mxu0 %v9574_v21  ;;  %v2356_v9 = vrot.slane %v2354_v22, 1  ;;  %v11558_v10 = vsel %vm668_vm0, %v2312_v39, %v2316_v38  ;;  %v2368_v59 = vor.u32 %v2366_v8, %v2340_v28  ;;  %v2362_v46 = vshll.u32 %v11481_v13, 16  ;;  %v9587_v23 = vld [vmem:[%s13889_s3 + $0x20] ss:$8 sps:$4 sm:$0xff]   ;;  %v9595_v55 = vld [vmem:[%s13889_s3 + $0x14] ss:$8 sps:$4 sm:$0xff]  }
 0x1a3   : > { %3189 = vmatprep.subr.bf16.mxu1 %v9571_v34  ;;  %v2372_v15 = vrot.slane %v2370_v16, 1  ;;  %v11566_v54 = vsel %vm668_vm0, %v2328_v50, %v2332_v51  ;;  %v2342_v41 = vshrl.u32 %v11441_v18, 16  ;;  %v2348_v3 = vrot.slane %v2346_v63, 1  ;;  %v9598_v22 = vld [vmem:[%s13889_s3 + $0x114] ss:$8 sps:$4 sm:$0xff]  }
 0x1a4   : > { %2764 = vmatmul.mubr.bf16.gmra.mxu0 %v11558_v10  ;;  %v11572_v7 = vsel %vm668_vm0, %v2352_v57, %v2356_v9  ;;  %v2358_v5 = vshrl.u32 %v11443_v24, 16  ;;  %v2364_v11 = vrot.slane %v2362_v46, 1  ;;  %v2377_v61 = vshrl.u32 %v11528_v0, 16  ;;  %v9596_v39 = vld [vmem:[%s13889_s3 + $0x110] ss:$8 sps:$4 sm:$0xff]  }
 0x1a5   : > { %2837 = vmatmul.mubr.bf16.gmra.mxu1 %v11566_v54  ;;  %3263 = vmatpush1.bf16.msra.mxu0 %v9572_v35  ;;  %v11580_v40 = vsel %vm668_vm0, %v2368_v59, %v2372_v15  ;;  %v2344_v49 = vor.u32 %v2342_v41, %v2316_v38  ;;  %v2383_v21 = vshrl.u32 %v11534_v30, 16  ;;  %v9592_v38 = vld [vmem:[%s13889_s3 + $0x124] ss:$8 sps:$4 sm:$0xff]   ;;  %v2374_v35 = vshrl.u32 %v11479_v6, 16  ;;  %v9593_v16 = vld [vmem:[%s13889_s3 + $0x10] ss:$8 sps:$4 sm:$0xff]  }
 0x1a6   : > { %3190 = vmatpush1.bf16.msra.mxu1 %v9569_v32  ;;  %3264 = vmatprep.subr.bf16.mxu0 %v9580_v14  ;;  %v2360_v62 = vor.u32 %v2358_v5, %v2332_v51  ;;  %v11601_v28 = vor.u32 %v2377_v61, %v2356_v9  ;;  %v9590_v51 = vld [vmem:[%s13889_s3 + $0x120] ss:$8 sps:$4 sm:$0xff]   ;;  %v2380_v8 = vshrl.u32 %v11481_v13, 16  ;;  %v9601_v14 = vld [vmem:[%s13889_s3 + $0x4] ss:$8 sps:$4 sm:$0xff]  }
 0x1a7   : > { %3191 = vmatprep.subr.bf16.mxu1 %v9577_v58  ;;  %2773 = vmatprep.mubr.bf16.mxu0 %v11572_v7  ;;  %v11604_v34 = vsel %vm668_vm0, %v2344_v49, %v2348_v3  ;;  %v11606_v36 = vor.u32 %v2383_v21, %v2372_v15  ;;  %v11642_v32 = vor.u32 %v2374_v35, %v2348_v3  ;;  %v9602_v57 = vld [vmem:[%s13889_s3 + $0x100] ss:$8 sps:$4 sm:$0xff]   ;;  %v9604_v9 = vld [vmem:[%s13889_s3 + $0x104] ss:$8 sps:$4 sm:$0xff]   ;;  %v9607_v15 = vld [vmem:[%s13889_s3 + $0xf4] ss:$8 sps:$4 sm:$0xff]  }
 0x1a8   : > { %8279 = vmatprep.mubr.msk.bf16.mxu1 %vm2708_vm3, %v11580_v40  ;;  %v11613_v52 = vsel %vm668_vm0, %v2360_v62, %v2364_v11  ;;  %v11644_v50 = vor.u32 %v2380_v8, %v2364_v11  ;;  %v9599_v58 = vld [vmem:[%s13889_s3] ss:$8 sps:$4 sm:$0xff]   ;;  %v9610_v59 = vld [vmem:[%s13889_s3 + $0x1e4] ss:$8 sps:$4 sm:$0xff]   ;;  %v9616_v46 = vld [vmem:[%s13889_s3 + $0x1d4] ss:$8 sps:$4 sm:$0xff]  }
 0x1a9   : > { %3265 = vmatpush1.bf16.msra.mxu0 %v9578_v44  ;;  %v9608_v63 = vld [vmem:[%s13889_s3 + $0x1e0] ss:$8 sps:$4 sm:$0xff]   ;;  %v9613_v44 = vld [vmem:[%s13889_s3 + $0xe4] ss:$8 sps:$4 sm:$0xff]   ;;  %v9619_v3 = vld [vmem:[%s13889_s3 + $0xd4] ss:$8 sps:$4 sm:$0xff]  }
 0x1aa   : > { %3192 = vmatpush1.bf16.msra.mxu1 %v9575_v60  ;;  %3266 = vmatprep.subr.bf16.mxu0 %v9586_v26  ;;  %v9605_v60 = vld [vmem:[%s13889_s3 + $0xf0] ss:$8 sps:$4 sm:$0xff]   ;;  %v9611_v26 = vld [vmem:[%s13889_s3 + $0xe0] ss:$8 sps:$4 sm:$0xff]   ;;  %v9622_v41 = vld [vmem:[%s13889_s3 + $0x1c4] ss:$8 sps:$4 sm:$0xff]  }
 0x1ab   : > { %3193 = vmatprep.subr.bf16.mxu1 %v9583_v29  ;;  %v9614_v29 = vld [vmem:[%s13889_s3 + $0x1d0] ss:$8 sps:$4 sm:$0xff]   ;;  %v9620_v5 = vld [vmem:[%s13889_s3 + $0x1c0] ss:$8 sps:$4 sm:$0xff]   ;;  %v9628_v61 = vld [vmem:[%s13889_s3 + $0x1b4] ss:$8 sps:$4 sm:$0xff]  }
 0x1ac   : > { %2774 = vmatmul.mubr.bf16.gmra.mxu0 %v11604_v34  ;;  %v9617_v11 = vld [vmem:[%s13889_s3 + $0xd0] ss:$8 sps:$4 sm:$0xff]   ;;  %v9623_v21 = vld [vmem:[%s13889_s3 + $0xc0] ss:$8 sps:$4 sm:$0xff]   ;;  %v9631_v62 = vld [vmem:[%s13889_s3 + $0xb4] ss:$8 sps:$4 sm:$0xff]  }
 0x1ad   : > { %2847 = vmatmul.mubr.bf16.gmra.mxu1 %v11613_v52  ;;  %3267 = vmatpush1.bf16.msra.mxu0 %v9584_v12  ;;  %v9625_v12 = vld [vmem:[%s13889_s3 + $0xc4] ss:$8 sps:$4 sm:$0xff]   ;;  %v9626_v49 = vld [vmem:[%s13889_s3 + $0x1b0] ss:$8 sps:$4 sm:$0xff]   ;;  %v9644_v8 = vld [vmem:[%s13889_s3 + $0x180] ss:$8 sps:$4 sm:$0xff]  }
 0x1ae   : > { %3194 = vmatpush1.bf16.msra.mxu1 %v9581_v48  ;;  %2783 = vmatprep.mubr.bf16.mxu0 %v11601_v28  ;;  %v9634_v48 = vld [vmem:[%s13889_s3 + $0x1a4] ss:$8 sps:$4 sm:$0xff]  }
 0x1af   : > { %8280 = vmatprep.mubr.msk.bf16.mxu1 %vm2708_vm3, %v11606_v36  ;;  %3195 = vmatprep.subr.bf16.mxu1 %v9589_v37  ;;  %v9632_v37 = vld [vmem:[%s13889_s3 + $0x1a0] ss:$8 sps:$4 sm:$0xff]   ;;  %v9646_v35 = vld [vmem:[%s13889_s3 + $0x184] ss:$8 sps:$4 sm:$0xff]  }
 0x1b0   : > { %3268 = vmatprep.subr.bf16.mxu0 %v9592_v38  ;;  %v9629_v38 = vld [vmem:[%s13889_s3 + $0xb0] ss:$8 sps:$4 sm:$0xff]  }
 0x1b1   : > { %3269 = vmatpush1.bf16.msra.mxu0 %v9590_v51  ;;  %v9637_v51 = vld [vmem:[%s13889_s3 + $0xa4] ss:$8 sps:$4 sm:$0xff]  }
 0x1b2   : > { %3196 = vmatpush1.bf16.msra.mxu1 %v9587_v23  ;;  %3270 = vmatprep.subr.bf16.mxu0 %v9598_v22  ;;  %v9640_v23 = vld [vmem:[%s13889_s3 + $0x194] ss:$8 sps:$4 sm:$0xff]   ;;  %v9635_v22 = vld [vmem:[%s13889_s3 + $0xa0] ss:$8 sps:$4 sm:$0xff]  }
 0x1b3   : > { %3197 = vmatprep.subr.bf16.mxu1 %v9595_v55  ;;  %v9638_v55 = vld [vmem:[%s13889_s3 + $0x190] ss:$8 sps:$4 sm:$0xff]  }
 0x1b4   : > { %2784 = vmatmul.mubr.bf16.gmra.mxu0 %v11642_v32 }
 0x1b5   : > { %2857 = vmatmul.mubr.bf16.gmra.mxu1 %v11644_v50  ;;  %3271 = vmatpush1.bf16.msra.mxu0 %v9596_v39  ;;  %v9643_v39 = vld [vmem:[%s13889_s3 + $0x94] ss:$8 sps:$4 sm:$0xff]  }
 0x1b6   : > { %3198 = vmatpush1.bf16.msra.mxu1 %v9593_v16  ;;  %3217 = vmatprep.mubr.bf16.mxu1 %v11392_v31  ;;  %v9641_v16 = vld [vmem:[%s13889_s3 + $0x90] ss:$8 sps:$4 sm:$0xff]  }
 0x1b7   : > { %8343 = vmatprep.mubr.msk.bf16.mxu0 %vm2708_vm3, %v11394_v33  ;;  %3199 = vmatprep.subr.bf16.mxu1 %v9601_v14  ;;  %v9652_v14 = vld [vmem:[%s13889_s3 + $0x454] ss:$8 sps:$4 sm:$0xff]  }
 0x1b8   : > { %3272 = vmatprep.subr.bf16.mxu0 %v9604_v9  ;;  %v9650_v9 = vld [vmem:[%s13889_s3 + $0x450] ss:$8 sps:$4 sm:$0xff]  }
 0x1b9   : > { %3273 = vmatpush1.bf16.msra.mxu0 %v9602_v57  ;;  %v9649_v57 = vld [vmem:[%s13889_s3 + $0x84] ss:$8 sps:$4 sm:$0xff]  }
 0x1ba   : > { %3200 = vmatpush1.bf16.msra.mxu1 %v9599_v58  ;;  %3276 = vmatprep.subr.bf16.mxu0 %v9610_v59  ;;  %v9647_v58 = vld [vmem:[%s13889_s3 + $0x80] ss:$8 sps:$4 sm:$0xff]   ;;  %v9655_v59 = vld [vmem:[%s13889_s3 + $0x444] ss:$8 sps:$4 sm:$0xff]  }
 0x1bb   : > { %3201 = vmatprep.subr.bf16.mxu1 %v9607_v15  ;;  %v9658_v15 = vld [vmem:[%s13889_s3 + $0x554] ss:$8 sps:$4 sm:$0xff]  }
 0x1bd   : > { %3277 = vmatpush2.bf16.msra.mxu0 %v9608_v63  ;;  %v9653_v63 = vld [vmem:[%s13889_s3 + $0x440] ss:$8 sps:$4 sm:$0xff]  }
 0x1be   : > { %3202 = vmatpush2.bf16.msra.mxu1 %v9605_v60  ;;  %3278 = vmatprep.subr.bf16.mxu0 %v9616_v46  ;;  %v9656_v60 = vld [vmem:[%s13889_s3 + $0x550] ss:$8 sps:$4 sm:$0xff]   ;;  %v9661_v46 = vld [vmem:[%s13889_s3 + $0x434] ss:$8 sps:$4 sm:$0xff]  }
 0x1bf   : > { %3203 = vmatprep.subr.bf16.mxu1 %v9613_v44  ;;  %v9664_v44 = vld [vmem:[%s13889_s3 + $0x544] ss:$8 sps:$4 sm:$0xff]  }
 0x1c1   : > { %3279 = vmatpush2.bf16.msra.mxu0 %v9614_v29  ;;  %v9659_v29 = vld [vmem:[%s13889_s3 + $0x430] ss:$8 sps:$4 sm:$0xff]  }
 0x1c2   : > { %3204 = vmatpush2.bf16.msra.mxu1 %v9611_v26  ;;  %3280 = vmatprep.subr.bf16.mxu0 %v9622_v41  ;;  %v9662_v26 = vld [vmem:[%s13889_s3 + $0x540] ss:$8 sps:$4 sm:$0xff]   ;;  %v9667_v41 = vld [vmem:[%s13889_s3 + $0x424] ss:$8 sps:$4 sm:$0xff]  }
 0x1c3   : > { %3205 = vmatprep.subr.bf16.mxu1 %v9619_v3  ;;  %v9670_v3 = vld [vmem:[%s13889_s3 + $0x534] ss:$8 sps:$4 sm:$0xff]  }
 0x1c5   : > { %3281 = vmatpush2.bf16.msra.mxu0 %v9620_v5  ;;  %v9665_v5 = vld [vmem:[%s13889_s3 + $0x420] ss:$8 sps:$4 sm:$0xff]  }
 0x1c6   : > { %3206 = vmatpush2.bf16.msra.mxu1 %v9617_v11  ;;  %3282 = vmatprep.subr.bf16.mxu0 %v9628_v61  ;;  %v9668_v11 = vld [vmem:[%s13889_s3 + $0x530] ss:$8 sps:$4 sm:$0xff]   ;;  %v9673_v61 = vld [vmem:[%s13889_s3 + $0x414] ss:$8 sps:$4 sm:$0xff]  }
 0x1c7   : > { %3207 = vmatprep.subr.bf16.mxu1 %v9625_v12  ;;  %v9676_v12 = vld [vmem:[%s13889_s3 + $0x524] ss:$8 sps:$4 sm:$0xff]  }
 0x1c9   : > { %3283 = vmatpush2.bf16.msra.mxu0 %v9626_v49  ;;  %v9671_v49 = vld [vmem:[%s13889_s3 + $0x410] ss:$8 sps:$4 sm:$0xff]  }
 0x1ca   : > { %3208 = vmatpush2.bf16.msra.mxu1 %v9623_v21  ;;  %3284 = vmatprep.subr.bf16.mxu0 %v9634_v48  ;;  %v9674_v21 = vld [vmem:[%s13889_s3 + $0x520] ss:$8 sps:$4 sm:$0xff]   ;;  %v9679_v48 = vld [vmem:[%s13889_s3 + $0x404] ss:$8 sps:$4 sm:$0xff]  }
 0x1cb   : > { %3209 = vmatprep.subr.bf16.mxu1 %v9631_v62  ;;  %v9682_v62 = vld [vmem:[%s13889_s3 + $0x514] ss:$8 sps:$4 sm:$0xff]  }
 0x1cd   : > { %3285 = vmatpush2.bf16.msra.mxu0 %v9632_v37  ;;  %v9677_v37 = vld [vmem:[%s13889_s3 + $0x400] ss:$8 sps:$4 sm:$0xff]  }
 0x1ce   : > { %3210 = vmatpush2.bf16.msra.mxu1 %v9629_v38  ;;  %3286 = vmatprep.subr.bf16.mxu0 %v9640_v23  ;;  %v9680_v38 = vld [vmem:[%s13889_s3 + $0x510] ss:$8 sps:$4 sm:$0xff]   ;;  %v9685_v23 = vld [vmem:[%s13889_s3 + $0x3f4] ss:$8 sps:$4 sm:$0xff]  }
 0x1cf   : > { %3211 = vmatprep.subr.bf16.mxu1 %v9637_v51  ;;  %v9688_v51 = vld [vmem:[%s13889_s3 + $0x504] ss:$8 sps:$4 sm:$0xff]  }
 0x1d1   : > { %3287 = vmatpush2.bf16.msra.mxu0 %v9638_v55  ;;  %v3414_v55 = vrot.slane %v11418_v25, 1 }
 0x1d2   : > { %3212 = vmatpush2.bf16.msra.mxu1 %v9635_v22  ;;  %3288 = vmatprep.subr.bf16.mxu0 %v9646_v35  ;;  %v9683_v22 = vld [vmem:[%s13889_s3 + $0x3f0] ss:$8 sps:$4 sm:$0xff]   ;;  %v9686_v35 = vld [vmem:[%s13889_s3 + $0x500] ss:$8 sps:$4 sm:$0xff]  }
 0x1d3   : > { %3213 = vmatprep.subr.bf16.mxu1 %v9643_v39  ;;  %v3413_v39 = vrot.slane %v11392_v31, 1 }
 0x1d5   : > { %3289 = vmatpush2.bf16.msra.mxu0 %v9644_v8  ;;  %v9691_v8 = vld [vmem:[%s13889_s3 + $0x3e4] ss:$8 sps:$4 sm:$0xff]  }
 0x1d6   : > { %3214 = vmatpush2.bf16.msra.mxu1 %v9641_v16  ;;  %3772 = vmatprep.subr.bf16.mxu0 %v9652_v14  ;;  %v9694_v16 = vld [vmem:[%s13889_s3 + $0x4f4] ss:$8 sps:$4 sm:$0xff]   ;;  %v11858_v14 = vsel %vm1585_vm2, %v3413_v39, %v3414_v55  ;;  %v9725_v39 = vld [vmem:[%s13889_s3 + $0x480] ss:$8 sps:$4 sm:$0xff]  }
 0x1d7   : > { %3215 = vmatprep.subr.bf16.mxu1 %v9649_v57  ;;  %v9689_v57 = vld [vmem:[%s13889_s3 + $0x3e0] ss:$8 sps:$4 sm:$0xff]  }
 0x1d8   : > { %3291 = vmatmul.mubr.bf16.vlgmr.msra.gmra.mxu0 %v11384_v45 }
 0x1d9   : > { %8344 = vmatprep.mubr.msk.bf16.mxu0 %vm2708_vm3, %v11420_v43  ;;  %3773 = vmatpush1.bf16.msra.mxu0 %v9650_v9  ;;  %v3420_v9 = vrot.slane %v11420_v43, 1 }
 0x1da   : > { %3216 = vmatpush2.bf16.msra.mxu1 %v9647_v58  ;;  %3774 = vmatprep.subr.bf16.mxu0 %v9655_v59  ;;  %v9692_v58 = vld [vmem:[%s13889_s3 + $0x4f0] ss:$8 sps:$4 sm:$0xff]   ;;  %v3419_v59 = vrot.slane %v11394_v33, 1 }
 0x1db   : > { %3845 = vmatprep.subr.bf16.mxu1 %v9658_v15  ;;  %v9697_v15 = vld [vmem:[%s13889_s3 + $0x4d4] ss:$8 sps:$4 sm:$0xff]  }
 0x1dd   : > { %3218 = vmatmul.mubr.bf16.vlgmr.msra.gmra.mxu1 %v11382_v42  ;;  %3775 = vmatpush1.bf16.msra.mxu0 %v9653_v63  ;;  %v9700_v63 = vld [vmem:[%s13889_s3 + $0x4e4] ss:$8 sps:$4 sm:$0xff]  }
 0x1de   : > { %3227 = vmatprep.mubr.bf16.mxu1 %v11418_v25  ;;  %3846 = vmatpush1.bf16.msra.mxu1 %v9656_v60  ;;  %v11879_v60 = vsel %vm1585_vm2, %v3419_v59, %v3420_v9  ;;  %v9734_v59 = vld [vmem:[%s13889_s3 + $0x570] ss:$8 sps:$4 sm:$0xff]  }
 0x1df   : > { %3776 = vmatprep.subr.bf16.mxu0 %v9661_v46  ;;  %3847 = vmatprep.subr.bf16.mxu1 %v9664_v44  ;;  %v9695_v46 = vld [vmem:[%s13889_s3 + $0x4d0] ss:$8 sps:$4 sm:$0xff]   ;;  %v9698_v44 = vld [vmem:[%s13889_s3 + $0x4e0] ss:$8 sps:$4 sm:$0xff]  }
 0x1e0   : > { %3301 = vmatmul.mubr.bf16.gmra.mxu0 %v11414_v20 }
 0x1e1   : > { %8345 = vmatprep.mubr.msk.bf16.mxu0 %vm2708_vm3, %v11449_v19  ;;  %3777 = vmatpush1.bf16.msra.mxu0 %v9659_v29  ;;  %v9703_v29 = vld [vmem:[%s13889_s3 + $0x4c4] ss:$8 sps:$4 sm:$0xff]  }
 0x1e2   : > { %3848 = vmatpush1.bf16.msra.mxu1 %v9662_v26  ;;  %3778 = vmatprep.subr.bf16.mxu0 %v9667_v41  ;;  %v9706_v26 = vld [vmem:[%s13889_s3 + $0x5c4] ss:$8 sps:$4 sm:$0xff]   ;;  %v9701_v41 = vld [vmem:[%s13889_s3 + $0x4c0] ss:$8 sps:$4 sm:$0xff]  }
 0x1e3   : > { %3849 = vmatprep.subr.bf16.mxu1 %v9670_v3  ;;  %v9704_v3 = vld [vmem:[%s13889_s3 + $0x5c0] ss:$8 sps:$4 sm:$0xff]  }
 0x1e5   : > { %3228 = vmatmul.mubr.bf16.gmra.mxu1 %v11412_v4  ;;  %3779 = vmatpush1.bf16.msra.mxu0 %v9665_v5  ;;  %v9709_v5 = vld [vmem:[%s13889_s3 + $0x4b4] ss:$8 sps:$4 sm:$0xff]  }
 0x1e6   : > { %3237 = vmatprep.mubr.bf16.mxu1 %v11447_v1  ;;  %3850 = vmatpush1.bf16.msra.mxu1 %v9668_v11  ;;  %v9712_v11 = vld [vmem:[%s13889_s3 + $0x5b4] ss:$8 sps:$4 sm:$0xff]  }
 0x1e7   : > { %3780 = vmatprep.subr.bf16.mxu0 %v9673_v61  ;;  %3851 = vmatprep.subr.bf16.mxu1 %v9676_v12  ;;  %v9707_v61 = vld [vmem:[%s13889_s3 + $0x4b0] ss:$8 sps:$4 sm:$0xff]  }
 0x1e8   : > { %3311 = vmatmul.mubr.bf16.gmra.mxu0 %v11443_v24  ;;  %v9710_v12 = vld [vmem:[%s13889_s3 + $0x5b0] ss:$8 sps:$4 sm:$0xff]  }
 0x1e9   : > { %8346 = vmatprep.mubr.msk.bf16.mxu0 %vm2708_vm3, %v11534_v30  ;;  %3781 = vmatpush1.bf16.msra.mxu0 %v9671_v49  ;;  %v9715_v49 = vld [vmem:[%s13889_s3 + $0x4a4] ss:$8 sps:$4 sm:$0xff]  }
 0x1ea   : > { %3852 = vmatpush1.bf16.msra.mxu1 %v9674_v21  ;;  %3782 = vmatprep.subr.bf16.mxu0 %v9679_v48  ;;  %v9718_v21 = vld [vmem:[%s13889_s3 + $0x5a4] ss:$8 sps:$4 sm:$0xff]   ;;  %v9713_v48 = vld [vmem:[%s13889_s3 + $0x4a0] ss:$8 sps:$4 sm:$0xff]  }
 0x1eb   : > { %3853 = vmatprep.subr.bf16.mxu1 %v9682_v62  ;;  %v9716_v62 = vld [vmem:[%s13889_s3 + $0x5a0] ss:$8 sps:$4 sm:$0xff]  }
 0x1ed   : > { %3238 = vmatmul.mubr.bf16.gmra.mxu1 %v11441_v18  ;;  %3783 = vmatpush1.bf16.msra.mxu0 %v9677_v37  ;;  %v9721_v37 = vld [vmem:[%s13889_s3 + $0x494] ss:$8 sps:$4 sm:$0xff]  }
 0x1ee   : > { %3247 = vmatprep.mubr.bf16.mxu1 %v11528_v0  ;;  %3854 = vmatpush1.bf16.msra.mxu1 %v9680_v38  ;;  %v9724_v38 = vld [vmem:[%s13889_s3 + $0x594] ss:$8 sps:$4 sm:$0xff]  }
 0x1ef   : > { %3784 = vmatprep.subr.bf16.mxu0 %v9685_v23  ;;  %3855 = vmatprep.subr.bf16.mxu1 %v9688_v51  ;;  %v9719_v23 = vld [vmem:[%s13889_s3 + $0x490] ss:$8 sps:$4 sm:$0xff]  }
 0x1f0   : > { %3321 = vmatmul.mubr.bf16.gmra.mxu0 %v11481_v13  ;;  %v9722_v51 = vld [vmem:[%s13889_s3 + $0x590] ss:$8 sps:$4 sm:$0xff]  }
 0x1f1   : > { %3785 = vmatpush1.bf16.msra.mxu0 %v9683_v22  ;;  %3804 = vmatprep.mubr.bf16.mxu0 %v11858_v14  ;;  %v9727_v22 = vld [vmem:[%s13889_s3 + $0x484] ss:$8 sps:$4 sm:$0xff]  }
 0x1f2   : > { %3856 = vmatpush1.bf16.msra.mxu1 %v9686_v35  ;;  %3786 = vmatprep.subr.bf16.mxu0 %v9691_v8  ;;  %v9730_v35 = vld [vmem:[%s13889_s3 + $0x584] ss:$8 sps:$4 sm:$0xff]   ;;  %v9728_v8 = vld [vmem:[%s13889_s3 + $0x580] ss:$8 sps:$4 sm:$0xff]  }
 0x1f3   : > { %3857 = vmatprep.subr.bf16.mxu1 %v9694_v16  ;;  %v9733_v16 = vld [vmem:[%s13889_s3 + $0x474] ss:$8 sps:$4 sm:$0xff]  }
 0x1f5   : > { %3248 = vmatmul.mubr.bf16.gmra.mxu1 %v11479_v6  ;;  %3787 = vmatpush1.bf16.msra.mxu0 %v9689_v57  ;;  %v9736_v57 = vld [vmem:[%s13889_s3 + $0x574] ss:$8 sps:$4 sm:$0xff]  }
 0x1f6   : > { %3858 = vmatpush1.bf16.msra.mxu1 %v9692_v58  ;;  %8471 = vmatprep.mubr.msk.bf16.mxu1 %vm2708_vm3, %v11879_v60  ;;  %v9731_v58 = vld [vmem:[%s13889_s3 + $0x470] ss:$8 sps:$4 sm:$0xff]  }
 0x1f7   : > { %3788 = vmatprep.subr.bf16.mxu0 %v9697_v15  ;;  %3859 = vmatprep.subr.bf16.mxu1 %v9700_v63  ;;  %v9739_v15 = vld [vmem:[%s13889_s3 + $0x464] ss:$8 sps:$4 sm:$0xff]  }
 0x1f8   : > { %v9742_v63 = vld [vmem:[%s13889_s3 + $0x564] ss:$8 sps:$4 sm:$0xff]  }
 0x1f9   : > { %3789 = vmatpush2.bf16.msra.mxu0 %v9695_v46  ;;  %v9737_v46 = vld [vmem:[%s13889_s3 + $0x460] ss:$8 sps:$4 sm:$0xff]  }
 0x1fa   : > { %3860 = vmatpush1.bf16.msra.mxu1 %v9698_v44  ;;  %3790 = vmatprep.subr.bf16.mxu0 %v9703_v29  ;;  %v9740_v44 = vld [vmem:[%s13889_s3 + $0x560] ss:$8 sps:$4 sm:$0xff]   ;;  %v9748_v29 = vld [vmem:[%s13890_s4 + $0x364] ss:$8 sps:$4 sm:$0xff]  }
 0x1fb   : > { %3863 = vmatprep.subr.bf16.mxu1 %v9706_v26  ;;  %v3411_v26 = vrot.slane %v11412_v4, 1 }
 0x1fd   : > { %3791 = vmatpush2.bf16.msra.mxu0 %v9701_v41  ;;  %v9745_v41 = vld [vmem:[%s13890_s4 + $0x264] ss:$8 sps:$4 sm:$0xff]  }
 0x1fe   : > { %3864 = vmatpush2.bf16.msra.mxu1 %v9704_v3  ;;  %3792 = vmatprep.subr.bf16.mxu0 %v9709_v5  ;;  %v3417_v3 = vrot.slane %v11414_v20, 1  ;;  %v3424_v5 = vrot.slane %v11447_v1, 1 }
 0x1ff   : > { %3865 = vmatprep.subr.bf16.mxu1 %v9712_v11  ;;  %v3410_v11 = vrot.slane %v11382_v42, 1 }
 0x201   : > { %3793 = vmatpush2.bf16.msra.mxu0 %v9707_v61  ;;  %v3428_v61 = vrot.slane %v11449_v19, 1 }
 0x202   : > { %3866 = vmatpush2.bf16.msra.mxu1 %v9710_v12  ;;  %3794 = vmatprep.subr.bf16.mxu0 %v9715_v49  ;;  %v3416_v12 = vrot.slane %v11384_v45, 1  ;;  %v9743_v49 = vld [vmem:[%s13890_s4 + $0x260] ss:$8 sps:$4 sm:$0xff]  }
 0x203   : > { %3867 = vmatprep.subr.bf16.mxu1 %v9718_v21  ;;  %v11989_v21 = vsel %vm1585_vm2, %v3410_v11, %v3411_v26  ;;  %v9769_v11 = vld [vmem:[%s13890_s4 + $0x224] ss:$8 sps:$4 sm:$0xff]  }
 0x205   : > { %3795 = vmatpush2.bf16.msra.mxu0 %v9713_v48  ;;  %v9746_v48 = vld [vmem:[%s13890_s4 + $0x360] ss:$8 sps:$4 sm:$0xff]  }
 0x206   : > { %3868 = vmatpush2.bf16.msra.mxu1 %v9716_v62  ;;  %3796 = vmatprep.subr.bf16.mxu0 %v9721_v37  ;;  %v9751_v62 = vld [vmem:[%s13890_s4 + $0x254] ss:$8 sps:$4 sm:$0xff]   ;;  %v11999_v37 = vsel %vm1585_vm2, %v3416_v12, %v3417_v3  ;;  %v9772_v12 = vld [vmem:[%s13890_s4 + $0x324] ss:$8 sps:$4 sm:$0xff]  }
 0x207   : > { %3869 = vmatprep.subr.bf16.mxu1 %v9724_v38  ;;  %v12004_v38 = vsel %vm1585_vm2, %v3414_v55, %v3424_v5  ;;  %v9749_v55 = vld [vmem:[%s13890_s4 + $0x250] ss:$8 sps:$4 sm:$0xff]  }
 0x209   : > { %3797 = vmatpush2.bf16.msra.mxu0 %v9719_v23  ;;  %v9754_v23 = vld [vmem:[%s13890_s4 + $0x354] ss:$8 sps:$4 sm:$0xff]  }
 0x20a   : > { %3870 = vmatpush2.bf16.msra.mxu1 %v9722_v51  ;;  %3798 = vmatprep.subr.bf16.mxu0 %v9727_v22  ;;  %v12014_v51 = vsel %vm1585_vm2, %v3420_v9, %v3428_v61  ;;  %v9752_v22 = vld [vmem:[%s13890_s4 + $0x350] ss:$8 sps:$4 sm:$0xff]   ;;  %v9757_v9 = vld [vmem:[%s13890_s4 + $0x244] ss:$8 sps:$4 sm:$0xff]  }
 0x20b   : > { %3871 = vmatprep.subr.bf16.mxu1 %v9730_v35  ;;  %v3422_v35 = vrot.slane %v11441_v18, 1 }
 0x20d   : > { %3799 = vmatpush2.bf16.msra.mxu0 %v9725_v39  ;;  %v3426_v39 = vrot.slane %v11443_v24, 1 }
 0x20e   : > { %3872 = vmatpush2.bf16.msra.mxu1 %v9728_v8  ;;  %3800 = vmatprep.subr.bf16.mxu0 %v9733_v16  ;;  %v9760_v8 = vld [vmem:[%s13890_s4 + $0x344] ss:$8 sps:$4 sm:$0xff]   ;;  %v12033_v16 = vrot.slane %v11528_v0, 1 }
 0x20f   : > { %3873 = vmatprep.subr.bf16.mxu1 %v9736_v57  ;;  %v12036_v57 = vrot.slane %v11534_v30, 1 }
 0x211   : > { %3801 = vmatpush2.bf16.msra.mxu0 %v9731_v58  ;;  %v9755_v58 = vld [vmem:[%s13890_s4 + $0x240] ss:$8 sps:$4 sm:$0xff]  }
 0x212   : > { %3874 = vmatpush2.bf16.msra.mxu1 %v9734_v59  ;;  %3802 = vmatprep.subr.bf16.mxu0 %v9739_v15  ;;  %v12042_v59 = vsel %vm1585_vm2, %v3411_v26, %v3422_v35  ;;  %v9758_v15 = vld [vmem:[%s13890_s4 + $0x340] ss:$8 sps:$4 sm:$0xff]   ;;  %v12065_v26 = vsel %vm1585_vm2, %v3428_v61, %v12036_v57  ;;  %v12082_v61 = vrot.slane %v11481_v13, 1 }
 0x213   : > { %3875 = vmatprep.subr.bf16.mxu1 %v9742_v63  ;;  %v9763_v63 = vld [vmem:[%s13890_s4 + $0x234] ss:$8 sps:$4 sm:$0xff]  }
 0x215   : > { %3803 = vmatpush2.bf16.msra.mxu0 %v9737_v46  ;;  %v12052_v46 = vsel %vm1585_vm2, %v3417_v3, %v3426_v39  ;;  %v9764_v3 = vld [vmem:[%s13890_s4 + $0x330] ss:$8 sps:$4 sm:$0xff]  }
 0x216   : > { %3876 = vmatpush2.bf16.msra.mxu1 %v9740_v44  ;;  %4485 = vmatprep.subr.bf16.mxu0 %v9748_v29  ;;  %v12056_v44 = vsel %vm1585_vm2, %v3424_v5, %v12033_v16  ;;  %v9766_v29 = vld [vmem:[%s13890_s4 + $0x334] ss:$8 sps:$4 sm:$0xff]   ;;  %v12076_v5 = vrot.slane %v11479_v6, 1 }
 0x217   : > { %4412 = vmatprep.subr.bf16.mxu1 %v9745_v41  ;;  %v9761_v41 = vld [vmem:[%s13890_s4 + $0x230] ss:$8 sps:$4 sm:$0xff]  }
 0x218   : > { %3805 = vmatmul.mubr.bf16.vlgmr.msra.gmra.mxu0 %v11989_v21 }
 0x219   : > { %3878 = vmatmul.mubr.bf16.vlgmr.msra.gmra.mxu1 %v11999_v37  ;;  %3814 = vmatprep.mubr.bf16.mxu0 %v12004_v38 }
 0x21a   : > { %8472 = vmatprep.mubr.msk.bf16.mxu1 %vm2708_vm3, %v12014_v51  ;;  %4413 = vmatpush1.bf16.msra.mxu1 %v9743_v49  ;;  %v9767_v49 = vld [vmem:[%s13890_s4 + $0x220] ss:$8 sps:$4 sm:$0xff]  }
 0x21b   : > { %4486 = vmatpush1.bf16.msra.mxu0 %v9746_v48  ;;  %4414 = vmatprep.subr.bf16.mxu1 %v9751_v62  ;;  %v12092_v48 = vsel %vm1585_vm2, %v3422_v35, %v12076_v5  ;;  %v9770_v62 = vld [vmem:[%s13890_s4 + $0x320] ss:$8 sps:$4 sm:$0xff]   ;;  %v9773_v35 = vld [vmem:[%s13890_s4 + $0x210] ss:$8 sps:$4 sm:$0xff]  }
 0x21c   : > { %4487 = vmatprep.subr.bf16.mxu0 %v9754_v23  ;;  %v9775_v23 = vld [vmem:[%s13890_s4 + $0x214] ss:$8 sps:$4 sm:$0xff]  }
 0x21e   : > { %4415 = vmatpush1.bf16.msra.mxu1 %v9749_v55  ;;  %v12103_v55 = vsel %vm1585_vm2, %v3426_v39, %v12082_v61  ;;  %v9781_v39 = vld [vmem:[%s13890_s4 + $0x204] ss:$8 sps:$4 sm:$0xff]  }
 0x21f   : > { %4488 = vmatpush1.bf16.msra.mxu0 %v9752_v22  ;;  %4416 = vmatprep.subr.bf16.mxu1 %v9757_v9  ;;  %v9778_v22 = vld [vmem:[%s13890_s4 + $0x314] ss:$8 sps:$4 sm:$0xff]   ;;  %v9776_v9 = vld [vmem:[%s13890_s4 + $0x310] ss:$8 sps:$4 sm:$0xff]  }
 0x220   : > { %3815 = vmatmul.mubr.bf16.gmra.mxu0 %v12042_v59  ;;  %4489 = vmatprep.subr.bf16.mxu0 %v9760_v8  ;;  %v9784_v8 = vld [vmem:[%s13890_s4 + $0x304] ss:$8 sps:$4 sm:$0xff]  }
 0x221   : > { %3888 = vmatmul.mubr.bf16.gmra.mxu1 %v12052_v46  ;;  %3824 = vmatprep.mubr.bf16.mxu0 %v12056_v44 }
 0x222   : > { %8473 = vmatprep.mubr.msk.bf16.mxu1 %vm2708_vm3, %v12065_v26  ;;  %4417 = vmatpush1.bf16.msra.mxu1 %v9755_v58  ;;  %v9779_v58 = vld [vmem:[%s13890_s4 + $0x200] ss:$8 sps:$4 sm:$0xff]  }
 0x223   : > { %4490 = vmatpush1.bf16.msra.mxu0 %v9758_v15  ;;  %4418 = vmatprep.subr.bf16.mxu1 %v9763_v63  ;;  %v9782_v15 = vld [vmem:[%s13890_s4 + $0x300] ss:$8 sps:$4 sm:$0xff]   ;;  %v9787_v63 = vld [vmem:[%s13890_s4 + $0x1f4] ss:$8 sps:$4 sm:$0xff]  }
 0x224   : > { %4491 = vmatprep.subr.bf16.mxu0 %v9766_v29  ;;  %v9790_v29 = vld [vmem:[%s13890_s4 + $0x2f4] ss:$8 sps:$4 sm:$0xff]  }
 0x226   : > { %4419 = vmatpush1.bf16.msra.mxu1 %v9761_v41  ;;  %v9785_v41 = vld [vmem:[%s13890_s4 + $0x1f0] ss:$8 sps:$4 sm:$0xff]  }
 0x227   : > { %4492 = vmatpush1.bf16.msra.mxu0 %v9764_v3  ;;  %4420 = vmatprep.subr.bf16.mxu1 %v9769_v11  ;;  %v9788_v3 = vld [vmem:[%s13890_s4 + $0x2f0] ss:$8 sps:$4 sm:$0xff]   ;;  %v9793_v11 = vld [vmem:[%s13890_s4 + $0x2e4] ss:$8 sps:$4 sm:$0xff]  }
 0x228   : > { %3825 = vmatmul.mubr.bf16.gmra.mxu0 %v12092_v48  ;;  %4493 = vmatprep.subr.bf16.mxu0 %v9772_v12  ;;  %v9794_v12 = vld [vmem:[%s13890_s4 + $0x3d0] ss:$8 sps:$4 sm:$0xff]  }
 0x229   : > { %3898 = vmatmul.mubr.bf16.gmra.mxu1 %v12103_v55  ;;  %3834 = vmatprep.mubr.bf16.mxu0 %v12033_v16 }
 0x22a   : > { %8474 = vmatprep.mubr.msk.bf16.mxu1 %vm2708_vm3, %v12036_v57  ;;  %4421 = vmatpush1.bf16.msra.mxu1 %v9767_v49  ;;  %v9799_v49 = vld [vmem:[%s13890_s4 + $0x2d4] ss:$8 sps:$4 sm:$0xff]  }
 0x22b   : > { %4494 = vmatpush1.bf16.msra.mxu0 %v9770_v62  ;;  %4422 = vmatprep.subr.bf16.mxu1 %v9775_v23  ;;  %v9802_v62 = vld [vmem:[%s13890_s4 + $0x3c4] ss:$8 sps:$4 sm:$0xff]   ;;  %v9797_v23 = vld [vmem:[%s13890_s4 + $0x2d0] ss:$8 sps:$4 sm:$0xff]  }
 0x22c   : > { %4495 = vmatprep.subr.bf16.mxu0 %v9778_v22  ;;  %v9800_v22 = vld [vmem:[%s13890_s4 + $0x3c0] ss:$8 sps:$4 sm:$0xff]  }
 0x22e   : > { %4423 = vmatpush1.bf16.msra.mxu1 %v9773_v35  ;;  %v9805_v35 = vld [vmem:[%s13890_s4 + $0x2c4] ss:$8 sps:$4 sm:$0xff]  }
 0x22f   : > { %4496 = vmatpush1.bf16.msra.mxu0 %v9776_v9  ;;  %4424 = vmatprep.subr.bf16.mxu1 %v9781_v39  ;;  %v9808_v9 = vld [vmem:[%s13890_s4 + $0x3b4] ss:$8 sps:$4 sm:$0xff]   ;;  %v9803_v39 = vld [vmem:[%s13890_s4 + $0x2c0] ss:$8 sps:$4 sm:$0xff]  }
 0x230   : > { %3835 = vmatmul.mubr.bf16.gmra.mxu0 %v12076_v5  ;;  %4497 = vmatprep.subr.bf16.mxu0 %v9784_v8  ;;  %v9806_v8 = vld [vmem:[%s13890_s4 + $0x3b0] ss:$8 sps:$4 sm:$0xff]  }
 0x231   : > { %3908 = vmatmul.mubr.bf16.gmra.mxu1 %v12082_v61  ;;  %8599 = vmatprep.mubr.msk.bf16.mxu0 %vm2708_vm3, %v11476_v56  ;;  %v9796_v56 = vld [vmem:[%s13890_s4 + $0x3d4] ss:$8 sps:$4 sm:$0xff]  }
 0x232   : > { %4425 = vmatpush1.bf16.msra.mxu1 %v9779_v58  ;;  %4444 = vmatprep.mubr.bf16.mxu1 %v11463_v27  ;;  %v9791_v27 = vld [vmem:[%s13890_s4 + $0x2e0] ss:$8 sps:$4 sm:$0xff]   ;;  %v9811_v58 = vld [vmem:[%s13890_s4 + $0x2b4] ss:$8 sps:$4 sm:$0xff]  }
 0x233   : > { %4498 = vmatpush1.bf16.msra.mxu0 %v9782_v15  ;;  %4426 = vmatprep.subr.bf16.mxu1 %v9787_v63  ;;  %v9814_v15 = vld [vmem:[%s13890_s4 + $0x3a4] ss:$8 sps:$4 sm:$0xff]   ;;  %v9809_v63 = vld [vmem:[%s13890_s4 + $0x2b0] ss:$8 sps:$4 sm:$0xff]  }
 0x234   : > { %4499 = vmatprep.subr.bf16.mxu0 %v9790_v29  ;;  %v9812_v29 = vld [vmem:[%s13890_s4 + $0x3a0] ss:$8 sps:$4 sm:$0xff]  }
 0x236   : > { %4427 = vmatpush1.bf16.msra.mxu1 %v9785_v41  ;;  %v9817_v41 = vld [vmem:[%s13890_s4 + $0x2a4] ss:$8 sps:$4 sm:$0xff]  }
 0x237   : > { %4500 = vmatpush1.bf16.msra.mxu0 %v9788_v3  ;;  %4428 = vmatprep.subr.bf16.mxu1 %v9793_v11  ;;  %v9820_v3 = vld [vmem:[%s13890_s4 + $0x394] ss:$8 sps:$4 sm:$0xff]   ;;  %v9815_v11 = vld [vmem:[%s13890_s4 + $0x2a0] ss:$8 sps:$4 sm:$0xff]  }
 0x238   : > { %4503 = vmatprep.subr.bf16.mxu0 %v9796_v56  ;;  %v9818_v56 = vld [vmem:[%s13890_s4 + $0x390] ss:$8 sps:$4 sm:$0xff]  }
 0x23a   : > { %4429 = vmatpush2.bf16.msra.mxu1 %v9791_v27  ;;  %v9823_v27 = vld [vmem:[%s13890_s4 + $0x294] ss:$8 sps:$4 sm:$0xff]  }
 0x23b   : > { %4504 = vmatpush2.bf16.msra.mxu0 %v9794_v12  ;;  %4430 = vmatprep.subr.bf16.mxu1 %v9799_v49  ;;  %v9826_v12 = vld [vmem:[%s13890_s4 + $0x384] ss:$8 sps:$4 sm:$0xff]   ;;  %v9821_v49 = vld [vmem:[%s13890_s4 + $0x290] ss:$8 sps:$4 sm:$0xff]  }
 0x23c   : > { %4505 = vmatprep.subr.bf16.mxu0 %v9802_v62  ;;  %v9824_v62 = vld [vmem:[%s13890_s4 + $0x380] ss:$8 sps:$4 sm:$0xff]  }
 0x23e   : > { %4431 = vmatpush2.bf16.msra.mxu1 %v9797_v23  ;;  %v9829_v23 = vld [vmem:[%s13890_s4 + $0x284] ss:$8 sps:$4 sm:$0xff]  }
 0x23f   : > { %4506 = vmatpush2.bf16.msra.mxu0 %v9800_v22  ;;  %4432 = vmatprep.subr.bf16.mxu1 %v9805_v35  ;;  %v9832_v22 = vld [vmem:[%s13890_s4 + $0x374] ss:$8 sps:$4 sm:$0xff]   ;;  %v9827_v35 = vld [vmem:[%s13890_s4 + $0x280] ss:$8 sps:$4 sm:$0xff]  }
 0x240   : > { %4507 = vmatprep.subr.bf16.mxu0 %v9808_v9  ;;  %v9830_v9 = vld [vmem:[%s13890_s4 + $0x370] ss:$8 sps:$4 sm:$0xff]  }
 0x242   : > { %4433 = vmatpush2.bf16.msra.mxu1 %v9803_v39  ;;  %v9835_v39 = vld [vmem:[%s13890_s4 + $0x274] ss:$8 sps:$4 sm:$0xff]  }
 0x243   : > { %4508 = vmatpush2.bf16.msra.mxu0 %v9806_v8  ;;  %4434 = vmatprep.subr.bf16.mxu1 %v9811_v58  ;;  %v9838_v8 = vld [vmem:[%s13890_s4 + $0x74] ss:$8 sps:$4 sm:$0xff]   ;;  %v9833_v58 = vld [vmem:[%s13890_s4 + $0x270] ss:$8 sps:$4 sm:$0xff]  }
 0x244   : > { %4509 = vmatprep.subr.bf16.mxu0 %v9814_v15  ;;  %v9836_v15 = vld [vmem:[%s13890_s4 + $0x70] ss:$8 sps:$4 sm:$0xff]  }
 0x246   : > { %4435 = vmatpush2.bf16.msra.mxu1 %v9809_v63  ;;  %v9841_v63 = vld [vmem:[%s13890_s4 + $0x64] ss:$8 sps:$4 sm:$0xff]  }
 0x247   : > { %4510 = vmatpush2.bf16.msra.mxu0 %v9812_v29  ;;  %4436 = vmatprep.subr.bf16.mxu1 %v9817_v41  ;;  %v9844_v29 = vld [vmem:[%s13890_s4 + $0x174] ss:$8 sps:$4 sm:$0xff]   ;;  %v9842_v41 = vld [vmem:[%s13890_s4 + $0x170] ss:$8 sps:$4 sm:$0xff]  }
 0x248   : > { %4511 = vmatprep.subr.bf16.mxu0 %v9820_v3  ;;  %v9839_v3 = vld [vmem:[%s13890_s4 + $0x60] ss:$8 sps:$4 sm:$0xff]  }
 0x24a   : > { %4437 = vmatpush2.bf16.msra.mxu1 %v9815_v11  ;;  %v9850_v11 = vld [vmem:[%s13890_s4 + $0x164] ss:$8 sps:$4 sm:$0xff]  }
 0x24b   : > { %4512 = vmatpush2.bf16.msra.mxu0 %v9818_v56  ;;  %4438 = vmatprep.subr.bf16.mxu1 %v9823_v27  ;;  %v9845_v56 = vld [vmem:[%s13890_s4 + $0x50] ss:$8 sps:$4 sm:$0xff]  }
 0x24c   : > { %4513 = vmatprep.subr.bf16.mxu0 %v9826_v12  ;;  %v9853_v12 = vld [vmem:[%s13890_s4 + $0x44] ss:$8 sps:$4 sm:$0xff]  }
 0x24e   : > { %4439 = vmatpush2.bf16.msra.mxu1 %v9821_v49 }
 0x24f   : > { %4514 = vmatpush2.bf16.msra.mxu0 %v9824_v62  ;;  %4440 = vmatprep.subr.bf16.mxu1 %v9829_v23  ;;  %v9854_v23 = vld [vmem:[%s13890_s4 + $0x150] ss:$8 sps:$4 sm:$0xff]  }
 0x250   : > { %4515 = vmatprep.subr.bf16.mxu0 %v9832_v22 }
 0x252   : > { %4441 = vmatpush2.bf16.msra.mxu1 %v9827_v35  ;;  %v9851_v35 = vld [vmem:[%s13890_s4 + $0x40] ss:$8 sps:$4 sm:$0xff]  }
 0x253   : > { %4516 = vmatpush2.bf16.msra.mxu0 %v9830_v9  ;;  %4442 = vmatprep.subr.bf16.mxu1 %v9835_v39 }
 0x254   : > { %4868 = vmatprep.subr.bf16.mxu0 %v9838_v8  ;;  %v9859_v8 = vld [vmem:[%s13890_s4 + $0x34] ss:$8 sps:$4 sm:$0xff]  }
 0x256   : > { %4518 = vmatmul.mubr.bf16.vlgmr.msra.gmra.mxu0 %v11511_v2  ;;  %4443 = vmatpush2.bf16.msra.mxu1 %v9833_v58  ;;  %v9847_v2 = vld [vmem:[%s13890_s4 + $0x54] ss:$8 sps:$4 sm:$0xff]  }
 0x257   : > { %8600 = vmatprep.mubr.msk.bf16.mxu0 %vm2708_vm3, %v11538_v47  ;;  %4869 = vmatpush1.bf16.msra.mxu0 %v9836_v15  ;;  %v9848_v47 = vld [vmem:[%s13890_s4 + $0x160] ss:$8 sps:$4 sm:$0xff]  }
 0x258   : > { %4870 = vmatprep.subr.bf16.mxu0 %v9841_v63  ;;  %4941 = vmatprep.subr.bf16.mxu1 %v9844_v29  ;;  %v9860_v63 = vld [vmem:[%s13890_s4 + $0x140] ss:$8 sps:$4 sm:$0xff]  }
 0x259   : > { %4445 = vmatmul.mubr.bf16.vlgmr.msra.gmra.mxu1 %v11501_v17  ;;  %v9856_v17 = vld [vmem:[%s13890_s4 + $0x154] ss:$8 sps:$4 sm:$0xff]  }
 0x25a   : > { %4454 = vmatprep.mubr.bf16.mxu1 %v11531_v53  ;;  %4942 = vmatpush1.bf16.msra.mxu1 %v9842_v41  ;;  %v9857_v41 = vld [vmem:[%s13890_s4 + $0x30] ss:$8 sps:$4 sm:$0xff]  }
 0x25b   : > { %4871 = vmatpush1.bf16.msra.mxu0 %v9839_v3  ;;  %4943 = vmatprep.subr.bf16.mxu1 %v9850_v11  ;;  %v9868_v3 = vld [vmem:[%s13890_s4 + $0x134] ss:$8 sps:$4 sm:$0xff]  }
 0x25c   : > { %4872 = vmatprep.subr.bf16.mxu0 %v9847_v2  ;;  %v2755_v27 = vpop.f32.mrf.mxu0 }
 0x25d   : > { %v2828_v53 = vpop.f32.mrf.mxu1 }
 0x25e   : > { %4528 = vmatmul.mubr.bf16.gmra.mxu0 %v11566_v54  ;;  %v12279_v49 = vadd.f32 %v2828_v53, %v2755_v27  ;;  %4944 = vmatpush1.bf16.msra.mxu1 %v9848_v47  ;;  %v2757_v62 = vpop.f32.mrf.mxu0  ;;  %v9862_v54 = vld [vmem:[%s13890_s4 + $0x144] ss:$8 sps:$4 sm:$0xff]  }
 0x25f   : > { %8601 = vmatprep.mubr.msk.bf16.mxu0 %vm2708_vm3, %v11580_v40  ;;  %4873 = vmatpush1.bf16.msra.mxu0 %v9845_v56  ;;  %v2830_v22 = vpop.f32.mrf.mxu1  ;;  %v9866_v56 = vld [vmem:[%s13890_s4 + $0x130] ss:$8 sps:$4 sm:$0xff]  }
 0x260   : > { %v12292_v9 = vadd.f32 %v2830_v22, %v2757_v62  ;;  %4874 = vmatprep.subr.bf16.mxu0 %v9853_v12  ;;  %4945 = vmatprep.subr.bf16.mxu1 %v9856_v17  ;;  %v2759_v39 = vpop.f32.mrf.mxu0  ;;  %v9863_v12 = vld [vmem:[%s13890_s4 + $0x20] ss:$8 sps:$4 sm:$0xff]   ;;  %v9871_v62 = vld [vmem:[%s13890_s4 + $0x14] ss:$8 sps:$4 sm:$0xff]  }
 0x261   : > { %4455 = vmatmul.mubr.bf16.gmra.mxu1 %v11558_v10  ;;  %v2832_v40 = vpop.f32.mrf.mxu1 }
 0x262   : > { %v12298_v58 = vadd.f32 %v2832_v40, %v2759_v39  ;;  %4464 = vmatprep.mubr.bf16.mxu1 %v11572_v7  ;;  %4946 = vmatpush1.bf16.msra.mxu1 %v9854_v23  ;;  %v12301_v15 = vpop.f32.mrf.mxu0  ;;  %v9865_v7 = vld [vmem:[%s13890_s4 + $0x24] ss:$8 sps:$4 sm:$0xff]   ;;  %v9869_v39 = vld [vmem:[%s13890_s4 + $0x10] ss:$8 sps:$4 sm:$0xff]  }
 0x263   : > { %4875 = vmatpush1.bf16.msra.mxu0 %v9851_v35  ;;  %v12306_v29 = vpop.f32.mrf.mxu1  ;;  %4947 = vmatprep.subr.bf16.mxu1 %v9862_v54  ;;  %v9872_v35 = vld [vmem:[%s13890_s4 + $0x120] ss:$8 sps:$4 sm:$0xff]  }
 0x264   : > { %4876 = vmatprep.subr.bf16.mxu0 %v9859_v8  ;;  %v2765_v10 = vpop.f32.mrf.mxu0  ;;  %v9880_v8 = vld [vmem:[%s13890_s4 + $0x114] ss:$8 sps:$4 sm:$0xff]  }
 0x265   : > { %v2838_v11 = vpop.f32.mrf.mxu1 }
 0x266   : > { %4538 = vmatmul.mubr.bf16.gmra.mxu0 %v11613_v52  ;;  %v12318_v2 = vadd.f32 %v2838_v11, %v2765_v10  ;;  %4948 = vmatpush1.bf16.msra.mxu1 %v9860_v63  ;;  %v2767_v47 = vpop.f32.mrf.mxu0  ;;  %v9874_v52 = vld [vmem:[%s13890_s4 + $0x124] ss:$8 sps:$4 sm:$0xff]   ;;  %v9878_v10 = vld [vmem:[%s13890_s4 + $0x110] ss:$8 sps:$4 sm:$0xff]  }
 0x267   : > { %8602 = vmatprep.mubr.msk.bf16.mxu0 %vm2708_vm3, %v11606_v36  ;;  %4877 = vmatpush1.bf16.msra.mxu0 %v9857_v41  ;;  %v2840_v27 = vpop.f32.mrf.mxu1 }
 0x268   : > { %v12331_v17 = vadd.f32 %v2840_v27, %v2767_v47  ;;  %4878 = vmatprep.subr.bf16.mxu0 %v9865_v7  ;;  %4949 = vmatprep.subr.bf16.mxu1 %v9868_v3  ;;  %v2769_v53 = vpop.f32.mrf.mxu0  ;;  %v9875_v3 = vld [vmem:[%s13890_s4] ss:$8 sps:$4 sm:$0xff]  }
 0x269   : > { %4465 = vmatmul.mubr.bf16.gmra.mxu1 %v11604_v34  ;;  %v2842_v36 = vpop.f32.mrf.mxu1 }
 0x26a   : > { %v12337_v23 = vadd.f32 %v2842_v36, %v2769_v53  ;;  %4474 = vmatprep.mubr.bf16.mxu1 %v11601_v28  ;;  %4950 = vmatpush1.bf16.msra.mxu1 %v9866_v56  ;;  %v12340_v22 = vpop.f32.mrf.mxu0  ;;  %v9877_v28 = vld [vmem:[%s13890_s4 + $0x4] ss:$8 sps:$4 sm:$0xff]   ;;  %v9883_v56 = vld [vmem:[%s13890_s4 + $0xf4] ss:$8 sps:$4 sm:$0xff]  }
 0x26b   : > { %4879 = vmatpush1.bf16.msra.mxu0 %v9863_v12  ;;  %v12345_v54 = vpop.f32.mrf.mxu1  ;;  %4951 = vmatprep.subr.bf16.mxu1 %v9874_v52  ;;  %v9884_v52 = vld [vmem:[%s13890_s4 + $0x100] ss:$8 sps:$4 sm:$0xff]   ;;  %v9889_v36 = vld [vmem:[%s13890_s4 + $0xe4] ss:$8 sps:$4 sm:$0xff]  }
 0x26c   : > { %4880 = vmatprep.subr.bf16.mxu0 %v9871_v62  ;;  %v2775_v34 = vpop.f32.mrf.mxu0  ;;  %v9892_v62 = vld [vmem:[%s13890_s4 + $0x1e4] ss:$8 sps:$4 sm:$0xff]  }
 0x26d   : > { %v2848_v40 = vpop.f32.mrf.mxu1 }
 0x26e   : > { %4548 = vmatmul.mubr.bf16.gmra.mxu0 %v11644_v50  ;;  %v12357_v63 = vadd.f32 %v2848_v40, %v2775_v34  ;;  %4952 = vmatpush1.bf16.msra.mxu1 %v9872_v35  ;;  %v2777_v41 = vpop.f32.mrf.mxu0  ;;  %v9886_v50 = vld [vmem:[%s13890_s4 + $0x104] ss:$8 sps:$4 sm:$0xff]   ;;  %v9887_v40 = vld [vmem:[%s13890_s4 + $0xe0] ss:$8 sps:$4 sm:$0xff]  }
 0x26f   : > { %4881 = vmatpush1.bf16.msra.mxu0 %v9869_v39  ;;  %4900 = vmatprep.mubr.bf16.mxu0 %v11392_v31  ;;  %v2850_v7 = vpop.f32.mrf.mxu1 }
 0x270   : > { %v12369_v11 = vadd.f32 %v2850_v7, %v2777_v41  ;;  %4882 = vmatprep.subr.bf16.mxu0 %v9877_v28  ;;  %4953 = vmatprep.subr.bf16.mxu1 %v9880_v8  ;;  %v2779_v47 = vpop.f32.mrf.mxu0  ;;  %v9890_v28 = vld [vmem:[%s13890_s4 + $0x1e0] ss:$8 sps:$4 sm:$0xff]   ;;  %v9898_v41 = vld [vmem:[%s13890_s4 + $0x1d4] ss:$8 sps:$4 sm:$0xff]  }
 0x271   : > { %4475 = vmatmul.mubr.bf16.gmra.mxu1 %v11642_v32  ;;  %v2852_v31 = vpop.f32.mrf.mxu1  ;;  %v9881_v32 = vld [vmem:[%s13890_s4 + $0xf0] ss:$8 sps:$4 sm:$0xff]  }
 0x272   : > { %v12375_v27 = vadd.f32 %v2852_v31, %v2779_v47  ;;  %4954 = vmatpush1.bf16.msra.mxu1 %v9878_v10  ;;  %8665 = vmatprep.mubr.msk.bf16.mxu1 %vm2708_vm3, %v11394_v33  ;;  %v12379_v12 = vpop.f32.mrf.mxu0  ;;  %v9893_v31 = vld [vmem:[%s13890_s4 + $0xd0] ss:$8 sps:$4 sm:$0xff]  }
 0x273   : > { %4883 = vmatpush1.bf16.msra.mxu0 %v9875_v3  ;;  %v12384_v53 = vpop.f32.mrf.mxu1  ;;  %4955 = vmatprep.subr.bf16.mxu1 %v9886_v50  ;;  %v9895_v3 = vld [vmem:[%s13890_s4 + $0xd4] ss:$8 sps:$4 sm:$0xff]  }
 0x274   : > { %4884 = vmatprep.subr.bf16.mxu0 %v9883_v56  ;;  %v2785_v33 = vpop.f32.mrf.mxu0  ;;  %v9896_v56 = vld [vmem:[%s13890_s4 + $0x1d0] ss:$8 sps:$4 sm:$0xff]  }
 0x275   : > { %v2858_v35 = vpop.f32.mrf.mxu1 }
 0x276   : > { %v12395_v39 = vadd.f32 %v2858_v35, %v2785_v33  ;;  %4956 = vmatpush1.bf16.msra.mxu1 %v9884_v52  ;;  %v2787_v34 = vpop.f32.mrf.mxu0  ;;  %v9904_v52 = vld [vmem:[%s13890_s4 + $0x1c4] ss:$8 sps:$4 sm:$0xff]   ;;  %v9899_v33 = vld [vmem:[%s13890_s4 + $0xc0] ss:$8 sps:$4 sm:$0xff]   ;;  %v9907_v35 = vld [vmem:[%s13890_s4 + $0xb4] ss:$8 sps:$4 sm:$0xff]  }
 0x277   : > { %4885 = vmatpush2.bf16.msra.mxu0 %v9881_v32  ;;  %v2860_v8 = vpop.f32.mrf.mxu1  ;;  %4959 = vmatprep.subr.bf16.mxu1 %v9892_v62  ;;  %v9901_v32 = vld [vmem:[%s13890_s4 + $0xc4] ss:$8 sps:$4 sm:$0xff]   ;;  %v9902_v62 = vld [vmem:[%s13890_s4 + $0x1c0] ss:$8 sps:$4 sm:$0xff]  }
 0x278   : > { %v12406_v10 = vadd.f32 %v2860_v8, %v2787_v34  ;;  %4886 = vmatprep.subr.bf16.mxu0 %v9889_v36  ;;  %v2789_v7 = vpop.f32.mrf.mxu0  ;;  %v9910_v36 = vld [vmem:[%s13890_s4 + $0x1b4] ss:$8 sps:$4 sm:$0xff]   ;;  %v9908_v34 = vld [vmem:[%s13890_s4 + $0x1b0] ss:$8 sps:$4 sm:$0xff]   ;;  %v9916_v8 = vld [vmem:[%s13890_s4 + $0x1a4] ss:$8 sps:$4 sm:$0xff]  }
 0x279   : > { %v2862_v50 = vpop.f32.mrf.mxu1 }
 0x27a   : > { %v12411_v47 = vadd.f32 %v2862_v50, %v2789_v7  ;;  %4960 = vmatpush2.bf16.msra.mxu1 %v9890_v28  ;;  %v9905_v28 = vld [vmem:[%s13890_s4 + $0xb0] ss:$8 sps:$4 sm:$0xff]   ;;  %v9911_v7 = vld [vmem:[%s13890_s4 + $0xa0] ss:$8 sps:$4 sm:$0xff]   ;;  %v9919_v50 = vld [vmem:[%s13890_s4 + $0x94] ss:$8 sps:$4 sm:$0xff]  }
 0x27b   : > { %4887 = vmatpush2.bf16.msra.mxu0 %v9887_v40  ;;  %4961 = vmatprep.subr.bf16.mxu1 %v9898_v41  ;;  %v9913_v40 = vld [vmem:[%s13890_s4 + $0xa4] ss:$8 sps:$4 sm:$0xff]   ;;  %v9914_v41 = vld [vmem:[%s13890_s4 + $0x1a0] ss:$8 sps:$4 sm:$0xff]  }
 0x27c   : > { %4888 = vmatprep.subr.bf16.mxu0 %v9895_v3  ;;  %v9922_v3 = vld [vmem:[%s13890_s4 + $0x194] ss:$8 sps:$4 sm:$0xff]  }
 0x27e   : > { %4962 = vmatpush2.bf16.msra.mxu1 %v9896_v56  ;;  %v9920_v56 = vld [vmem:[%s13890_s4 + $0x190] ss:$8 sps:$4 sm:$0xff]  }
 0x27f   : > { %4889 = vmatpush2.bf16.msra.mxu0 %v9893_v31  ;;  %4963 = vmatprep.subr.bf16.mxu1 %v9904_v52  ;;  %v9917_v31 = vld [vmem:[%s13890_s4 + $0x90] ss:$8 sps:$4 sm:$0xff]   ;;  %v9928_v52 = vld [vmem:[%s13890_s4 + $0x184] ss:$8 sps:$4 sm:$0xff]  }
 0x280   : > { %4890 = vmatprep.subr.bf16.mxu0 %v9901_v32  ;;  %v9925_v32 = vld [vmem:[%s13890_s4 + $0x84] ss:$8 sps:$4 sm:$0xff]  }
 0x282   : > { %4964 = vmatpush2.bf16.msra.mxu1 %v9902_v62  ;;  %v9926_v62 = vld [vmem:[%s13890_s4 + $0x180] ss:$8 sps:$4 sm:$0xff]  }
 0x283   : > { %4891 = vmatpush2.bf16.msra.mxu0 %v9899_v33  ;;  %4965 = vmatprep.subr.bf16.mxu1 %v9910_v36  ;;  %v9923_v33 = vld [vmem:[%s13890_s4 + $0x80] ss:$8 sps:$4 sm:$0xff]   ;;  %v9931_v36 = vld [vmem:[%s13890_s4 + $0x454] ss:$8 sps:$4 sm:$0xff]  }
 0x284   : > { %4892 = vmatprep.subr.bf16.mxu0 %v9907_v35  ;;  %v9934_v35 = vld [vmem:[%s13890_s4 + $0x554] ss:$8 sps:$4 sm:$0xff]  }
 0x286   : > { %4966 = vmatpush2.bf16.msra.mxu1 %v9908_v34  ;;  %v9929_v34 = vld [vmem:[%s13890_s4 + $0x450] ss:$8 sps:$4 sm:$0xff]  }
 0x287   : > { %4893 = vmatpush2.bf16.msra.mxu0 %v9905_v28  ;;  %4967 = vmatprep.subr.bf16.mxu1 %v9916_v8  ;;  %v9932_v28 = vld [vmem:[%s13890_s4 + $0x550] ss:$8 sps:$4 sm:$0xff]   ;;  %v9937_v8 = vld [vmem:[%s13890_s4 + $0x444] ss:$8 sps:$4 sm:$0xff]  }
 0x288   : > { %4894 = vmatprep.subr.bf16.mxu0 %v9913_v40  ;;  %v9940_v40 = vld [vmem:[%s13890_s4 + $0x544] ss:$8 sps:$4 sm:$0xff]  }
 0x28a   : > { %4968 = vmatpush2.bf16.msra.mxu1 %v9914_v41  ;;  %v12498_v41 = vpop.f32.mrf.mxu0 }
 0x28b   : > { %4895 = vmatpush2.bf16.msra.mxu0 %v9911_v7  ;;  %4969 = vmatprep.subr.bf16.mxu1 %v9922_v3  ;;  %v9935_v7 = vld [vmem:[%s13890_s4 + $0x440] ss:$8 sps:$4 sm:$0xff]  }
 0x28c   : > { %4896 = vmatprep.subr.bf16.mxu0 %v9919_v50  ;;  %v9938_v3 = vld [vmem:[%s13890_s4 + $0x540] ss:$8 sps:$4 sm:$0xff]   ;;  %v12516_v50 = vpop.f32.mrf.mxu1 }
 0x28e   : > { %4970 = vmatpush2.bf16.msra.mxu1 %v9920_v56  ;;  %v9941_v56 = vld [vmem:[%s13890_s4 + $0x430] ss:$8 sps:$4 sm:$0xff]  }
 0x28f   : > { %4897 = vmatpush2.bf16.msra.mxu0 %v9917_v31  ;;  %4971 = vmatprep.subr.bf16.mxu1 %v9928_v52  ;;  %v9944_v52 = vld [vmem:[%s13890_s4 + $0x530] ss:$8 sps:$4 sm:$0xff]  }
 0x290   : > { %4898 = vmatprep.subr.bf16.mxu0 %v9925_v32  ;;  %v9949_v32 = vld [vmem:[%s13890_s4 + $0x424] ss:$8 sps:$4 sm:$0xff]  }
 0x292   : > { %4972 = vmatpush2.bf16.msra.mxu1 %v9926_v62 }
 0x293   : > { %4899 = vmatpush2.bf16.msra.mxu0 %v9923_v33  ;;  %5387 = vmatprep.subr.bf16.mxu1 %v9931_v36  ;;  %v9952_v33 = vld [vmem:[%s13890_s4 + $0x524] ss:$8 sps:$4 sm:$0xff]  }
 0x294   : > { %5460 = vmatprep.subr.bf16.mxu0 %v9934_v35 }
 0x295   : > { %4974 = vmatmul.mubr.bf16.vlgmr.msra.gmra.mxu1 %v11384_v45 }
 0x296   : > { %4901 = vmatmul.mubr.bf16.vlgmr.msra.gmra.mxu0 %v11382_v42  ;;  %8666 = vmatprep.mubr.msk.bf16.mxu1 %vm2708_vm3, %v11420_v43  ;;  %v9943_v42 = vld [vmem:[%s13890_s4 + $0x434] ss:$8 sps:$4 sm:$0xff]  }
 0x297   : > { %4910 = vmatprep.mubr.bf16.mxu0 %v11418_v25  ;;  %5388 = vmatpush1.bf16.msra.mxu1 %v9929_v34  ;;  %v9946_v25 = vld [vmem:[%s13890_s4 + $0x534] ss:$8 sps:$4 sm:$0xff]  }
 0x298   : > { %5461 = vmatpush1.bf16.msra.mxu0 %v9932_v28  ;;  %v3292_v45 = vpop.f32.mrf.mxu0  ;;  %5389 = vmatprep.subr.bf16.mxu1 %v9937_v8 }
 0x299   : > { %5462 = vmatprep.subr.bf16.mxu0 %v9940_v40  ;;  %v9958_v40 = vld [vmem:[%s13890_s4 + $0x514] ss:$8 sps:$4 sm:$0xff]  }
 0x29a   : > { %v3294_v43 = vpop.f32.mrf.mxu0 }
 0x29b   : > { %5390 = vmatpush1.bf16.msra.mxu1 %v9935_v7 }
 0x29c   : > { %5463 = vmatpush1.bf16.msra.mxu0 %v9938_v3  ;;  %v3296_v31 = vpop.f32.mrf.mxu0  ;;  %5391 = vmatprep.subr.bf16.mxu1 %v9943_v42  ;;  %v9953_v42 = vld [vmem:[%s13890_s4 + $0x410] ss:$8 sps:$4 sm:$0xff]  }
 0x29d   : > { %v3219_v62 = vpop.f32.mrf.mxu1  ;;  %4984 = vmatmul.mubr.bf16.gmra.mxu1 %v11414_v20  ;;  %5464 = vmatprep.subr.bf16.mxu0 %v9946_v25  ;;  %v9947_v20 = vld [vmem:[%s13890_s4 + $0x420] ss:$8 sps:$4 sm:$0xff]  }
 0x29e   : > { %v3220_v36 = vadd.f32 %v3219_v62, %v12279_v49  ;;  %4911 = vmatmul.mubr.bf16.gmra.mxu0 %v11412_v4  ;;  %8667 = vmatprep.mubr.msk.bf16.mxu1 %vm2708_vm3, %v11449_v19  ;;  %v12535_v35 = vpop.f32.mrf.mxu0  ;;  %v9950_v4 = vld [vmem:[%s13890_s4 + $0x520] ss:$8 sps:$4 sm:$0xff]  }
 0x29f   : > { %4920 = vmatprep.mubr.bf16.mxu0 %v11447_v1  ;;  %5392 = vmatpush1.bf16.msra.mxu1 %v9941_v56  ;;  %v3221_v34 = vpop.f32.mrf.mxu1  ;;  %v9955_v1 = vld [vmem:[%s13890_s4 + $0x414] ss:$8 sps:$4 sm:$0xff]  }
 0x2a0   : > { %v12541_v28 = vadd.f32 %v3292_v45, %v3220_v36  ;;  %5465 = vmatpush1.bf16.msra.mxu0 %v9944_v52  ;;  %v3222_v49 = vadd.f32 %v3221_v34, %v12292_v9  ;;  %v3302_v8 = vpop.f32.mrf.mxu0  ;;  %5393 = vmatprep.subr.bf16.mxu1 %v9949_v32 }
 0x2a1   : > { %v3223_v19 = vpop.f32.mrf.mxu1  ;;  %5466 = vmatprep.subr.bf16.mxu0 %v9952_v33 }
 0x2a2   : > { %v12553_v7 = vadd.f32 %v3294_v43, %v3222_v49  ;;  %v3224_v9 = vadd.f32 %v3223_v19, %v12298_v58  ;;  %v3304_v45 = vpop.f32.mrf.mxu0  ;;  %v9956_v43 = vld [vmem:[%s13890_s4 + $0x510] ss:$8 sps:$4 sm:$0xff]   ;;  %v9961_v58 = vld [vmem:[%s13890_s4 + $0x404] ss:$8 sps:$4 sm:$0xff]  }
 0x2a3   : > { %5394 = vmatpush1.bf16.msra.mxu1 %v9947_v20  ;;  %v12556_v3 = vpop.f32.mrf.mxu1  ;;  %v9970_v20 = vld [vmem:[%s13890_s4 + $0x4f4] ss:$8 sps:$4 sm:$0xff]  }
 0x2a4   : > { %v12561_v25 = vadd.f32 %v3296_v31, %v3224_v9  ;;  %5467 = vmatpush1.bf16.msra.mxu0 %v9950_v4  ;;  %v3306_v56 = vpop.f32.mrf.mxu0  ;;  %5395 = vmatprep.subr.bf16.mxu1 %v9955_v1  ;;  %v9964_v31 = vld [vmem:[%s13890_s4 + $0x504] ss:$8 sps:$4 sm:$0xff]   ;;  %v9965_v1 = vld [vmem:[%s13890_s4 + $0x3f0] ss:$8 sps:$4 sm:$0xff]  }
 0x2a5   : > { %v3229_v52 = vpop.f32.mrf.mxu1  ;;  %4994 = vmatmul.mubr.bf16.gmra.mxu1 %v11443_v24  ;;  %5468 = vmatprep.subr.bf16.mxu0 %v9958_v40  ;;  %v9959_v24 = vld [vmem:[%s13890_s4 + $0x400] ss:$8 sps:$4 sm:$0xff]   ;;  %v9968_v9 = vld [vmem:[%s13890_s4 + $0x4f0] ss:$8 sps:$4 sm:$0xff]  }
 0x2a6   : > { %v3230_v32 = vadd.f32 %v3229_v52, %v12318_v2  ;;  %4921 = vmatmul.mubr.bf16.gmra.mxu0 %v11441_v18  ;;  %8668 = vmatprep.mubr.msk.bf16.mxu1 %vm2708_vm3, %v11534_v30  ;;  %v12577_v62 = vpop.f32.mrf.mxu0  ;;  %v9962_v18 = vld [vmem:[%s13890_s4 + $0x500] ss:$8 sps:$4 sm:$0xff]  }
 0x2a7   : > { %4930 = vmatprep.mubr.bf16.mxu0 %v11528_v0  ;;  %5396 = vmatpush1.bf16.msra.mxu1 %v9953_v42  ;;  %v3231_v33 = vpop.f32.mrf.mxu1  ;;  %v9967_v0 = vld [vmem:[%s13890_s4 + $0x3f4] ss:$8 sps:$4 sm:$0xff]   ;;  %v9976_v42 = vld [vmem:[%s13890_s4 + $0x4e4] ss:$8 sps:$4 sm:$0xff]  }
 0x2a8   : > { %v12583_v36 = vadd.f32 %v3302_v8, %v3230_v32  ;;  %5469 = vmatpush1.bf16.msra.mxu0 %v9956_v43  ;;  %v3232_v2 = vadd.f32 %v3231_v33, %v12331_v17  ;;  %v3312_v34 = vpop.f32.mrf.mxu0  ;;  %5397 = vmatprep.subr.bf16.mxu1 %v9961_v58 }
 0x2a9   : > { %v3233_v30 = vpop.f32.mrf.mxu1  ;;  %5470 = vmatprep.subr.bf16.mxu0 %v9964_v31  ;;  %v9982_v31 = vld [vmem:[%s13890_s4 + $0x5c4] ss:$8 sps:$4 sm:$0xff]  }
 0x2aa   : > { %v12595_v49 = vadd.f32 %v3304_v45, %v3232_v2  ;;  %v3234_v17 = vadd.f32 %v3233_v30, %v12337_v23  ;;  %v3314_v8 = vpop.f32.mrf.mxu0  ;;  %v9973_v23 = vld [vmem:[%s13890_s4 + $0x3e4] ss:$8 sps:$4 sm:$0xff]   ;;  %v9977_v2 = vld [vmem:[%s13890_s4 + $0x4d0] ss:$8 sps:$4 sm:$0xff]   ;;  %v9988_v30 = vld [vmem:[%s13890_s4 + $0x5b4] ss:$8 sps:$4 sm:$0xff]  }
 0x2ab   : > { %5398 = vmatpush1.bf16.msra.mxu1 %v9959_v24  ;;  %v12598_v4 = vpop.f32.mrf.mxu1 }
 0x2ac   : > { %v12603_v19 = vadd.f32 %v3306_v56, %v3234_v17  ;;  %5471 = vmatpush1.bf16.msra.mxu0 %v9962_v18  ;;  %v3316_v40 = vpop.f32.mrf.mxu0  ;;  %5399 = vmatprep.subr.bf16.mxu1 %v9967_v0  ;;  %v9980_v18 = vld [vmem:[%s13890_s4 + $0x5c0] ss:$8 sps:$4 sm:$0xff]  }
 0x2ad   : > { %v3239_v45 = vpop.f32.mrf.mxu1  ;;  %5004 = vmatmul.mubr.bf16.gmra.mxu1 %v11481_v13  ;;  %5472 = vmatprep.subr.bf16.mxu0 %v9970_v20  ;;  %v9971_v13 = vld [vmem:[%s13890_s4 + $0x3e0] ss:$8 sps:$4 sm:$0xff]  }
 0x2ae   : > { %v3240_v56 = vadd.f32 %v3239_v45, %v12357_v63  ;;  %4931 = vmatmul.mubr.bf16.gmra.mxu0 %v11479_v6  ;;  %5419 = vmatprep.mubr.bf16.mxu1 %v11858_v14  ;;  %v12620_v58 = vpop.f32.mrf.mxu0  ;;  %v9974_v6 = vld [vmem:[%s13890_s4 + $0x4e0] ss:$8 sps:$4 sm:$0xff]   ;;  %v9979_v14 = vld [vmem:[%s13890_s4 + $0x4d4] ss:$8 sps:$4 sm:$0xff]  }
 0x2af   : > { %5400 = vmatpush1.bf16.msra.mxu1 %v9965_v1  ;;  %8793 = vmatprep.mubr.msk.bf16.mxu0 %vm2708_vm3, %v11879_v60  ;;  %v3241_v43 = vpop.f32.mrf.mxu1  ;;  %v9983_v1 = vld [vmem:[%s13890_s4 + $0x4c0] ss:$8 sps:$4 sm:$0xff]  }
 0x2b0   : > { %v12625_v52 = vadd.f32 %v3312_v34, %v3240_v56  ;;  %5473 = vmatpush1.bf16.msra.mxu0 %v9968_v9  ;;  %v3242_v63 = vadd.f32 %v3241_v43, %v12369_v11  ;;  %5401 = vmatprep.subr.bf16.mxu1 %v9973_v23  ;;  %v3322_v11 = vpop.f32.mrf.mxu0  ;;  %v9986_v23 = vld [vmem:[%s13890_s4 + $0x5b0] ss:$8 sps:$4 sm:$0xff]  }
 0x2b1   : > { %v3243_v60 = vpop.f32.mrf.mxu1  ;;  %5474 = vmatprep.subr.bf16.mxu0 %v9976_v42  ;;  %v9994_v42 = vld [vmem:[%s13890_s4 + $0x5a4] ss:$8 sps:$4 sm:$0xff]  }
 0x2b2   : > { %v12637_v32 = vadd.f32 %v3314_v8, %v3242_v63  ;;  %v3244_v33 = vadd.f32 %v3243_v60, %v12375_v27  ;;  %v9985_v27 = vld [vmem:[%s13890_s4 + $0x4c4] ss:$8 sps:$4 sm:$0xff]   ;;  %v3324_v17 = vpop.f32.mrf.mxu0  ;;  %v9995_v60 = vld [vmem:[%s13890_s4 + $0x4a0] ss:$8 sps:$4 sm:$0xff]  }
 0x2b3   : > { %5402 = vmatpush1.bf16.msra.mxu1 %v9971_v13  ;;  %v12640_v24 = vpop.f32.mrf.mxu1  ;;  %v9989_v13 = vld [vmem:[%s13890_s4 + $0x4b0] ss:$8 sps:$4 sm:$0xff]  }
 0x2b4   : > { %v12645_v34 = vadd.f32 %v3316_v40, %v3244_v33  ;;  %5475 = vmatpush1.bf16.msra.mxu0 %v9974_v6  ;;  %5403 = vmatprep.subr.bf16.mxu1 %v9979_v14  ;;  %v9992_v6 = vld [vmem:[%s13890_s4 + $0x5a0] ss:$8 sps:$4 sm:$0xff]   ;;  %v9997_v14 = vld [vmem:[%s13890_s4 + $0x4a4] ss:$8 sps:$4 sm:$0xff]   ;;  %v10003_v33 = vld [vmem:[%s13890_s4 + $0x494] ss:$8 sps:$4 sm:$0xff]  }
 0x2b5   : > { %v3249_v0 = vpop.f32.mrf.mxu1  ;;  %5478 = vmatprep.subr.bf16.mxu0 %v9982_v31  ;;  %v9998_v31 = vld [vmem:[%s13890_s4 + $0x590] ss:$8 sps:$4 sm:$0xff]  }
 0x2b6   : > { %v3250_v20 = vadd.f32 %v3249_v0, %v12395_v39  ;;  %v9991_v39 = vld [vmem:[%s13890_s4 + $0x4b4] ss:$8 sps:$4 sm:$0xff]  }
 0x2b7   : > { %5404 = vmatpush2.bf16.msra.mxu1 %v9977_v2  ;;  %v3251_v8 = vpop.f32.mrf.mxu1  ;;  %v10001_v2 = vld [vmem:[%s13890_s4 + $0x490] ss:$8 sps:$4 sm:$0xff]   ;;  %v10012_v0 = vld [vmem:[%s13890_s4 + $0x574] ss:$8 sps:$4 sm:$0xff]  }
 0x2b8   : > { %v12660_v40 = vadd.f32 %v3322_v11, %v3250_v20  ;;  %5479 = vmatpush2.bf16.msra.mxu0 %v9980_v18  ;;  %v3252_v9 = vadd.f32 %v3251_v8, %v12406_v10  ;;  %5405 = vmatprep.subr.bf16.mxu1 %v9985_v27  ;;  %v3326_v10 = vpop.f32.mrf.mxu0  ;;  %v10006_v11 = vld [vmem:[%s13890_s4 + $0x584] ss:$8 sps:$4 sm:$0xff]   ;;  %v10004_v18 = vld [vmem:[%s13890_s4 + $0x580] ss:$8 sps:$4 sm:$0xff]   ;;  %v10010_v20 = vld [vmem:[%s13890_s4 + $0x570] ss:$8 sps:$4 sm:$0xff]  }
 0x2b9   : > { %v3253_v45 = vpop.f32.mrf.mxu1  ;;  %5480 = vmatprep.subr.bf16.mxu0 %v9988_v30  ;;  %v10009_v27 = vld [vmem:[%s13890_s4 + $0x484] ss:$8 sps:$4 sm:$0xff]   ;;  %v10007_v30 = vld [vmem:[%s13890_s4 + $0x480] ss:$8 sps:$4 sm:$0xff]  }
 0x2ba   : > { %v12672_v56 = vadd.f32 %v3324_v17, %v3252_v9  ;;  %v3254_v43 = vadd.f32 %v3253_v45, %v12411_v47  ;;  %v10000_v47 = vld [vmem:[%s13890_s4 + $0x594] ss:$8 sps:$4 sm:$0xff]   ;;  %v10018_v8 = vld [vmem:[%s13890_s4 + $0x564] ss:$8 sps:$4 sm:$0xff]   ;;  %v10016_v9 = vld [vmem:[%s13890_s4 + $0x560] ss:$8 sps:$4 sm:$0xff]   ;;  %v12740_v45 = vpop.f32.mrf.mxu0 }
 0x2bb   : > { %5406 = vmatpush2.bf16.msra.mxu1 %v9983_v1  ;;  %v10015_v17 = vld [vmem:[%s13890_s4 + $0x474] ss:$8 sps:$4 sm:$0xff]   ;;  %v10013_v1 = vld [vmem:[%s13890_s4 + $0x470] ss:$8 sps:$4 sm:$0xff]  }
 0x2bc   : > { %v12678_v63 = vadd.f32 %v3326_v10, %v3254_v43  ;;  %5481 = vmatpush2.bf16.msra.mxu0 %v9986_v23  ;;  %5407 = vmatprep.subr.bf16.mxu1 %v9991_v39  ;;  %v10021_v23 = vld [vmem:[%s13890_s4 + $0x464] ss:$8 sps:$4 sm:$0xff]   ;;  %v10019_v39 = vld [vmem:[%s13890_s4 + $0x460] ss:$8 sps:$4 sm:$0xff]  }
 0x2bd   : > { %5482 = vmatprep.subr.bf16.mxu0 %v9994_v42  ;;  %v3255_v42 = vpop.f32.mrf.mxu1 }
 0x2bf   : > { %5408 = vmatpush2.bf16.msra.mxu1 %v9989_v13 }
 0x2c0   : > { %5483 = vmatpush2.bf16.msra.mxu0 %v9992_v6  ;;  %5409 = vmatprep.subr.bf16.mxu1 %v9997_v14 }
 0x2c1   : > { %5484 = vmatprep.subr.bf16.mxu0 %v10000_v47 }
 0x2c3   : > { %5410 = vmatpush2.bf16.msra.mxu1 %v9995_v60 }
 0x2c4   : > { %5485 = vmatpush2.bf16.msra.mxu0 %v9998_v31  ;;  %5411 = vmatprep.subr.bf16.mxu1 %v10003_v33 }
 0x2c5   : > { %5486 = vmatprep.subr.bf16.mxu0 %v10006_v11 }
 0x2c7   : > { %5412 = vmatpush2.bf16.msra.mxu1 %v10001_v2 }
 0x2c8   : > { %5487 = vmatpush2.bf16.msra.mxu0 %v10004_v18  ;;  %5413 = vmatprep.subr.bf16.mxu1 %v10009_v27 }
 0x2c9   : > { %5488 = vmatprep.subr.bf16.mxu0 %v10012_v0 }
 0x2cb   : > { %5414 = vmatpush2.bf16.msra.mxu1 %v10007_v30 }
 0x2cc   : > { %5489 = vmatpush2.bf16.msra.mxu0 %v10010_v20  ;;  %5415 = vmatprep.subr.bf16.mxu1 %v10015_v17 }
 0x2cd   : > { %5490 = vmatprep.subr.bf16.mxu0 %v10018_v8 }
 0x2cf   : > { %5416 = vmatpush2.bf16.msra.mxu1 %v10013_v1 }
 0x2d0   : > { %5491 = vmatpush2.bf16.msra.mxu0 %v10016_v9  ;;  %5417 = vmatprep.subr.bf16.mxu1 %v10021_v23 }
 0x2d3   : > { %5493 = vmatmul.mubr.bf16.vlgmr.msra.gmra.mxu0 %v11999_v37  ;;  %5418 = vmatpush2.bf16.msra.mxu1 %v10019_v39 }
 0x2d4   : > { %8794 = vmatprep.mubr.msk.bf16.mxu0 %vm2708_vm3, %v12014_v51 }
 0x2d6   : > { %5420 = vmatmul.mubr.bf16.vlgmr.msra.gmra.mxu1 %v11989_v21 }
 0x2d7   : > { %5429 = vmatprep.mubr.bf16.mxu1 %v12004_v38 }
 0x2d8   : > { %v3806_v43 = vpop.f32.mrf.mxu0 }
 0x2d9   : > { %v3879_v10 = vpop.f32.mrf.mxu1 }
 0x2da   : > { %v3880_v13 = vadd.f32 %v3879_v10, %v3806_v43  ;;  %v3808_v6 = vpop.f32.mrf.mxu0 }
 0x2db   : > { %5503 = vmatmul.mubr.bf16.gmra.mxu0 %v12052_v46  ;;  %v3881_v14 = vpop.f32.mrf.mxu1 }
 0x2dc   : > { %v12746_v37 = vadd.f32 %v3880_v13, %v12541_v28  ;;  %8795 = vmatprep.mubr.msk.bf16.mxu0 %vm2708_vm3, %v12065_v26  ;;  %v3882_v51 = vadd.f32 %v3881_v14, %v3808_v6  ;;  %v3810_v47 = vpop.f32.mrf.mxu0 }
 0x2dd   : > { %v3883_v60 = vpop.f32.mrf.mxu1 }
 0x2de   : > { %v12751_v21 = vadd.f32 %v3882_v51, %v12553_v7  ;;  %v3884_v38 = vadd.f32 %v3883_v60, %v3810_v47  ;;  %5430 = vmatmul.mubr.bf16.gmra.mxu1 %v12042_v59  ;;  %v12754_v31 = vpop.f32.mrf.mxu0 }
 0x2df   : > { %5439 = vmatprep.mubr.bf16.mxu1 %v12056_v44  ;;  %v12757_v46 = vpop.f32.mrf.mxu1 }
 0x2e0   : > { %v12760_v28 = vadd.f32 %v3884_v38, %v12561_v25  ;;  %v3816_v33 = vpop.f32.mrf.mxu0 }
 0x2e1   : > { %v3889_v26 = vpop.f32.mrf.mxu1 }
 0x2e2   : > { %v3890_v11 = vadd.f32 %v3889_v26, %v3816_v33  ;;  %v3818_v2 = vpop.f32.mrf.mxu0 }
 0x2e3   : > { %5513 = vmatmul.mubr.bf16.gmra.mxu0 %v12103_v55  ;;  %v3891_v7 = vpop.f32.mrf.mxu1 }
 0x2e4   : > { %v12764_v18 = vadd.f32 %v3890_v11, %v12583_v36  ;;  %8796 = vmatprep.mubr.msk.bf16.mxu0 %vm2708_vm3, %v12036_v57  ;;  %v3892_v59 = vadd.f32 %v3891_v7, %v3818_v2  ;;  %v3820_v44 = vpop.f32.mrf.mxu0 }
 0x2e5   : > { %v3893_v27 = vpop.f32.mrf.mxu1 }
 0x2e6   : > { %v12769_v0 = vadd.f32 %v3892_v59, %v12595_v49  ;;  %v3894_v25 = vadd.f32 %v3893_v27, %v3820_v44  ;;  %5440 = vmatmul.mubr.bf16.gmra.mxu1 %v12092_v48  ;;  %v3822_v30 = vpop.f32.mrf.mxu0 }
 0x2e7   : > { %5449 = vmatprep.mubr.bf16.mxu1 %v12033_v16  ;;  %v3895_v55 = vpop.f32.mrf.mxu1 }
 0x2e8   : > { %v12774_v20 = vadd.f32 %v3894_v25, %v12603_v19  ;;  %v12776_v36 = vadd.f32 %v3895_v55, %v3822_v30  ;;  %v3826_v17 = vpop.f32.mrf.mxu0 }
 0x2e9   : > { %v3899_v57 = vpop.f32.mrf.mxu1 }
 0x2ea   : > { %v3900_v8 = vadd.f32 %v3899_v57, %v3826_v17  ;;  %v3828_v1 = vpop.f32.mrf.mxu0 }
 0x2eb   : > { %5523 = vmatmul.mubr.bf16.gmra.mxu0 %v12082_v61  ;;  %v3901_v49 = vpop.f32.mrf.mxu1 }
 0x2ec   : > { %v12780_v9 = vadd.f32 %v3900_v8, %v12625_v52  ;;  %v3902_v48 = vadd.f32 %v3901_v49, %v3828_v1  ;;  %v3830_v23 = vpop.f32.mrf.mxu0  ;;  %v2865_v52 = vadd.f32 %v12516_v50, %v12498_v41 }
 0x2ed   : > { %v3903_v39 = vpop.f32.mrf.mxu1 }
 0x2ee   : > { %v12783_v16 = vadd.f32 %v3902_v48, %v12637_v32  ;;  %v3904_v19 = vadd.f32 %v3903_v39, %v3830_v23  ;;  %5450 = vmatmul.mubr.bf16.gmra.mxu1 %v12076_v5  ;;  %v3832_v43 = vpop.f32.mrf.mxu0  ;;  %v3256_v32 = vadd.f32 %v3255_v42, %v2865_v52 }
 0x2ef   : > { %v3905_v10 = vpop.f32.mrf.mxu1 }
 0x2f0   : > { %v12787_v13 = vadd.f32 %v3904_v19, %v12645_v34  ;;  %v12789_v6 = vadd.f32 %v3905_v10, %v3832_v43  ;;  %v3836_v61 = vpop.f32.mrf.mxu0  ;;  %v3329_v59 = vadd.f32 %v12740_v45, %v3256_v32 }
 0x2f1   : > { %v3909_v14 = vpop.f32.mrf.mxu1 }
 0x2f2   : > { %v3910_v51 = vadd.f32 %v3909_v14, %v3836_v61  ;;  %v3838_v47 = vpop.f32.mrf.mxu0 }
 0x2f3   : > { %v3911_v60 = vpop.f32.mrf.mxu1 }
 0x2f4   : > { %v12794_v38 = vadd.f32 %v3910_v51, %v12660_v40  ;;  %v3912_v5 = vadd.f32 %v3911_v60, %v3838_v47  ;;  %v3840_v33 = vpop.f32.mrf.mxu0 }
 0x2f5   : > { %v3913_v26 = vpop.f32.mrf.mxu1 }
 0x2f6   : > { %v12797_v34 = vadd.f32 %v3912_v5, %v12672_v56  ;;  %v3914_v11 = vadd.f32 %v3913_v26, %v3840_v33  ;;  %v3842_v2 = vpop.f32.mrf.mxu0 }
 0x2f7   : > { %v3915_v7 = vpop.f32.mrf.mxu1 }
 0x2f8   : > { %13966 = vst [vmem:[#allocation11_spill] sm:$0xff] %v12797_v34  ;;  %v12801_v41 = vadd.f32 %v3914_v11, %v12678_v63  ;;  %v3916_v50 = vadd.f32 %v3915_v7, %v3842_v2 }
 0x2fa   : > { %13967 = vst [vmem:[#allocation25_spill] sm:$0xff] %v12801_v41  ;;  %v12803_v44 = vadd.f32 %v3916_v50, %v3329_v59 }
 0x2fc   : > { %13968 = vst [vmem:[#allocation26_spill] sm:$0xff] %v12803_v44 }
 0x316   : > { %v4519_v42 = vpop.f32.mrf.mxu0 }
 0x318   : > { %v4521_v40 = vpop.f32.mrf.mxu0 }
 0x319   : > { %v4446_v27 = vpop.f32.mrf.mxu1 }
 0x31a   : > { %v4520_v25 = vadd.f32 %v4519_v42, %v4446_v27  ;;  %v4523_v30 = vpop.f32.mrf.mxu0 }
 0x31b   : > { %v4448_v55 = vpop.f32.mrf.mxu1 }
 0x31c   : > { %v4522_v17 = vadd.f32 %v4521_v40, %v4448_v55  ;;  %v4525_v56 = vpop.f32.mrf.mxu0 }
 0x31d   : > { %v4450_v57 = vpop.f32.mrf.mxu1 }
 0x31e   : > { %v4524_v8 = vadd.f32 %v4523_v30, %v4450_v57  ;;  %v4529_v1 = vpop.f32.mrf.mxu0 }
 0x31f   : > { %v4452_v49 = vpop.f32.mrf.mxu1 }
 0x320   : > { %v4526_v48 = vadd.f32 %v4525_v56, %v4452_v49  ;;  %v4531_v45 = vpop.f32.mrf.mxu0 }
 0x321   : > { %v4456_v23 = vpop.f32.mrf.mxu1 }
 0x322   : > { %v12805_v63 = vadd.f32 %v4529_v1, %v4456_v23  ;;  %v4533_v39 = vpop.f32.mrf.mxu0 }
 0x323   : > { %v4458_v19 = vpop.f32.mrf.mxu1 }
 0x324   : > { %v12807_v43 = vadd.f32 %v4531_v45, %v4458_v19  ;;  %v4535_v10 = vpop.f32.mrf.mxu0  ;;  %v13918_v45 = vmov 0  }
 0x325   : > { %v4460_v61 = vpop.f32.mrf.mxu1  ;;  %5665 = vmatprep.mubr.bf16.mxu0 %v13918_v45 }
 0x326   : > { %v12809_v14 = vadd.f32 %v4533_v39, %v4460_v61  ;;  %v4539_v52 = vpop.f32.mrf.mxu0 }
 0x327   : > { %v4462_v51 = vpop.f32.mrf.mxu1 }
 0x328   : > { %v12811_v47 = vadd.f32 %v4535_v10, %v4462_v51  ;;  %v4541_v60 = vpop.f32.mrf.mxu0 }
 0x329   : > { %v4466_v32 = vpop.f32.mrf.mxu1 }
 0x32a   : > { %v12813_v5 = vadd.f32 %v4539_v52, %v4466_v32  ;;  %v4543_v33 = vpop.f32.mrf.mxu0 }
 0x32b   : > { %v4468_v26 = vpop.f32.mrf.mxu1 }
 0x32c   : > { %v12815_v11 = vadd.f32 %v4541_v60, %v4468_v26  ;;  %v4545_v2 = vpop.f32.mrf.mxu0 }
 0x32d   : > { %v4470_v7 = vpop.f32.mrf.mxu1 }
 0x32e   : > { %v12817_v59 = vadd.f32 %v4543_v33, %v4470_v7  ;;  %v4549_v50 = vpop.f32.mrf.mxu0 }
 0x32f   : > { %v4472_v42 = vpop.f32.mrf.mxu1 }
 0x330   : > { %v12819_v40 = vadd.f32 %v4545_v2, %v4472_v42  ;;  %v4551_v55 = vpop.f32.mrf.mxu0 }
 0x331   : > { %v4476_v27 = vpop.f32.mrf.mxu1 }
 0x332   : > { %v12821_v30 = vadd.f32 %v4549_v50, %v4476_v27  ;;  %v12827_v49 = vpop.f32.mrf.mxu0 }
 0x333   : > { %v4478_v56 = vpop.f32.mrf.mxu1 }
 0x334   : > { %13969 = vst [vmem:[#allocation12_spill] sm:$0xff] %v12821_v30  ;;  %v12823_v57 = vadd.f32 %v4551_v55, %v4478_v56  ;;  %v12832_v39 = vpop.f32.mrf.mxu0 }
 0x335   : > { %v12825_v1 = vpop.f32.mrf.mxu1  ;;  %13972 = vst [vmem:[#allocation15_spill] sm:$0xff] %v12832_v39 }
 0x336   : > { %13970 = vst [vmem:[#allocation13_spill] sm:$0xff] %v12823_v57 }
 0x337   : > { %v12830_v23 = vpop.f32.mrf.mxu1 }
 0x338   : > { %13971 = vst [vmem:[#allocation14_spill] sm:$0xff] %v12830_v23 }
 0x355   : > { %v4975_v19 = vpop.f32.mrf.mxu1 }
 0x356   : > { %v4902_v10 = vpop.f32.mrf.mxu0 }
 0x357   : > { %v4903_v61 = vadd.f32 %v4902_v10, %v4520_v25  ;;  %v4977_v52 = vpop.f32.mrf.mxu1 }
 0x358   : > { %v4904_v51 = vpop.f32.mrf.mxu0 }
 0x359   : > { %v12834_v60 = vadd.f32 %v4975_v19, %v4903_v61  ;;  %v4905_v32 = vadd.f32 %v4904_v51, %v4522_v17  ;;  %v4979_v26 = vpop.f32.mrf.mxu1  ;;  %v10026_v17 = vld [vmem:[%s13894_s8 + $0x70] ss:$8 sps:$4 sm:$0xff]   ;;  %v10029_v61 = vld [vmem:[%s13894_s8 + $0x60] ss:$8 sps:$4 sm:$0xff]   ;;  %v10034_v51 = vld [vmem:[%s13894_s8 + $0x54] ss:$8 sps:$4 sm:$0xff]  }
 0x35a   : > { %v4906_v33 = vpop.f32.mrf.mxu0 }
 0x35b   : > { %v12836_v2 = vadd.f32 %v4977_v52, %v4905_v32  ;;  %v4907_v7 = vadd.f32 %v4906_v33, %v4524_v8  ;;  %v4981_v55 = vpop.f32.mrf.mxu1  ;;  %v10028_v8 = vld [vmem:[%s13894_s8 + $0x74] ss:$8 sps:$4 sm:$0xff]   ;;  %v10032_v33 = vld [vmem:[%s13894_s8 + $0x50] ss:$8 sps:$4 sm:$0xff]  }
 0x35c   : > { %v4908_v50 = vpop.f32.mrf.mxu0  ;;  %6227 = vmatprep.subr.bf16.mxu1 %v10028_v8 }
 0x35d   : > { %v12838_v42 = vadd.f32 %v4979_v26, %v4907_v7  ;;  %v4909_v27 = vadd.f32 %v4908_v50, %v4526_v48  ;;  %v12844_v25 = vpop.f32.mrf.mxu1  ;;  %v10031_v48 = vld [vmem:[%s13894_s8 + $0x64] ss:$8 sps:$4 sm:$0xff]   ;;  %6228 = vmatpush1.bf16.msra.mxu1 %v10026_v17  ;;  %v10046_v17 = vld [vmem:[%s13894_s8 + $0x34] ss:$8 sps:$4 sm:$0xff]  }
 0x35e   : > { %v12842_v45 = vpop.f32.mrf.mxu0  ;;  %6229 = vmatprep.subr.bf16.mxu1 %v10031_v48  ;;  %v10040_v7 = vld [vmem:[%s13894_s8 + $0x44] ss:$8 sps:$4 sm:$0xff]   ;;  %v10044_v48 = vld [vmem:[%s13894_s8 + $0x30] ss:$8 sps:$4 sm:$0xff]  }
 0x35f   : > { %v12840_v56 = vadd.f32 %v4981_v55, %v4909_v27  ;;  %v12857_v19 = vpop.f32.mrf.mxu1  ;;  %v10038_v27 = vld [vmem:[%s13894_s8 + $0x40] ss:$8 sps:$4 sm:$0xff]  }
 0x360   : > { %v12846_v10 = vpop.f32.mrf.mxu0 }
 0x361   : > { %v12867_v32 = vpop.f32.mrf.mxu1  ;;  %6230 = vmatpush1.bf16.msra.mxu1 %v10029_v61 }
 0x362   : > { %v12862_v52 = vpop.f32.mrf.mxu0  ;;  %6231 = vmatprep.subr.bf16.mxu1 %v10034_v51  ;;  %v10052_v51 = vld [vmem:[%s13894_s8 + $0x24] ss:$8 sps:$4 sm:$0xff]  }
 0x363   : > { %v12877_v50 = vpop.f32.mrf.mxu1 }
 0x364   : > { %v12872_v26 = vpop.f32.mrf.mxu0 }
 0x365   : > { %6232 = vmatpush1.bf16.msra.mxu1 %v10032_v33  ;;  %v12887_v8 = vpop.f32.mrf.mxu1 }
 0x366   : > { %v12882_v55 = vpop.f32.mrf.mxu0  ;;  %6233 = vmatprep.subr.bf16.mxu1 %v10040_v7  ;;  %v10050_v7 = vld [vmem:[%s13894_s8 + $0x20] ss:$8 sps:$4 sm:$0xff]  }
 0x367   : > { %v12897_v33 = vpop.f32.mrf.mxu1 }
 0x368   : > { %v12892_v61 = vpop.f32.mrf.mxu0 }
 0x369   : > { %6234 = vmatpush1.bf16.msra.mxu1 %v10038_v27  ;;  %v10058_v27 = vld [vmem:[%s13894_s8 + $0x14] ss:$8 sps:$4 sm:$0xff]   ;;  %v12907_v41 = vpop.f32.mrf.mxu1 }
 0x36a   : > { %6235 = vmatprep.subr.bf16.mxu1 %v10046_v17  ;;  %v12902_v44 = vpop.f32.mrf.mxu0  ;;  %13973 = vst [vmem:[#allocation16_spill] sm:$0xff] %v12907_v41  ;;  %v10056_v17 = vld [vmem:[%s13894_s8 + $0x10] ss:$8 sps:$4 sm:$0xff]  }
 0x36b   : > { %v12917_v57 = vpop.f32.mrf.mxu1 }
 0x36c   : > { %v12912_v34 = vpop.f32.mrf.mxu0  ;;  %13974 = vst [vmem:[#allocation17_spill] sm:$0xff] %v12917_v57 }
 0x36d   : > { %6236 = vmatpush1.bf16.msra.mxu1 %v10044_v48  ;;  %v10064_v48 = vld [vmem:[%s13894_s8 + $0x4] ss:$8 sps:$4 sm:$0xff]  }
 0x36e   : > { %6237 = vmatprep.subr.bf16.mxu1 %v10052_v51  ;;  %v10062_v51 = vld [vmem:[%s13894_s8] ss:$8 sps:$4 sm:$0xff]   ;;  %v12922_v41 = vpop.f32.mrf.mxu0 }
 0x36f   : > { %13975 = vst [vmem:[#allocation18_spill] sm:$0xff] %v12922_v41  ;;  %v2136_v41 = vld [vmem:[%s13891_s5] sm:$0x3] }
 0x370   : > { %v12928_v30 = vpop.f32.mrf.mxu0 }
 0x371   : > { %6238 = vmatpush1.bf16.msra.mxu1 %v10050_v7  ;;  %v12924_v7 = vpop.f32.mrf.mxu1  ;;  %13977 = vst [vmem:[#allocation20_spill] sm:$0xff] %v12928_v30 }
 0x372   : > { %6239 = vmatprep.subr.bf16.mxu1 %v10058_v27  ;;  %13976 = vst [vmem:[#allocation19_spill] sm:$0xff] %v12924_v7  ;;  %v2835_v27 = vadd.f32 %v12306_v29, %v12301_v15  ;;  %v13979_v7 = vld [vmem:[#allocation24_spill] sm:$0xff] }
 0x373   : > { %v12933_v57 = vpop.f32.mrf.mxu1 }
 0x374   : > { %v3226_v39 = vadd.f32 %v12556_v3, %v2835_v27  ;;  %13978 = vst [vmem:[#allocation21_spill] sm:$0xff] %v12933_v57  ;;  %v12945_v3 = vrot.slane %v2136_v41, %v13979_v7  ;;  %v13980_v27 = vld [vmem:[#allocation23_spill] sm:$0xff]  ;;  %v2855_v57 = vadd.f32 %v12384_v53, %v12379_v12 }
 0x375   : > { %6240 = vmatpush1.bf16.msra.mxu1 %v10056_v17  ;;  %v2845_v17 = vadd.f32 %v12345_v54, %v12340_v22  ;;  %v12948_v22 = vrot.slane %v2136_v41, %v13980_v27  ;;  %v12950_v54 = vpop.f32.mrf.mxu1 }
 0x376   : > { %6241 = vmatprep.subr.bf16.mxu1 %v10064_v48  ;;  %v3886_v48 = vadd.f32 %v12757_v46, %v12754_v31  ;;  %v3299_v29 = vadd.f32 %v12535_v35, %v3226_v39  ;;  %v12962_v41 = vadd.f32 %v12945_v3, %v12751_v21 }
 0x377   : > { %v3236_v15 = vadd.f32 %v12598_v4, %v2845_v17  ;;  %v3246_v4 = vadd.f32 %v12640_v24, %v2855_v57  ;;  %v3945_v35 = vadd.f32 %v12948_v22, %v12746_v37  ;;  %v12965_v17 = vpop.f32.mrf.mxu1  ;;  %v12969_v12 = vadd.f32 %v12948_v22, %v12760_v28 }
 0x378   : > { %v3921_v30 = vadd.f32 %v3886_v48, %v3299_v29  ;;  %v12976_v24 = vadd.f32 %v12948_v22, %v12764_v18  ;;  %v12980_v37 = vadd.f32 %v12945_v3, %v12769_v0  ;;  %v12985_v57 = vadd.f32 %v12948_v22, %v12774_v20 }
 0x379   : > { %6242 = vmatpush1.bf16.msra.mxu1 %v10062_v51  ;;  %v12940_v51 = vpop.f32.mrf.mxu0  ;;  %v3309_v31 = vadd.f32 %v12577_v62, %v3236_v15  ;;  %v3962_v15 = vmax.f32 %v12962_v41, 0.0  ;;  %v12993_v18 = vadd.f32 %v12948_v22, %v12780_v9  ;;  %v13006_v9 = vadd.f32 %v12948_v22, %v12787_v13 }
 0x37a   : > { %v12972_v53 = vadd.f32 %v12945_v3, %v3921_v30  ;;  %v3961_v30 = vmax.f32 %v3945_v35, 0.0  ;;  %v4915_v13 = vadd.f32 %v12846_v10, %v12807_v43 }
 0x37b   : > { %v12954_v23 = vpop.f32.mrf.mxu0  ;;  %v3925_v39 = vadd.f32 %v12776_v36, %v3309_v31  ;;  %v3319_v36 = vadd.f32 %v12620_v58, %v3246_v4  ;;  %v3963_v31 = vmax.f32 %v12969_v12, 0.0 }
 0x37d   : > { %v12989_v29 = vadd.f32 %v12945_v3, %v3925_v39  ;;  %v13002_v39 = vadd.f32 %v12945_v3, %v12783_v16  ;;  %v4913_v16 = vadd.f32 %v12842_v45, %v12805_v63  ;;  %v4917_v63 = vadd.f32 %v12862_v52, %v12809_v14 }
 0x393   : > { %v5494_v46 = vpop.f32.mrf.mxu0 }
 0x395   : > { %v5496_v62 = vpop.f32.mrf.mxu0 }
 0x396   : > { %v5421_v21 = vpop.f32.mrf.mxu1 }
 0x397   : > { %v5495_v28 = vadd.f32 %v5494_v46, %v5421_v21  ;;  %v5498_v48 = vpop.f32.mrf.mxu0 }
 0x398   : > { %v5423_v0 = vpop.f32.mrf.mxu1 }
 0x399   : > { %v5533_v20 = vadd.f32 %v5495_v28, %v12834_v60  ;;  %v5497_v4 = vadd.f32 %v5496_v62, %v5423_v0  ;;  %v5500_v46 = vpop.f32.mrf.mxu0  ;;  %v3968_v0 = vmax.f32 %v12989_v29, 0.0 }
 0x39a   : > { %v5425_v21 = vpop.f32.mrf.mxu1 }
 0x39b   : > { %v5549_v58 = vadd.f32 %v5533_v20, %v12948_v22  ;;  %v5534_v60 = vadd.f32 %v5497_v4, %v12836_v2  ;;  %v5499_v62 = vadd.f32 %v5498_v48, %v5425_v21  ;;  %v5504_v28 = vpop.f32.mrf.mxu0  ;;  %v3970_v48 = vmax.f32 %v13002_v39, 0.0 }
 0x39c   : > { %v5427_v35 = vpop.f32.mrf.mxu1  ;;  %v3971_v4 = vmax.f32 %v13006_v9, 0.0  ;;  %v3929_v21 = vadd.f32 %v12789_v6, %v3319_v36 }
 0x39d   : > { %v5565_v27 = vmax.f32 %v5549_v58, 0.0  ;;  %v5550_v12 = vadd.f32 %v5534_v60, %v12945_v3  ;;  %v5535_v20 = vadd.f32 %v5499_v62, %v12838_v42  ;;  %v5501_v7 = vadd.f32 %v5500_v46, %v5427_v35  ;;  %v5506_v2 = vpop.f32.mrf.mxu0 }
 0x39e   : > { %v5431_v45 = vpop.f32.mrf.mxu1  ;;  %v4986_v42 = vadd.f32 %v12844_v25, %v4913_v16  ;;  %v4988_v46 = vadd.f32 %v12857_v19, %v4915_v13  ;;  %v4919_v35 = vadd.f32 %v12872_v26, %v12811_v47  ;;  %v4925_v25 = vadd.f32 %v12892_v61, %v12815_v11 }
 0x39f   : > { %v5581_v41 = vmax.f32 %v3961_v30, %v5565_v27  ;;  %v5566_v43 = vmax.f32 %v5550_v12, 0.0  ;;  %v5551_v10 = vadd.f32 %v5535_v20, %v12948_v22  ;;  %v5536_v58 = vadd.f32 %v5501_v7, %v12840_v56  ;;  %v5508_v60 = vpop.f32.mrf.mxu0 }
 0x3a0   : > { %v5505_v62 = vadd.f32 %v5504_v28, %v5431_v45  ;;  %v5433_v6 = vpop.f32.mrf.mxu1  ;;  %v4990_v12 = vadd.f32 %v12867_v32, %v4917_v63  ;;  %v4923_v56 = vadd.f32 %v12882_v55, %v12813_v5  ;;  %v13037_v20 = vadd.f32 %v12945_v3, %v3929_v21 }
 0x3a1   : > { %v5567_v36 = vmax.f32 %v5551_v10, 0.0  ;;  %v5552_v14 = vadd.f32 %v5536_v58, %v12945_v3  ;;  %v5507_v52 = vadd.f32 %v5506_v2, %v5433_v6  ;;  %v5510_v27 = vpop.f32.mrf.mxu0  ;;  %v5582_v30 = vmax.f32 %v3962_v15, %v5566_v43 }
 0x3a2   : > { %v5537_v19 = vadd.f32 %v5505_v62, %v4986_v42  ;;  %v5435_v7 = vpop.f32.mrf.mxu1  ;;  %v13041_v15 = vadd.f32 %v12948_v22, %v12794_v38  ;;  %v4992_v32 = vadd.f32 %v12877_v50, %v4919_v35  ;;  %v13981_v63 = vmax.f32 %v12972_v53, 0.0 }
 0x3a3   : > { %v5583_v16 = vmax.f32 %v3963_v31, %v5567_v36  ;;  %v5568_v47 = vmax.f32 %v5552_v14, 0.0  ;;  %v5538_v26 = vadd.f32 %v5507_v52, %v4988_v46  ;;  %v5509_v28 = vadd.f32 %v5508_v60, %v5435_v7  ;;  %v5514_v13 = vpop.f32.mrf.mxu0 }
 0x3a4   : > { %v5553_v5 = vadd.f32 %v5537_v19, %v12948_v22  ;;  %v5437_v55 = vpop.f32.mrf.mxu1  ;;  %v4996_v21 = vadd.f32 %v12887_v8, %v4923_v56  ;;  %v4998_v43 = vadd.f32 %v12897_v33, %v4925_v25  ;;  %v4927_v62 = vadd.f32 %v12902_v44, %v12817_v59  ;;  %v13983_v25 = vld [vmem:[#allocation14_spill] sm:$0xff]  ;;  %v13984_v44 = vld [vmem:[#allocation15_spill] sm:$0xff]  ;;  %v13985_v19 = vld [vmem:[#allocation12_spill] sm:$0xff] }
 0x3a5   : > { %v5554_v11 = vadd.f32 %v5538_v26, %v12945_v3  ;;  %v5539_v61 = vadd.f32 %v5509_v28, %v4990_v12  ;;  %v5511_v31 = vadd.f32 %v5510_v27, %v5437_v55  ;;  %v5516_v2 = vpop.f32.mrf.mxu0  ;;  %v5584_v45 = vmax.f32 %v13981_v63, %v5568_v47 }
 0x3a6   : > { %v5569_v10 = vmax.f32 %v5553_v5, 0.0  ;;  %v5441_v38 = vpop.f32.mrf.mxu1  ;;  %v13050_v58 = vpack.c.bf16 %v5583_v16, %v5581_v41  ;;  %v4929_v53 = vadd.f32 %v12912_v34, %v12819_v40  ;;  %v13982_v8 = vmax.f32 %v12976_v24, 0.0  ;;  %v13986_v34 = vld [vmem:[#allocation18_spill] sm:$0xff]  ;;  %v13989_v5 = vld [vmem:[#allocation16_spill] sm:$0xff] }
 0x3a7   : > { %v5570_v50 = vmax.f32 %v5554_v11, 0.0  ;;  %v5555_v60 = vadd.f32 %v5539_v61, %v12948_v22  ;;  %v5540_v42 = vadd.f32 %v5511_v31, %v4992_v32  ;;  %v5515_v46 = vadd.f32 %v5514_v13, %v5441_v38  ;;  %v5518_v35 = vpop.f32.mrf.mxu0  ;;  %v13991_v11 = vld [vmem:[#allocation13_spill] sm:$0xff]  ;;  %v13992_v61 = vld [vmem:[#allocation20_spill] sm:$0xff]  ;;  %v13993_v38 = vld [vmem:[#allocation19_spill] sm:$0xff] }
 0x3a8   : > { %v5585_v6 = vmax.f32 %v13982_v8, %v5569_v10  ;;  %v5443_v33 = vpop.f32.mrf.mxu1  ;;  %v13059_v36 = vpack.c.bf16 %v5584_v45, %v5582_v30  ;;  %v4554_v56 = vadd.f32 %v12827_v49, %v12825_v1  ;;  %v4556_v59 = vadd.f32 %v13984_v44, %v13983_v25  ;;  %v13990_v49 = vld [vmem:[#allocation17_spill] sm:$0xff]  ;;  %v13996_v44 = vld [vmem:[#allocation11_spill] sm:$0xff] }
 0x3a9   : > { %v5571_v41 = vmax.f32 %v5555_v60, 0.0  ;;  %v5556_v14 = vadd.f32 %v5540_v42, %v12945_v3  ;;  %v5541_v52 = vadd.f32 %v5515_v46, %v4996_v21  ;;  %v5517_v27 = vadd.f32 %v5516_v2, %v5443_v33  ;;  %v5520_v12 = vpop.f32.mrf.mxu0 }
 0x3aa   : > { %v4933_v40 = vadd.f32 %v13986_v34, %v13985_v19  ;;  %v5445_v24 = vpop.f32.mrf.mxu1  ;;  %v13987_v7 = vmax.f32 %v12980_v37, 0.0  ;;  %v13988_v16 = vmax.f32 %v12985_v57, 0.0  ;;  %v5000_v1 = vadd.f32 %v13989_v5, %v4927_v62 }
 0x3ab   : > { %v5572_v26 = vmax.f32 %v5556_v14, 0.0  ;;  %v5557_v28 = vadd.f32 %v5541_v52, %v12948_v22  ;;  %v5542_v13 = vadd.f32 %v5517_v27, %v4998_v43  ;;  %v5524_v32 = vpop.f32.mrf.mxu0  ;;  %v5002_v55 = vadd.f32 %v13990_v49, %v4929_v53  ;;  %v13998_v49 = vld [vmem:[#allocation26_spill] sm:$0xff] }
 0x3ac   : > { %v5586_v30 = vmax.f32 %v13987_v7, %v5570_v50  ;;  %v5587_v47 = vmax.f32 %v13988_v16, %v5571_v41  ;;  %v4935_v31 = vadd.f32 %v13992_v61, %v13991_v11  ;;  %v5519_v2 = vadd.f32 %v5518_v35, %v5445_v24  ;;  %v5447_v63 = vpop.f32.mrf.mxu1  ;;  %v13995_v41 = vld [vmem:[#allocation21_spill] sm:$0xff] }
 0x3ad   : > { %v5573_v45 = vmax.f32 %v5557_v28, 0.0  ;;  %v5558_v37 = vadd.f32 %v5542_v13, %v12945_v3  ;;  %v5521_v21 = vadd.f32 %v5520_v12, %v5447_v63  ;;  %v5526_v57 = vpop.f32.mrf.mxu0  ;;  %v5588_v10 = vmax.f32 %v3968_v0, %v5572_v26 }
 0x3ae   : > { %v5006_v43 = vadd.f32 %v13993_v38, %v4933_v40  ;;  %v4937_v50 = vadd.f32 %v12940_v51, %v4554_v56  ;;  %v5543_v60 = vadd.f32 %v5519_v2, %v5000_v1  ;;  %v5451_v42 = vpop.f32.mrf.mxu1  ;;  %v13082_v46 = vpack.c.bf16 %v5587_v47, %v5585_v6  ;;  %v13997_v47 = vld [vmem:[#allocation25_spill] sm:$0xff] }
 0x3af   : > { %v13994_v62 = vmax.f32 %v12993_v18, 0.0  ;;  %v5574_v53 = vmax.f32 %v5558_v37, 0.0  ;;  %v5544_v8 = vadd.f32 %v5521_v21, %v5002_v55  ;;  %v5525_v33 = vadd.f32 %v5524_v32, %v5451_v42  ;;  %v5528_v0 = vpop.f32.mrf.mxu0  ;;  %v10023_v42 = vld [vmem:[%s13892_s6 + $0x8] sm:$0x7f]  }
 0x3b0   : > { %v5008_v14 = vadd.f32 %v13995_v41, %v4935_v31  ;;  %v4939_v52 = vadd.f32 %v12954_v23, %v4556_v59  ;;  %v5559_v29 = vadd.f32 %v5543_v60, %v12948_v22  ;;  %v5453_v27 = vpop.f32.mrf.mxu1  ;;  %v5600_v12 = vpack.c.bf16 %v5588_v10, %v5586_v30  ;;  %v10055_v41 = vld [vmem:[%s13894_s8 + $0x134] ss:$8 sps:$4 sm:$0xff]  }
 0x3b1   : > { %v5589_v35 = vmax.f32 %v13994_v62, %v5573_v45  ;;  %v5560_v51 = vadd.f32 %v5544_v8, %v12945_v3  ;;  %v5545_v56 = vadd.f32 %v5525_v33, %v5006_v43  ;;  %v5527_v6 = vadd.f32 %v5526_v57, %v5453_v27  ;;  %v5530_v26 = vpop.f32.mrf.mxu0  ;;  %v10037_v62 = vld [vmem:[%s13894_s8 + $0x164] ss:$8 sps:$4 sm:$0xff]   ;;  %v10047_v33 = vld [vmem:[%s13894_s8 + $0x140] ss:$8 sps:$4 sm:$0xff]   ;;  %v10067_v27 = vld [vmem:[%s13894_s8 + $0x114] ss:$8 sps:$4 sm:$0xff]  }
 0x3b2   : > { %v5590_v18 = vmax.f32 %v3970_v48, %v5574_v53  ;;  %v3972_v25 = vmax.f32 %v13037_v20, 0.0  ;;  %v3958_v19 = vadd.f32 %v12945_v3, %v13996_v44  ;;  %v5010_v34 = vadd.f32 %v12950_v54, %v4937_v50  ;;  %v5455_v59 = vpop.f32.mrf.mxu1  ;;  %v10035_v53 = vld [vmem:[%s13894_s8 + $0x160] ss:$8 sps:$4 sm:$0xff]   ;;  %v10077_v44 = vld [vmem:[%s13894_s8 + $0xf0] ss:$8 sps:$4 sm:$0xff]  }
 0x3b3   : > { %v5575_v23 = vmax.f32 %v5559_v29, 0.0  ;;  %v5576_v40 = vmax.f32 %v5560_v51, 0.0  ;;  %v5561_v24 = vadd.f32 %v5545_v56, %v12948_v22  ;;  %v5546_v7 = vadd.f32 %v5527_v6, %v5008_v14  ;;  %v10025_v8 = vld [vmem:[%s13893_s7 + $0x8] sm:$0x7f]   ;;  %v10053_v14 = vld [vmem:[%s13894_s8 + $0x130] ss:$8 sps:$4 sm:$0xff]  }
 0x3b4   : > { %v5529_v30 = vadd.f32 %v5528_v0, %v5455_v59  ;;  %v3973_v16 = vmax.f32 %v13041_v15, 0.0  ;;  %v3959_v39 = vadd.f32 %v12948_v22, %v13997_v47  ;;  %v5012_v48 = vadd.f32 %v12965_v17, %v4939_v52  ;;  %v5457_v28 = vpop.f32.mrf.mxu1  ;;  %v10061_v52 = vld [vmem:[%s13894_s8 + $0x124] ss:$8 sps:$4 sm:$0xff]   ;;  %v10059_v29 = vld [vmem:[%s13894_s8 + $0x120] ss:$8 sps:$4 sm:$0xff]  }
 0x3b5   : > { %v5591_v20 = vmax.f32 %v3971_v4, %v5575_v23  ;;  %v5577_v54 = vmax.f32 %v5561_v24, 0.0  ;;  %v5562_v13 = vadd.f32 %v5546_v7, %v12945_v3  ;;  %v5531_v5 = vadd.f32 %v5530_v26, %v5457_v28  ;;  %v10065_v0 = vld [vmem:[%s13894_s8 + $0x110] ss:$8 sps:$4 sm:$0xff]   ;;  %v10070_v51 = vld [vmem:[%s13894_s8 + $0xe4] ss:$8 sps:$4 sm:$0xff]  }
 0x3b6   : > { %v5547_v32 = vadd.f32 %v5529_v30, %v5010_v34  ;;  %v3974_v1 = vmax.f32 %v3958_v19, 0.0  ;;  %v3960_v55 = vadd.f32 %v12945_v3, %v13998_v49  ;;  %v5592_v15 = vmax.f32 %v3972_v25, %v5576_v40  ;;  %6245 = vmatprep.subr.bf16.mxu1 %v10070_v51  ;;  %v10071_v56 = vld [vmem:[%s13894_s8 + $0x100] ss:$8 sps:$4 sm:$0xff]   ;;  %v10073_v6 = vld [vmem:[%s13894_s8 + $0x104] ss:$8 sps:$4 sm:$0xff]  }
 0x3b7   : > { %v5601_v11 = vpack.c.bf16 %v5591_v20, %v5589_v35  ;;  %v5593_v61 = vmax.f32 %v3973_v16, %v5577_v54  ;;  %v5578_v31 = vmax.f32 %v5562_v13, 0.0  ;;  %v5548_v2 = vadd.f32 %v5531_v5, %v5012_v48  ;;  %v10024_v35 = vld [vmem:[%s13893_s7] sm:$0xff]   ;;  %v10076_v25 = vld [vmem:[%s13894_s8 + $0xd4] ss:$8 sps:$4 sm:$0xff]   ;;  %v10083_v59 = vld [vmem:[%s13894_s8 + $0x1d0] ss:$8 sps:$4 sm:$0xff]  }
 0x3b8   : > { %v5563_v17 = vadd.f32 %v5547_v32, %v12948_v22  ;;  %v5602_v9 = vpack.c.bf16 %v5592_v15, %v5590_v18  ;;  %v3975_v4 = vmax.f32 %v3959_v39, 0.0  ;;  %v3976_v21 = vmax.f32 %v3960_v55, 0.0  ;;  %v10074_v18 = vld [vmem:[%s13894_s8 + $0xd0] ss:$8 sps:$4 sm:$0xff]   ;;  %v10079_v19 = vld [vmem:[%s13894_s8 + $0xf4] ss:$8 sps:$4 sm:$0xff]  }
 0x3b9   : > { %v5594_v63 = vmax.f32 %v3974_v1, %v5578_v31  ;;  %v5564_v37 = vadd.f32 %v5548_v2, %v12945_v3  ;;  %v10022_v3 = vld [vmem:[%s13892_s6] sm:$0xff]   ;;  %v13999_v22 = vmov 0   ;;  %v10085_v40 = vld [vmem:[%s13894_s8 + $0x1d4] ss:$8 sps:$4 sm:$0xff]   ;;  %v10086_v24 = vld [vmem:[%s13894_s8 + $0xb0] ss:$8 sps:$4 sm:$0xff]  }
 0x3ba   : > { %v5579_v45 = vmax.f32 %v5563_v17, 0.0  ;;  %v10080_v34 = vld [vmem:[%s13894_s8 + $0xc0] ss:$8 sps:$4 sm:$0xff]   ;;  %v10082_v23 = vld [vmem:[%s13894_s8 + $0xc4] ss:$8 sps:$4 sm:$0xff]  }
 0x3bb   : > { %v5580_v10 = vmax.f32 %v5564_v37, 0.0  ;;  %v10088_v7 = vld [vmem:[%s13894_s8 + $0xb4] ss:$8 sps:$4 sm:$0xff]   ;;  %v10089_v30 = vld [vmem:[%s13894_s8 + $0x1c0] ss:$8 sps:$4 sm:$0xff]  }
 0x3bc   : > { %v5595_v57 = vmax.f32 %v3975_v4, %v5579_v45  ;;  %v10091_v16 = vld [vmem:[%s13894_s8 + $0x1c4] ss:$8 sps:$4 sm:$0xff]   ;;  %v10092_v47 = vld [vmem:[%s13894_s8 + $0xa0] ss:$8 sps:$4 sm:$0xff]   ;;  %v10095_v48 = vld [vmem:[%s13894_s8 + $0x1b0] ss:$8 sps:$4 sm:$0xff]  }
 0x3bd   : > { %v5596_v38 = vmax.f32 %v3976_v21, %v5580_v10  ;;  %v10094_v39 = vld [vmem:[%s13894_s8 + $0xa4] ss:$8 sps:$4 sm:$0xff]   ;;  %v10097_v20 = vld [vmem:[%s13894_s8 + $0x1b4] ss:$8 sps:$4 sm:$0xff]   ;;  %v10098_v26 = vld [vmem:[%s13894_s8 + $0x90] ss:$8 sps:$4 sm:$0xff]  }
 0x3be   : > { %v5603_v43 = vpack.c.bf16 %v5595_v57, %v5593_v61  ;;  %v10100_v28 = vld [vmem:[%s13894_s8 + $0x94] ss:$8 sps:$4 sm:$0xff]   ;;  %v10103_v54 = vld [vmem:[%s13894_s8 + $0x1a4] ss:$8 sps:$4 sm:$0xff]   ;;  %v10101_v32 = vld [vmem:[%s13894_s8 + $0x1a0] ss:$8 sps:$4 sm:$0xff]  }
 0x3bf   : > { %v5604_v50 = vpack.c.bf16 %v5596_v38, %v5594_v63  ;;  %v10106_v13 = vld [vmem:[%s13894_s8 + $0x84] ss:$8 sps:$4 sm:$0xff]   ;;  %v10104_v5 = vld [vmem:[%s13894_s8 + $0x80] ss:$8 sps:$4 sm:$0xff]   ;;  %v10109_v1 = vld [vmem:[%s13894_s8 + $0x194] ss:$8 sps:$4 sm:$0xff]  }
 0x3c0   : > { %v5628_v60 = vsel %vm5626_vm4, %v5603_v43, 0  ;;  %v10107_v49 = vld [vmem:[%s13894_s8 + $0x190] ss:$8 sps:$4 sm:$0xff]   ;;  %v10112_v55 = vld [vmem:[%s13894_s8 + $0x184] ss:$8 sps:$4 sm:$0xff]  }
 0x3c1   : > { %8799 = vmatprep.subr.msk.bf16.mxu0 %vm5626_vm4, %v5604_v50  ;;  %v10110_v15 = vld [vmem:[%s13894_s8 + $0x180] ss:$8 sps:$4 sm:$0xff]   ;;  %v10113_v61 = vld [vmem:[%s13894_s8 + $0x170] ss:$8 sps:$4 sm:$0xff]   ;;  %v10118_v31 = vld [vmem:[%s13894_s8 + $0x254] ss:$8 sps:$4 sm:$0xff]  }
 0x3c2   : > { %5642 = vmatpush1.bf16.msra.mxu0 %v5628_v60 }
 0x3c3   : > { %5643 = vmatprep.subr.bf16.mxu0 %v5602_v9 }
 0x3c6   : > { %5644 = vmatpush1.bf16.msra.mxu0 %v5601_v11 }
 0x3c7   : > { %5645 = vmatprep.subr.bf16.mxu0 %v5600_v12 }
 0x3ca   : > { %5646 = vmatpush1.bf16.msra.mxu0 %v13082_v46 }
 0x3cb   : > { %5647 = vmatprep.subr.bf16.mxu0 %v13059_v36 }
 0x3ce   : > { %5648 = vmatpush1.bf16.msra.mxu0 %v13050_v58 }
 0x3cf   : > { %8804 = vmatprep.subr.msk.bf16.mxu0 %vm5626_vm4, %v5604_v50 }
 0x3d1   : > { %8800 = vmatmul.mubr.msk.bf16.vlgmr.msra.gmra.mxu0 %vm5619_vm5, %v10022_v3 }
 0x3d2   : > { %5715 = vmatpush1.bf16.msra.mxu0 %v5628_v60  ;;  %5675 = vmatprep.mubr.bf16.mxu0 %v13999_v22 }
 0x3d3   : > { %5716 = vmatprep.subr.bf16.mxu0 %v5602_v9 }
 0x3d6   : > { %5717 = vmatpush1.bf16.msra.mxu0 %v5601_v11  ;;  %v10115_v11 = vld [vmem:[%s13894_s8 + $0x174] ss:$8 sps:$4 sm:$0xff]  }
 0x3d7   : > { %5718 = vmatprep.subr.bf16.mxu0 %v5600_v12  ;;  %v10068_v12 = vld [vmem:[%s13894_s8 + $0xe0] ss:$8 sps:$4 sm:$0xff]  }
 0x3d8   : > { %6246 = vmatpush2.bf16.msra.mxu1 %v10068_v12 }
 0x3d9   : > { %8801 = vmatmul.mubr.msk.bf16.gmra.mxu0 %vm5619_vm5, %v10023_v42  ;;  %6247 = vmatprep.subr.bf16.mxu1 %v10076_v25 }
 0x3da   : > { %5719 = vmatpush1.bf16.msra.mxu0 %v13082_v46  ;;  %5738 = vmatprep.mubr.bf16.mxu0 %v13999_v22  ;;  %v10043_v46 = vld [vmem:[%s13894_s8 + $0x154] ss:$8 sps:$4 sm:$0xff]  }
 0x3db   : > { %5720 = vmatprep.subr.bf16.mxu0 %v13059_v36  ;;  %v10041_v36 = vld [vmem:[%s13894_s8 + $0x150] ss:$8 sps:$4 sm:$0xff]  }
 0x3dc   : > { %6248 = vmatpush2.bf16.msra.mxu1 %v10074_v18 }
 0x3dd   : > { %6249 = vmatprep.subr.bf16.mxu1 %v10082_v23 }
 0x3de   : > { %5721 = vmatpush1.bf16.msra.mxu0 %v13050_v58  ;;  %v10049_v58 = vld [vmem:[%s13894_s8 + $0x144] ss:$8 sps:$4 sm:$0xff]  }
 0x3df   : > { %6020 = vmatprep.subr.bf16.mxu0 %v10037_v62 }
 0x3e0   : > { %6250 = vmatpush2.bf16.msra.mxu1 %v10080_v34 }
 0x3e1   : > { %8805 = vmatmul.mubr.msk.bf16.vlgmr.msra.gmra.mxu0 %vm5619_vm5, %v10024_v35  ;;  %6251 = vmatprep.subr.bf16.mxu1 %v10088_v7 }
 0x3e2   : > { %5748 = vmatprep.mubr.bf16.mxu0 %v13999_v22  ;;  %6021 = vmatpush1.bf16.msra.mxu0 %v10035_v53 }
 0x3e3   : > { %6022 = vmatprep.subr.bf16.mxu0 %v10043_v46 }
 0x3e4   : > { %6252 = vmatpush2.bf16.msra.mxu1 %v10086_v24 }
 0x3e5   : > { %6253 = vmatprep.subr.bf16.mxu1 %v10094_v39  ;;  %v10124_v39 = vld [vmem:[%s13894_s8 + $0x234] ss:$8 sps:$4 sm:$0xff]  }
 0x3e6   : > { %6023 = vmatpush1.bf16.msra.mxu0 %v10041_v36 }
 0x3e7   : > { %6024 = vmatprep.subr.bf16.mxu0 %v10049_v58 }
 0x3e8   : > { %6254 = vmatpush2.bf16.msra.mxu1 %v10092_v47  ;;  %v10119_v47 = vld [vmem:[%s13894_s8 + $0x240] ss:$8 sps:$4 sm:$0xff]  }
 0x3e9   : > { %8806 = vmatmul.mubr.msk.bf16.gmra.mxu0 %vm5619_vm5, %v10025_v8  ;;  %6255 = vmatprep.subr.bf16.mxu1 %v10100_v28 }
 0x3ea   : > { %6025 = vmatpush1.bf16.msra.mxu0 %v10047_v33 }
 0x3eb   : > { %6026 = vmatprep.subr.bf16.mxu0 %v10055_v41 }
 0x3ec   : > { %6256 = vmatpush2.bf16.msra.mxu1 %v10098_v26  ;;  %v10122_v26 = vld [vmem:[%s13894_s8 + $0x230] ss:$8 sps:$4 sm:$0xff]  }
 0x3ed   : > { %6257 = vmatprep.subr.bf16.mxu1 %v10106_v13  ;;  %v10127_v13 = vld [vmem:[%s13894_s8 + $0x224] ss:$8 sps:$4 sm:$0xff]  }
 0x3ee   : > { %6027 = vmatpush1.bf16.msra.mxu0 %v10053_v14 }
 0x3ef   : > { %6028 = vmatprep.subr.bf16.mxu0 %v10061_v52 }
 0x3f0   : > { %6258 = vmatpush2.bf16.msra.mxu1 %v10104_v5  ;;  %v10125_v5 = vld [vmem:[%s13894_s8 + $0x220] ss:$8 sps:$4 sm:$0xff]  }
 0x3f1   : > { %6753 = vmatprep.subr.bf16.mxu1 %v13999_v22 }
 0x3f2   : > { %6029 = vmatpush1.bf16.msra.mxu0 %v10059_v29 }
 0x3f3   : > { %6030 = vmatprep.subr.bf16.mxu0 %v10067_v27 }
 0x3f6   : > { %6031 = vmatpush1.bf16.msra.mxu0 %v10065_v0 }
 0x3f7   : > { %6032 = vmatprep.subr.bf16.mxu0 %v10073_v6 }
 0x3fa   : > { %6033 = vmatpush1.bf16.msra.mxu0 %v10071_v56 }
 0x3fb   : > { %6034 = vmatprep.subr.bf16.mxu0 %v10079_v19 }
 0x3fe   : > { %6035 = vmatpush1.bf16.msra.mxu0 %v10077_v44 }
 0x3ff   : > { %6038 = vmatprep.subr.bf16.mxu0 %v10085_v40  ;;  %v10116_v40 = vld [vmem:[%s13894_s8 + $0x250] ss:$8 sps:$4 sm:$0xff]  }
 0x402   : > { %6039 = vmatpush2.bf16.msra.mxu0 %v10083_v59 }
 0x403   : > { %6040 = vmatprep.subr.bf16.mxu0 %v10091_v16 }
 0x406   : > { %6041 = vmatpush2.bf16.msra.mxu0 %v10089_v30  ;;  %v10121_v30 = vld [vmem:[%s13894_s8 + $0x244] ss:$8 sps:$4 sm:$0xff]  }
 0x407   : > { %6042 = vmatprep.subr.bf16.mxu0 %v10097_v20 }
 0x40a   : > { %6043 = vmatpush2.bf16.msra.mxu0 %v10095_v48 }
 0x40b   : > { %6044 = vmatprep.subr.bf16.mxu0 %v10103_v54 }
 0x40e   : > { %6045 = vmatpush2.bf16.msra.mxu0 %v10101_v32 }
 0x40f   : > { %6046 = vmatprep.subr.bf16.mxu0 %v10109_v1  ;;  %v10130_v1 = vld [vmem:[%s13894_s8 + $0x214] ss:$8 sps:$4 sm:$0xff]  }
 0x412   : > { %6047 = vmatpush2.bf16.msra.mxu0 %v10107_v49  ;;  %v10128_v49 = vld [vmem:[%s13894_s8 + $0x210] ss:$8 sps:$4 sm:$0xff]  }
 0x413   : > { %6048 = vmatprep.subr.bf16.mxu0 %v10112_v55  ;;  %v10133_v55 = vld [vmem:[%s13894_s8 + $0x204] ss:$8 sps:$4 sm:$0xff]  }
 0x416   : > { %6049 = vmatpush2.bf16.msra.mxu0 %v10110_v15  ;;  %v10131_v15 = vld [vmem:[%s13894_s8 + $0x200] ss:$8 sps:$4 sm:$0xff]  }
 0x417   : > { %6050 = vmatprep.subr.bf16.mxu0 %v10115_v11  ;;  %v10136_v11 = vld [vmem:[%s13894_s8 + $0x1f4] ss:$8 sps:$4 sm:$0xff]  }
 0x41a   : > { %6051 = vmatpush2.bf16.msra.mxu0 %v10113_v61  ;;  %v10134_v61 = vld [vmem:[%s13894_s8 + $0x1f0] ss:$8 sps:$4 sm:$0xff]  }
 0x41b   : > { %6479 = vmatprep.subr.bf16.mxu0 %v10118_v31  ;;  %v10139_v31 = vld [vmem:[%s13894_s8 + $0x1e4] ss:$8 sps:$4 sm:$0xff]  }
 0x491   : > { %v5667_v17 = vpop.f32.mrf.mxu0 }
 0x493   : > { %v5669_v2 = vpop.f32.mrf.mxu0 }
 0x495   : > { %v5671_v9 = vpop.f32.mrf.mxu0 }
 0x497   : > { %v5673_v4 = vpop.f32.mrf.mxu0 }
 0x499   : > { %v5677_v63 = vpop.f32.mrf.mxu0 }
 0x49b   : > { %v5679_v45 = vpop.f32.mrf.mxu0 }
 0x49d   : > { %v5681_v37 = vpop.f32.mrf.mxu0 }
 0x49f   : > { %v5683_v21 = vpop.f32.mrf.mxu0 }
 0x4a1   : > { %v5740_v57 = vpop.f32.mrf.mxu0 }
 0x4a2   : > { %v5759_v42 = vmax.f32 %v5667_v17, %v5740_v57  ;;  %v10137_v17 = vld [vmem:[%s13894_s8 + $0x1e0] ss:$8 sps:$4 sm:$0xff]   ;;  %v10149_v57 = vld [vmem:[%s13894_s8 + $0x290] ss:$8 sps:$4 sm:$0xff]  }
 0x4a3   : > { %v5742_v10 = vpop.f32.mrf.mxu0 }
 0x4a4   : > { %v5760_v60 = vmax.f32 %v5669_v2, %v5742_v10  ;;  %v10142_v2 = vld [vmem:[%s13894_s8 + $0x2c4] ss:$8 sps:$4 sm:$0xff]  }
 0x4a5   : > { %v5744_v38 = vpop.f32.mrf.mxu0  ;;  %v10154_v10 = vld [vmem:[%s13894_s8 + $0x284] ss:$8 sps:$4 sm:$0xff]  }
 0x4a6   : > { %v5761_v43 = vmax.f32 %v5671_v9, %v5744_v38  ;;  %v10140_v9 = vld [vmem:[%s13894_s8 + $0x2c0] ss:$8 sps:$4 sm:$0xff]  }
 0x4a7   : > { %v5746_v50 = vpop.f32.mrf.mxu0  ;;  %v10152_v38 = vld [vmem:[%s13894_s8 + $0x280] ss:$8 sps:$4 sm:$0xff]  }
 0x4a8   : > { %v5762_v3 = vmax.f32 %v5673_v4, %v5746_v50  ;;  %v13269_v53 = vpack.c.bf16 %v5761_v43, %v5759_v42  ;;  %v10145_v4 = vld [vmem:[%s13894_s8 + $0x2b4] ss:$8 sps:$4 sm:$0xff]   ;;  %v10155_v50 = vld [vmem:[%s13894_s8 + $0x270] ss:$8 sps:$4 sm:$0xff]  }
 0x4a9   : > { %v5750_v62 = vpop.f32.mrf.mxu0  ;;  %v10157_v43 = vld [vmem:[%s13894_s8 + $0x274] ss:$8 sps:$4 sm:$0xff]  }
 0x4aa   : > { %v5768_v35 = vpack.c.bf16 %v5762_v3, %v5760_v60  ;;  %v5763_v58 = vmax.f32 %v5677_v63, %v5750_v62  ;;  %v5835_v41 = vshll.u32 %v13269_v53, 16  ;;  %v5833_v25 = vshrl.u32 %v13269_v53, 16  ;;  %v10143_v63 = vld [vmem:[%s13894_s8 + $0x2b0] ss:$8 sps:$4 sm:$0xff]   ;;  %v10160_v60 = vld [vmem:[%s13894_s8 + $0x264] ss:$8 sps:$4 sm:$0xff]  }
 0x4ab   : > { %v5752_v46 = vpop.f32.mrf.mxu0  ;;  %v10158_v3 = vld [vmem:[%s13894_s8 + $0x260] ss:$8 sps:$4 sm:$0xff]   ;;  %v6315_v62 = vrot.slane %v13269_v53, 1 }
 0x4ac   : > { %8899 = vmatprep.mubr.msk.bf16.mxu1 %vm2708_vm3, %v5768_v35  ;;  %v5847_v33 = vshll.u32 %v5768_v35, 16  ;;  %v5764_v52 = vmax.f32 %v5679_v45, %v5752_v46  ;;  %v5837_v56 = vrot.slane %v5835_v41, 1  ;;  %v5845_v6 = vshrl.u32 %v5768_v35, 16  ;;  %v10148_v45 = vld [vmem:[%s13894_s8 + $0x2a4] ss:$8 sps:$4 sm:$0xff]   ;;  %v10161_v46 = vld [vmem:[%s13896_s10 + $0x118] sm:$0xff]  }
 0x4ad   : > { %v5754_v36 = vpop.f32.mrf.mxu0  ;;  %6260 = vmatmul.mubr.bf16.vlgmr.msra.gmra.mxu1 %v13269_v53  ;;  %v6318_v54 = vrot.slane %v5768_v35, 1  ;;  %v10163_v53 = vld [vmem:[%s13896_s10 + $0x110] sm:$0xff]   ;;  %v10167_v41 = vld [vmem:[%s13896_s10 + $0x100] sm:$0xff]  }
 0x4ae   : > { %v5765_v8 = vmax.f32 %v5681_v37, %v5754_v36  ;;  %v5849_v51 = vrot.slane %v5847_v33, 1  ;;  %v5838_v59 = vor.u32 %v5837_v56, %v5833_v25  ;;  %v10146_v37 = vld [vmem:[%s13894_s8 + $0x2a0] ss:$8 sps:$4 sm:$0xff]   ;;  %v10166_v33 = vld [vmem:[%s13896_s10 + $0x98] sm:$0xff]  }
 0x4af   : > { %v5756_v14 = vpop.f32.mrf.mxu0  ;;  %v10162_v36 = vld [vmem:[%s13896_s10 + $0xa8] sm:$0xff]   ;;  %v10175_v56 = vld [vmem:[%s13896_s10 + $0xe0] sm:$0xff]   ;;  %v10178_v25 = vld [vmem:[%s13896_s10 + $0xd8] sm:$0xff]  }
 0x4b0   : > { %v13274_v29 = vpack.c.bf16 %v5765_v8, %v5763_v58  ;;  %v5766_v0 = vmax.f32 %v5683_v21, %v5756_v14  ;;  %v5850_v19 = vor.u32 %v5849_v51, %v5845_v6  ;;  %v10151_v21 = vld [vmem:[%s13894_s8 + $0x294] ss:$8 sps:$4 sm:$0xff]   ;;  %6754 = vmatpush1.bf16.msra.mxu1 %v10162_v36  ;;  %v10164_v58 = vld [vmem:[%s13896_s10 + $0xa0] sm:$0xff]   ;;  %v10165_v8 = vld [vmem:[%s13896_s10 + $0x108] sm:$0xff]  }
 0x4b1   : > { %6755 = vmatprep.subr.bf16.mxu1 %v13999_v22  ;;  %v10168_v14 = vld [vmem:[%s13896_s10 + $0x90] sm:$0xff]   ;;  %v10174_v51 = vld [vmem:[%s13896_s10 + $0x78] sm:$0xff]  }
 0x4b2   : > { %v5840_v27 = vshll.u32 %v13274_v29, 16  ;;  %v13277_v12 = vpack.c.bf16 %v5766_v0, %v5764_v52  ;;  %v5856_v48 = vshrl.u32 %v13274_v29, 16  ;;  %v6316_v42 = vrot.slane %v13274_v29, 1  ;;  %v10169_v52 = vld [vmem:[%s13896_s10 + $0xf8] sm:$0xff]   ;;  %v10171_v0 = vld [vmem:[%s13896_s10 + $0xf0] sm:$0xff]  }
 0x4b3   : > { %v10176_v6 = vld [vmem:[%s13896_s10 + $0x70] sm:$0xff]  }
 0x4b4   : > { %8900 = vmatprep.mubr.msk.bf16.mxu1 %vm2708_vm3, %v13277_v12  ;;  %v5852_v18 = vshll.u32 %v13277_v12, 16  ;;  %v5842_v44 = vrot.slane %v5840_v27, 1  ;;  %v5859_v23 = vshrl.u32 %v13277_v12, 16  ;;  %v6319_v20 = vrot.slane %v13277_v12, 1  ;;  %6756 = vmatpush1.bf16.msra.mxu1 %v10164_v58  ;;  %v10172_v27 = vld [vmem:[%s13896_s10 + $0x80] sm:$0xff]   ;;  %v10173_v12 = vld [vmem:[%s13896_s10 + $0xe8] sm:$0xff]  }
 0x4b5   : > { %6270 = vmatmul.mubr.bf16.gmra.mxu1 %v13274_v29  ;;  %v6317_v35 = vsel %vm1585_vm2, %v6315_v62, %v6316_v42  ;;  %6757 = vmatprep.subr.bf16.mxu1 %v13999_v22  ;;  %v10170_v29 = vld [vmem:[%s13896_s10 + $0x88] sm:$0xff]  }
 0x4b6   : > { %v5854_v34 = vrot.slane %v5852_v18, 1  ;;  %v5843_v16 = vsel %vm668_vm0, %v5838_v59, %v5842_v44  ;;  %v5858_v28 = vor.u32 %v5856_v48, %v5842_v44  ;;  %v6320_v32 = vsel %vm1585_vm2, %v6318_v54, %v6319_v20  ;;  %v10177_v18 = vld [vmem:[%s13896_s10 + $0x148] sm:$0xff]   ;;  %v10179_v44 = vld [vmem:[%s13896_s10 + $0x140] sm:$0xff]   ;;  %v10183_v59 = vld [vmem:[%s13896_s10 + $0x130] sm:$0xff]  }
 0x4b8   : > { %v5855_v24 = vsel %vm668_vm0, %v5850_v19, %v5854_v34  ;;  %v5861_v7 = vor.u32 %v5859_v23, %v5854_v34  ;;  %6758 = vmatpush1.bf16.msra.mxu1 %v10166_v33  ;;  %v10180_v19 = vld [vmem:[%s13896_s10 + $0xd0] sm:$0xff]   ;;  %v10181_v34 = vld [vmem:[%s13896_s10 + $0x138] sm:$0xff]   ;;  %v10182_v23 = vld [vmem:[%s13896_s10 + $0xc8] sm:$0xff]  }
 0x4b9   : > { %8867 = vmatprep.mubr.msk.bf16.mxu0 %vm2708_vm3, %v5855_v24  ;;  %6759 = vmatprep.subr.bf16.mxu1 %v13999_v22  ;;  %v10185_v24 = vld [vmem:[%s13896_s10 + $0x128] sm:$0xff]  }
 0x4ba   : > { %6053 = vmatmul.mubr.bf16.vlgmr.msra.gmra.mxu0 %v5843_v16  ;;  %v10188_v16 = vld [vmem:[%s13896_s10 + $0xb0] sm:$0xff]  }
 0x4bb   : > { %6480 = vmatpush1.bf16.msra.mxu0 %v10116_v40  ;;  %8868 = vmatprep.mubr.msk.bf16.mxu0 %vm2708_vm3, %v5861_v7  ;;  %v10184_v40 = vld [vmem:[%s13896_s10 + $0xc0] sm:$0xff]   ;;  %v10186_v7 = vld [vmem:[%s13896_s10 + $0xb8] sm:$0xff]  }
 0x4bc   : > { %6481 = vmatprep.subr.bf16.mxu0 %v10121_v30  ;;  %6760 = vmatpush1.bf16.msra.mxu1 %v10168_v14  ;;  %v10187_v30 = vld [vmem:[%s13896_s10 + $0x120] sm:$0xff]  }
 0x4bd   : > { %6761 = vmatprep.subr.bf16.mxu1 %v13999_v22 }
 0x4bf   : > { %6482 = vmatpush1.bf16.msra.mxu0 %v10119_v47 }
 0x4c0   : > { %6483 = vmatprep.subr.bf16.mxu0 %v10124_v39  ;;  %6762 = vmatpush1.bf16.msra.mxu1 %v10170_v29 }
 0x4c1   : > { %6763 = vmatprep.subr.bf16.mxu1 %v13999_v22 }
 0x4c2   : > { %6063 = vmatmul.mubr.bf16.gmra.mxu0 %v5858_v28 }
 0x4c3   : > { %6484 = vmatpush1.bf16.msra.mxu0 %v10122_v26  ;;  %8961 = vmatprep.mubr.msk.bf16.mxu0 %vm2708_vm3, %v6320_v32 }
 0x4c4   : > { %6485 = vmatprep.subr.bf16.mxu0 %v10127_v13  ;;  %6764 = vmatpush1.bf16.msra.mxu1 %v10172_v27 }
 0x4c5   : > { %6765 = vmatprep.subr.bf16.mxu1 %v13999_v22 }
 0x4c7   : > { %6486 = vmatpush1.bf16.msra.mxu0 %v10125_v5 }
 0x4c8   : > { %6487 = vmatprep.subr.bf16.mxu0 %v10130_v1  ;;  %6766 = vmatpush1.bf16.msra.mxu1 %v10174_v51 }
 0x4c9   : > { %6767 = vmatprep.subr.bf16.mxu1 %v13999_v22 }
 0x4cb   : > { %6488 = vmatpush1.bf16.msra.mxu0 %v10128_v49 }
 0x4cc   : > { %6489 = vmatprep.subr.bf16.mxu0 %v10133_v55  ;;  %6768 = vmatpush1.bf16.msra.mxu1 %v10176_v6 }
 0x4cd   : > { %6773 = vmatprep.subr.bf16.mxu1 %v13999_v22 }
 0x4cf   : > { %6490 = vmatpush1.bf16.msra.mxu0 %v10131_v15 }
 0x4d0   : > { %6491 = vmatprep.subr.bf16.mxu0 %v10136_v11  ;;  %6774 = vmatpush2.bf16.msra.mxu1 %v10178_v25 }
 0x4d1   : > { %6775 = vmatprep.subr.bf16.mxu1 %v13999_v22 }
 0x4d3   : > { %6492 = vmatpush1.bf16.msra.mxu0 %v10134_v61  ;;  %v6540_v61 = vld [vmem:[%s13895_s9] sm:$0x3] }
 0x4d4   : > { %6493 = vmatprep.subr.bf16.mxu0 %v10139_v31  ;;  %6776 = vmatpush2.bf16.msra.mxu1 %v10180_v19 }
 0x4d5   : > { %6777 = vmatprep.subr.bf16.mxu1 %v13999_v22 }
 0x4d7   : > { %6494 = vmatpush1.bf16.msra.mxu0 %v10137_v17 }
 0x4d8   : > { %6497 = vmatprep.subr.bf16.mxu0 %v10142_v2  ;;  %6778 = vmatpush2.bf16.msra.mxu1 %v10182_v23 }
 0x4d9   : > { %6779 = vmatprep.subr.bf16.mxu1 %v13999_v22 }
 0x4db   : > { %6498 = vmatpush2.bf16.msra.mxu0 %v10140_v9 }
 0x4dc   : > { %6499 = vmatprep.subr.bf16.mxu0 %v10145_v4  ;;  %6780 = vmatpush2.bf16.msra.mxu1 %v10184_v40  ;;  %v14000_v4 = vld [vmem:[#allocation24_spill] sm:$0xff] }
 0x4dd   : > { %6781 = vmatprep.subr.bf16.mxu1 %v13999_v22 }
 0x4df   : > { %6500 = vmatpush2.bf16.msra.mxu0 %v10143_v63  ;;  %v6549_v63 = vrot.slane %v6540_v61, %v14000_v4 }
 0x4e0   : > { %6501 = vmatprep.subr.bf16.mxu0 %v10148_v45  ;;  %6782 = vmatpush2.bf16.msra.mxu1 %v10186_v7 }
 0x4e1   : > { %6783 = vmatprep.subr.bf16.mxu1 %v13999_v22 }
 0x4e3   : > { %6502 = vmatpush2.bf16.msra.mxu0 %v10146_v37 }
 0x4e4   : > { %6503 = vmatprep.subr.bf16.mxu0 %v10151_v21  ;;  %6784 = vmatpush2.bf16.msra.mxu1 %v10188_v16  ;;  %v14001_v21 = vld [vmem:[#allocation23_spill] sm:$0xff] }
 0x4e5   : > { %6890 = vmatprep.subr.bf16.mxu1 %v13999_v22 }
 0x4e7   : > { %6504 = vmatpush2.bf16.msra.mxu0 %v10149_v57  ;;  %v6545_v57 = vrot.slane %v6540_v61, %v14001_v21 }
 0x4e8   : > { %6505 = vmatprep.subr.bf16.mxu0 %v10154_v10 }
 0x4eb   : > { %6506 = vmatpush2.bf16.msra.mxu0 %v10152_v38 }
 0x4ec   : > { %6507 = vmatprep.subr.bf16.mxu0 %v10157_v43 }
 0x4ef   : > { %6508 = vmatpush2.bf16.msra.mxu0 %v10155_v50 }
 0x4f0   : > { %6509 = vmatprep.subr.bf16.mxu0 %v10160_v60 }
 0x4f3   : > { %6510 = vmatpush2.bf16.msra.mxu0 %v10158_v3 }
 0x4f4   : > { %7070 = vmatprep.subr.bf16.mxu0 %v13999_v22 }
 0x4f6   : > { %6512 = vmatmul.mubr.bf16.vlgmr.msra.gmra.mxu0 %v6317_v35 }
 0x4f7   : > { %8962 = vmatprep.mubr.msk.bf16.mxu0 %vm2708_vm3, %v6319_v20  ;;  %7071 = vmatpush1.bf16.msra.mxu0 %v10161_v46 }
 0x4f8   : > { %7072 = vmatprep.subr.bf16.mxu0 %v13999_v22 }
 0x4fb   : > { %7073 = vmatpush1.bf16.msra.mxu0 %v10163_v53 }
 0x4fc   : > { %7074 = vmatprep.subr.bf16.mxu0 %v13999_v22 }
 0x4fe   : > { %6522 = vmatmul.mubr.bf16.gmra.mxu0 %v6316_v42 }
 0x4ff   : > { %7075 = vmatpush1.bf16.msra.mxu0 %v10165_v8 }
 0x500   : > { %7076 = vmatprep.subr.bf16.mxu0 %v13999_v22 }
 0x503   : > { %7077 = vmatpush1.bf16.msra.mxu0 %v10167_v41 }
 0x504   : > { %7078 = vmatprep.subr.bf16.mxu0 %v13999_v22 }
 0x507   : > { %7079 = vmatpush1.bf16.msra.mxu0 %v10169_v52 }
 0x508   : > { %7080 = vmatprep.subr.bf16.mxu0 %v13999_v22 }
 0x50b   : > { %7081 = vmatpush1.bf16.msra.mxu0 %v10171_v0 }
 0x50c   : > { %7082 = vmatprep.subr.bf16.mxu0 %v13999_v22 }
 0x50f   : > { %7083 = vmatpush1.bf16.msra.mxu0 %v10173_v12 }
 0x510   : > { %7084 = vmatprep.subr.bf16.mxu0 %v13999_v22 }
 0x513   : > { %7085 = vmatpush1.bf16.msra.mxu0 %v10175_v56 }
 0x514   : > { %7090 = vmatprep.subr.bf16.mxu0 %v13999_v22 }
 0x517   : > { %7091 = vmatpush2.bf16.msra.mxu0 %v10177_v18 }
 0x518   : > { %7092 = vmatprep.subr.bf16.mxu0 %v13999_v22 }
 0x51b   : > { %7093 = vmatpush2.bf16.msra.mxu0 %v10179_v44 }
 0x51c   : > { %7094 = vmatprep.subr.bf16.mxu0 %v13999_v22 }
 0x51f   : > { %7095 = vmatpush2.bf16.msra.mxu0 %v10181_v34 }
 0x520   : > { %7096 = vmatprep.subr.bf16.mxu0 %v13999_v22 }
 0x523   : > { %7097 = vmatpush2.bf16.msra.mxu0 %v10183_v59 }
 0x524   : > { %7098 = vmatprep.subr.bf16.mxu0 %v13999_v22 }
 0x527   : > { %7099 = vmatpush2.bf16.msra.mxu0 %v10185_v24 }
 0x528   : > { %7100 = vmatprep.subr.bf16.mxu0 %v13999_v22 }
 0x52b   : > { %7101 = vmatpush2.bf16.msra.mxu0 %v10187_v30 }
 0x52c   : > { %7411 = vmatprep.subr.bf16.mxu0 %v13999_v22 }
 0x56d   : > { %v6261_v26 = vpop.f32.mrf.mxu1 }
 0x56f   : > { %v6263_v54 = vpop.f32.mrf.mxu1 }
 0x571   : > { %v6265_v32 = vpop.f32.mrf.mxu1 }
 0x573   : > { %v6267_v1 = vpop.f32.mrf.mxu1 }
 0x575   : > { %v6271_v55 = vpop.f32.mrf.mxu1 }
 0x577   : > { %v6273_v45 = vpop.f32.mrf.mxu1 }
 0x579   : > { %v6275_v35 = vpop.f32.mrf.mxu1 }
 0x57a   : > { %v6054_v47 = vpop.f32.mrf.mxu0 }
 0x57b   : > { %v6262_v31 = vadd.f32 %v6261_v26, %v6054_v47  ;;  %v6277_v27 = vpop.f32.mrf.mxu1 }
 0x57c   : > { %v6056_v39 = vpop.f32.mrf.mxu0 }
 0x57d   : > { %v6264_v11 = vadd.f32 %v6263_v54, %v6056_v39 }
 0x57e   : > { %v6058_v48 = vpop.f32.mrf.mxu0 }
 0x57f   : > { %v6266_v2 = vadd.f32 %v6265_v32, %v6058_v48 }
 0x580   : > { %v6060_v20 = vpop.f32.mrf.mxu0 }
 0x581   : > { %v6268_v38 = vadd.f32 %v6267_v1, %v6060_v20 }
 0x582   : > { %v6064_v28 = vpop.f32.mrf.mxu0 }
 0x583   : > { %v6272_v60 = vadd.f32 %v6271_v55, %v6064_v28 }
 0x584   : > { %v6066_v13 = vpop.f32.mrf.mxu0 }
 0x585   : > { %v6274_v53 = vadd.f32 %v6273_v45, %v6066_v13  ;;  %v10190_v45 = vld [vmem:[%s13896_s10 + $0x38] sm:$0xff]  }
 0x586   : > { %v6068_v5 = vpop.f32.mrf.mxu0 }
 0x587   : > { %v6276_v14 = vadd.f32 %v6275_v35, %v6068_v5  ;;  %v10197_v35 = vld [vmem:[%s13897_s11 + $0x18] sm:$0xff]  }
 0x588   : > { %v6070_v49 = vpop.f32.mrf.mxu0 }
 0x589   : > { %v6278_v56 = vadd.f32 %v6277_v27, %v6070_v49  ;;  %v10209_v27 = vld [vmem:[%s13897_s11 + $0x58] sm:$0xff]  }
 0x5b6   : > { %v6513_v15 = vpop.f32.mrf.mxu0 }
 0x5b7   : > { %v6532_v37 = vadd.f32 %v6513_v15, %v6262_v31  ;;  %v10189_v15 = vld [vmem:[%s13897_s11 + $0x38] sm:$0xff]  }
 0x5b8   : > { %v6515_v17 = vpop.f32.mrf.mxu0 }
 0x5b9   : > { %v6533_v9 = vadd.f32 %v6515_v17, %v6264_v11  ;;  %v6552_v46 = vadd.f32 %v6545_v57, %v6532_v37 }
 0x5ba   : > { %v6517_v10 = vpop.f32.mrf.mxu0 }
 0x5bb   : > { %v6534_v43 = vadd.f32 %v6517_v10, %v6266_v2  ;;  %v6553_v3 = vadd.f32 %v6549_v63, %v6533_v9  ;;  %v6560_v12 = vmax.f32 %v6552_v46, 0.0  ;;  %v10191_v10 = vld [vmem:[%s13897_s11 + $0x30] sm:$0xff]   ;;  %v10198_v46 = vld [vmem:[%s13896_s10 + $0x18] sm:$0xff]  }
 0x5bc   : > { %v6519_v50 = vpop.f32.mrf.mxu0 }
 0x5bd   : > { %v6554_v42 = vadd.f32 %v6545_v57, %v6534_v43  ;;  %v6535_v62 = vadd.f32 %v6519_v50, %v6268_v38  ;;  %v6561_v52 = vmax.f32 %v6553_v3, 0.0  ;;  %v10192_v38 = vld [vmem:[%s13896_s10 + $0x30] sm:$0xff]   ;;  %v10193_v43 = vld [vmem:[%s13897_s11 + $0x28] sm:$0xff]  }
 0x5be   : > { %v6523_v36 = vpop.f32.mrf.mxu0 }
 0x5bf   : > { %v6555_v58 = vadd.f32 %v6549_v63, %v6535_v62  ;;  %v6536_v8 = vadd.f32 %v6523_v36, %v6272_v60  ;;  %v6562_v33 = vmax.f32 %v6554_v42, 0.0  ;;  %v10194_v60 = vld [vmem:[%s13896_s10 + $0x28] sm:$0xff]   ;;  %v10195_v42 = vld [vmem:[%s13897_s11 + $0x20] sm:$0xff]   ;;  %v10199_v36 = vld [vmem:[%s13897_s11 + $0x10] sm:$0xff]  }
 0x5c0   : > { %v6525_v41 = vpop.f32.mrf.mxu0  ;;  %v10196_v62 = vld [vmem:[%s13896_s10 + $0x20] sm:$0xff]  }
 0x5c1   : > { %v6563_v29 = vmax.f32 %v6555_v58, 0.0  ;;  %v6537_v0 = vadd.f32 %v6525_v41, %v6274_v53  ;;  %v6556_v18 = vadd.f32 %v6545_v57, %v6536_v8  ;;  %v13508_v44 = vpack.c.bf16 %v6562_v33, %v6560_v12  ;;  %v10200_v53 = vld [vmem:[%s13896_s10 + $0x10] sm:$0xff]   ;;  %v10201_v58 = vld [vmem:[%s13897_s11 + $0x8] sm:$0xff]   ;;  %v10203_v33 = vld [vmem:[%s13897_s11] sm:$0xff]  }
 0x5c2   : > { %v6527_v51 = vpop.f32.mrf.mxu0  ;;  %v10202_v8 = vld [vmem:[%s13896_s10 + $0x8] sm:$0xff]   ;;  %v10204_v41 = vld [vmem:[%s13896_s10] sm:$0xff]   ;;  %v10210_v12 = vld [vmem:[%s13896_s10 + $0x58] sm:$0xff]  }
 0x5c3   : > { %v13506_v6 = vpack.c.bf16 %v6563_v29, %v6561_v52  ;;  %v6538_v25 = vadd.f32 %v6527_v51, %v6276_v14  ;;  %v6557_v34 = vadd.f32 %v6549_v63, %v6537_v0  ;;  %v6564_v40 = vmax.f32 %v6556_v18, 0.0  ;;  %v10205_v14 = vld [vmem:[%s13897_s11 + $0x68] sm:$0xff]   ;;  %v10207_v29 = vld [vmem:[%s13897_s11 + $0x60] sm:$0xff]   ;;  %v10211_v51 = vld [vmem:[%s13897_s11 + $0x50] sm:$0xff]  }
 0x5c4   : > { %v6529_v19 = vpop.f32.mrf.mxu0  ;;  %v6633_v16 = vshll.u32 %v13508_v44, 16  ;;  %v6972_v55 = vrot.slane %v13508_v44, 1  ;;  %v6631_v11 = vshrl.u32 %v13508_v44, 16  ;;  %v10206_v52 = vld [vmem:[%s13896_s10 + $0x68] sm:$0xff]   ;;  %v10208_v0 = vld [vmem:[%s13896_s10 + $0x60] sm:$0xff]  }
 0x5c5   : > { %v6558_v23 = vadd.f32 %v6545_v57, %v6538_v25  ;;  %v6539_v59 = vadd.f32 %v6529_v19, %v6278_v56  ;;  %v6645_v30 = vshll.u32 %v13506_v6, 16  ;;  %v6565_v47 = vmax.f32 %v6557_v34, 0.0  ;;  %v10212_v56 = vld [vmem:[%s13896_s10 + $0x50] sm:$0xff]   ;;  %v10214_v18 = vld [vmem:[%s13896_s10 + $0x48] sm:$0xff]   ;;  %v10215_v25 = vld [vmem:[%s13897_s11 + $0x40] sm:$0xff]  }
 0x5c6   : > { %v6635_v13 = vrot.slane %v6633_v16, 1  ;;  %v6975_v32 = vrot.slane %v13506_v6, 1  ;;  %v6643_v1 = vshrl.u32 %v13506_v6, 16  ;;  %v10216_v19 = vld [vmem:[%s13896_s10 + $0x40] sm:$0xff]   ;;  %v10217_v34 = vld [vmem:[%s13897_s11 + $0xa8] sm:$0xff]   ;;  %v10225_v16 = vld [vmem:[%s13897_s11 + $0xd8] sm:$0xff]  }
 0x5c7   : > { %v6566_v24 = vmax.f32 %v6558_v23, 0.0  ;;  %v6559_v7 = vadd.f32 %v6549_v63, %v6539_v59  ;;  %v6647_v26 = vrot.slane %v6645_v30, 1  ;;  %v10218_v23 = vld [vmem:[%s13897_s11 + $0xa0] sm:$0xff]   ;;  %v10219_v59 = vld [vmem:[%s13897_s11 + $0x98] sm:$0xff]   ;;  %v10224_v30 = vld [vmem:[%s13897_s11 + $0x70] sm:$0xff]  }
 0x5c8   : > { %v6636_v63 = vor.u32 %v6635_v13, %v6631_v11  ;;  %v10232_v13 = vld [vmem:[%s13897_s11 + $0x110] sm:$0xff]   ;;  %v10238_v11 = vld [vmem:[%s13897_s11 + $0xe0] sm:$0xff]  }
 0x5c9   : > { %v13512_v39 = vpack.c.bf16 %v6566_v24, %v6564_v40  ;;  %v6567_v48 = vmax.f32 %v6559_v7, 0.0  ;;  %v6648_v17 = vor.u32 %v6647_v26, %v6643_v1  ;;  %v10221_v40 = vld [vmem:[%s13897_s11 + $0x88] sm:$0xff]   ;;  %v10222_v24 = vld [vmem:[%s13897_s11 + $0x80] sm:$0xff]   ;;  %v10223_v7 = vld [vmem:[%s13897_s11 + $0x78] sm:$0xff]  }
 0x5ca   : > { %v10230_v26 = vld [vmem:[%s13897_s11 + $0xb0] sm:$0xff]   ;;  %v10234_v1 = vld [vmem:[%s13897_s11 + $0x100] sm:$0xff]  }
 0x5cb   : > { %v13514_v20 = vpack.c.bf16 %v6567_v48, %v6565_v47  ;;  %v6638_v28 = vshll.u32 %v13512_v39, 16  ;;  %v13518_v54 = vrot.slane %v13512_v39, 1  ;;  %v6654_v50 = vshrl.u32 %v13512_v39, 16  ;;  %v10226_v47 = vld [vmem:[%s13897_s11 + $0xd0] sm:$0xff]   ;;  %v10228_v48 = vld [vmem:[%s13897_s11 + $0xc0] sm:$0xff]  }
 0x5cd   : > { %v13522_v5 = vrot.slane %v13514_v20, 1  ;;  %v6650_v49 = vshll.u32 %v13514_v20, 16  ;;  %v6640_v61 = vrot.slane %v6638_v28, 1  ;;  %v6657_v9 = vshrl.u32 %v13514_v20, 16  ;;  %v10231_v28 = vld [vmem:[%s13897_s11 + $0x118] sm:$0xff]  }
 0x5ce   : > { %v13540_v4 = vsel %vm1585_vm2, %v6972_v55, %v13518_v54  ;;  %v10236_v55 = vld [vmem:[%s13897_s11 + $0xf0] sm:$0xff]  }
 0x5cf   : > { %v13533_v31 = vsel %vm1585_vm2, %v6975_v32, %v13522_v5  ;;  %v6652_v2 = vrot.slane %v6650_v49, 1  ;;  %v13554_v57 = vsel %vm668_vm0, %v6636_v63, %v6640_v61  ;;  %v13579_v3 = vor.u32 %v6654_v50, %v6640_v61  ;;  %v10233_v32 = vld [vmem:[%s13897_s11 + $0x108] sm:$0xff]   ;;  %v10235_v49 = vld [vmem:[%s13897_s11 + $0xf8] sm:$0xff]   ;;  %v10244_v63 = vld [vmem:[%s13897_s11 + $0x120] sm:$0xff]  }
 0x5d0   : > { %9065 = vmatprep.mubr.msk.bf16.mxu0 %vm6746_vm6, %v13533_v31  ;;  %v10239_v61 = vld [vmem:[%s13897_s11 + $0x148] sm:$0xff]  }
 0x5d1   : > { %7103 = vmatmul.mubr.bf16.vlgmr.msra.gmra.mxu0 %v13540_v4  ;;  %v13547_v37 = vsel %vm668_vm0, %v6648_v17, %v6652_v2  ;;  %v13549_v21 = vor.u32 %v6657_v9, %v6652_v2  ;;  %v10241_v17 = vld [vmem:[%s13897_s11 + $0x138] sm:$0xff]   ;;  %v10242_v2 = vld [vmem:[%s13897_s11 + $0x130] sm:$0xff]   ;;  %v10243_v9 = vld [vmem:[%s13897_s11 + $0x128] sm:$0xff]  }
 0x5d2   : > { %7412 = vmatpush1.bf16.msra.mxu0 %v10189_v15  ;;  %9005 = vmatprep.mubr.msk.bf16.mxu1 %vm6746_vm6, %v13547_v37  ;;  %v10237_v15 = vld [vmem:[%s13897_s11 + $0xe8] sm:$0xff]  }
 0x5d3   : > { %9066 = vmatprep.mubr.msk.bf16.mxu0 %vm6746_vm6, %v13522_v5  ;;  %6786 = vmatmul.mubr.bf16.vlgmr.msra.gmra.mxu1 %v13554_v57 }
 0x5d4   : > { %6891 = vmatpush1.bf16.msra.mxu1 %v10190_v45  ;;  %9006 = vmatprep.mubr.msk.bf16.mxu1 %vm6746_vm6, %v13549_v21 }
 0x5d5   : > { %7413 = vmatprep.subr.bf16.mxu0 %v13999_v22  ;;  %6892 = vmatprep.subr.bf16.mxu1 %v13999_v22 }
 0x5d6   : > { %7414 = vmatpush1.bf16.msra.mxu0 %v10191_v10 }
 0x5d7   : > { %7415 = vmatprep.subr.bf16.mxu0 %v13999_v22 }
 0x5d8   : > { %6893 = vmatpush1.bf16.msra.mxu1 %v10192_v38 }
 0x5d9   : > { %7111 = vmatmul.mubr.bf16.gmra.mxu0 %v13518_v54  ;;  %6894 = vmatprep.subr.bf16.mxu1 %v13999_v22 }
 0x5da   : > { %7416 = vmatpush1.bf16.msra.mxu0 %v10193_v43  ;;  %9126 = vmatprep.mubr.msk.bf16.mxu0 %vm6746_vm6, %v13506_v6 }
 0x5db   : > { %6794 = vmatmul.mubr.bf16.gmra.mxu1 %v13579_v3  ;;  %7417 = vmatprep.subr.bf16.mxu0 %v13999_v22 }
 0x5dc   : > { %6895 = vmatpush1.bf16.msra.mxu1 %v10194_v60  ;;  %9021 = vmatprep.mubr.msk.bf16.mxu1 %vm6746_vm6, %v13506_v6  ;;  %v10213_v6 = vld [vmem:[%s13897_s11 + $0x48] sm:$0xff]  }
 0x5dd   : > { %6896 = vmatprep.subr.bf16.mxu1 %v13999_v22 }
 0x5de   : > { %7418 = vmatpush1.bf16.msra.mxu0 %v10195_v42 }
 0x5df   : > { %7419 = vmatprep.subr.bf16.mxu0 %v13999_v22 }
 0x5e0   : > { %6897 = vmatpush1.bf16.msra.mxu1 %v10196_v62 }
 0x5e1   : > { %6898 = vmatprep.subr.bf16.mxu1 %v13999_v22 }
 0x5e2   : > { %7420 = vmatpush1.bf16.msra.mxu0 %v10197_v35 }
 0x5e3   : > { %7421 = vmatprep.subr.bf16.mxu0 %v13999_v22 }
 0x5e4   : > { %6899 = vmatpush1.bf16.msra.mxu1 %v10198_v46 }
 0x5e5   : > { %6900 = vmatprep.subr.bf16.mxu1 %v13999_v22 }
 0x5e6   : > { %7422 = vmatpush1.bf16.msra.mxu0 %v10199_v36 }
 0x5e7   : > { %7423 = vmatprep.subr.bf16.mxu0 %v13999_v22 }
 0x5e8   : > { %6901 = vmatpush1.bf16.msra.mxu1 %v10200_v53 }
 0x5e9   : > { %6902 = vmatprep.subr.bf16.mxu1 %v13999_v22 }
 0x5ea   : > { %7424 = vmatpush1.bf16.msra.mxu0 %v10201_v58 }
 0x5eb   : > { %7425 = vmatprep.subr.bf16.mxu0 %v13999_v22 }
 0x5ec   : > { %6903 = vmatpush1.bf16.msra.mxu1 %v10202_v8 }
 0x5ed   : > { %6904 = vmatprep.subr.bf16.mxu1 %v13999_v22 }
 0x5ee   : > { %7426 = vmatpush1.bf16.msra.mxu0 %v10203_v33 }
 0x5ef   : > { %7431 = vmatprep.subr.bf16.mxu0 %v13999_v22 }
 0x5f0   : > { %6905 = vmatpush1.bf16.msra.mxu1 %v10204_v41 }
 0x5f1   : > { %6910 = vmatprep.subr.bf16.mxu1 %v13999_v22 }
 0x5f2   : > { %7432 = vmatpush2.bf16.msra.mxu0 %v10205_v14 }
 0x5f3   : > { %7433 = vmatprep.subr.bf16.mxu0 %v13999_v22 }
 0x5f4   : > { %6911 = vmatpush2.bf16.msra.mxu1 %v10206_v52  ;;  %v10310_v52 = vmov 0.0  }
 0x5f5   : > { %6912 = vmatprep.subr.bf16.mxu1 %v13999_v22 }
 0x5f6   : > { %7434 = vmatpush2.bf16.msra.mxu0 %v10207_v29 }
 0x5f7   : > { %7435 = vmatprep.subr.bf16.mxu0 %v13999_v22 }
 0x5f8   : > { %6913 = vmatpush2.bf16.msra.mxu1 %v10208_v0 }
 0x5f9   : > { %6914 = vmatprep.subr.bf16.mxu1 %v13999_v22 }
 0x5fa   : > { %7436 = vmatpush2.bf16.msra.mxu0 %v10209_v27 }
 0x5fb   : > { %7437 = vmatprep.subr.bf16.mxu0 %v13999_v22 }
 0x5fc   : > { %6915 = vmatpush2.bf16.msra.mxu1 %v10210_v12 }
 0x5fd   : > { %6916 = vmatprep.subr.bf16.mxu1 %v13999_v22 }
 0x5fe   : > { %7438 = vmatpush2.bf16.msra.mxu0 %v10211_v51 }
 0x5ff   : > { %7439 = vmatprep.subr.bf16.mxu0 %v13999_v22 }
 0x600   : > { %6917 = vmatpush2.bf16.msra.mxu1 %v10212_v56 }
 0x601   : > { %6918 = vmatprep.subr.bf16.mxu1 %v13999_v22 }
 0x602   : > { %7440 = vmatpush2.bf16.msra.mxu0 %v10213_v6 }
 0x603   : > { %7441 = vmatprep.subr.bf16.mxu0 %v13999_v22 }
 0x604   : > { %6919 = vmatpush2.bf16.msra.mxu1 %v10214_v18 }
 0x605   : > { %6920 = vmatprep.subr.bf16.mxu1 %v13999_v22 }
 0x606   : > { %7442 = vmatpush2.bf16.msra.mxu0 %v10215_v25 }
 0x607   : > { %9198 = vmatprep.subr.bf16.mxu0 %v10310_v52 }
 0x608   : > { %6921 = vmatpush2.bf16.msra.mxu1 %v10216_v19 }
 0x609   : > { %7444 = vmatmul.mubr.bf16.vlgmr.msra.gmra.mxu0 %v13508_v44  ;;  %7278 = vmatprep.subr.bf16.mxu1 %v13999_v22 }
 0x60a   : > { %9127 = vmatprep.mubr.msk.bf16.mxu0 %vm6746_vm6, %v13514_v20 }
 0x60b   : > { %6923 = vmatmul.mubr.bf16.vlgmr.msra.gmra.mxu1 %v13508_v44  ;;  %v10220_v44 = vld [vmem:[%s13897_s11 + $0x90] sm:$0xff]  }
 0x60c   : > { %9022 = vmatprep.mubr.msk.bf16.mxu1 %vm6746_vm6, %v13514_v20  ;;  %7279 = vmatpush1.bf16.msra.mxu1 %v10217_v34  ;;  %v10229_v20 = vld [vmem:[%s13897_s11 + $0xb8] sm:$0xff]  }
 0x60d   : > { %7280 = vmatprep.subr.bf16.mxu1 %v13999_v22 }
 0x610   : > { %7281 = vmatpush1.bf16.msra.mxu1 %v10218_v23 }
 0x611   : > { %7452 = vmatmul.mubr.bf16.gmra.mxu0 %v13512_v39  ;;  %7282 = vmatprep.subr.bf16.mxu1 %v13999_v22 }
 0x612   : > { %9202 = vmatprep.mubr.msk.bf16.mxu0 %vm10311_vm7, %v10310_v52 }
 0x613   : > { %6931 = vmatmul.mubr.bf16.gmra.mxu1 %v13512_v39  ;;  %v10227_v39 = vld [vmem:[%s13897_s11 + $0xc8] sm:$0xff]  }
 0x614   : > { %7283 = vmatpush1.bf16.msra.mxu1 %v10219_v59  ;;  %9110 = vmatprep.mubr.msk.bf16.mxu1 %vm6746_vm6, %v13547_v37 }
 0x615   : > { %7284 = vmatprep.subr.bf16.mxu1 %v13999_v22 }
 0x618   : > { %7285 = vmatpush1.bf16.msra.mxu1 %v10220_v44 }
 0x619   : > { %7286 = vmatprep.subr.bf16.mxu1 %v13999_v22 }
 0x61c   : > { %7287 = vmatpush1.bf16.msra.mxu1 %v10221_v40 }
 0x61d   : > { %7288 = vmatprep.subr.bf16.mxu1 %v13999_v22 }
 0x620   : > { %7289 = vmatpush1.bf16.msra.mxu1 %v10222_v24 }
 0x621   : > { %7290 = vmatprep.subr.bf16.mxu1 %v13999_v22 }
 0x624   : > { %7291 = vmatpush1.bf16.msra.mxu1 %v10223_v7 }
 0x625   : > { %7292 = vmatprep.subr.bf16.mxu1 %v13999_v22 }
 0x628   : > { %7293 = vmatpush1.bf16.msra.mxu1 %v10224_v30 }
 0x629   : > { %7298 = vmatprep.subr.bf16.mxu1 %v13999_v22 }
 0x62c   : > { %7299 = vmatpush2.bf16.msra.mxu1 %v10225_v16 }
 0x62d   : > { %7300 = vmatprep.subr.bf16.mxu1 %v13999_v22 }
 0x630   : > { %7301 = vmatpush2.bf16.msra.mxu1 %v10226_v47 }
 0x631   : > { %7302 = vmatprep.subr.bf16.mxu1 %v13999_v22 }
 0x634   : > { %7303 = vmatpush2.bf16.msra.mxu1 %v10227_v39 }
 0x635   : > { %7304 = vmatprep.subr.bf16.mxu1 %v13999_v22 }
 0x638   : > { %7305 = vmatpush2.bf16.msra.mxu1 %v10228_v48 }
 0x639   : > { %7306 = vmatprep.subr.bf16.mxu1 %v13999_v22 }
 0x63c   : > { %7307 = vmatpush2.bf16.msra.mxu1 %v10229_v20 }
 0x63d   : > { %7308 = vmatprep.subr.bf16.mxu1 %v13999_v22 }
 0x640   : > { %7309 = vmatpush2.bf16.msra.mxu1 %v10230_v26 }
 0x641   : > { %7573 = vmatprep.subr.bf16.mxu1 %v13999_v22 }
 0x643   : > { %7311 = vmatmul.mubr.bf16.vlgmr.msra.gmra.mxu1 %v13554_v57 }
 0x644   : > { %9111 = vmatprep.mubr.msk.bf16.mxu1 %vm6746_vm6, %v13549_v21  ;;  %7574 = vmatpush1.bf16.msra.mxu1 %v10231_v28 }
 0x645   : > { %7575 = vmatprep.subr.bf16.mxu1 %v13999_v22 }
 0x648   : > { %7576 = vmatpush1.bf16.msra.mxu1 %v10232_v13  ;;  %v9067_v13 = vld [vmem:[%s13898_s12] ss:$0 sm:$0xff] }
 0x649   : > { %7577 = vmatprep.subr.bf16.mxu1 %v13999_v22 }
 0x64b   : > { %7319 = vmatmul.mubr.bf16.gmra.mxu1 %v13579_v3 }
 0x64c   : > { %7578 = vmatpush1.bf16.msra.mxu1 %v10233_v32  ;;  %9170 = vmatprep.mubr.msk.bf16.mxu1 %vm6746_vm6, %v13533_v31  ;;  %v10240_v31 = vld [vmem:[%s13897_s11 + $0x140] sm:$0xff]  }
 0x64d   : > { %7579 = vmatprep.subr.bf16.mxu1 %v13999_v22 }
 0x650   : > { %7580 = vmatpush1.bf16.msra.mxu1 %v10234_v1 }
 0x651   : > { %7581 = vmatprep.subr.bf16.mxu1 %v13999_v22 }
 0x654   : > { %7582 = vmatpush1.bf16.msra.mxu1 %v10235_v49 }
 0x655   : > { %7583 = vmatprep.subr.bf16.mxu1 %v13999_v22 }
 0x658   : > { %7584 = vmatpush1.bf16.msra.mxu1 %v10236_v55 }
 0x659   : > { %7585 = vmatprep.subr.bf16.mxu1 %v13999_v22 }
 0x65c   : > { %7586 = vmatpush1.bf16.msra.mxu1 %v10237_v15 }
 0x65d   : > { %7587 = vmatprep.subr.bf16.mxu1 %v13999_v22 }
 0x660   : > { %7588 = vmatpush1.bf16.msra.mxu1 %v10238_v11 }
 0x661   : > { %7593 = vmatprep.subr.bf16.mxu1 %v13999_v22 }
 0x664   : > { %7594 = vmatpush2.bf16.msra.mxu1 %v10239_v61 }
 0x665   : > { %7595 = vmatprep.subr.bf16.mxu1 %v13999_v22 }
 0x668   : > { %7596 = vmatpush2.bf16.msra.mxu1 %v10240_v31 }
 0x669   : > { %7597 = vmatprep.subr.bf16.mxu1 %v13999_v22 }
 0x66c   : > { %7598 = vmatpush2.bf16.msra.mxu1 %v10241_v17 }
 0x66d   : > { %7599 = vmatprep.subr.bf16.mxu1 %v13999_v22 }
 0x670   : > { %7600 = vmatpush2.bf16.msra.mxu1 %v10242_v2 }
 0x671   : > { %7601 = vmatprep.subr.bf16.mxu1 %v13999_v22 }
 0x674   : > { %7602 = vmatpush2.bf16.msra.mxu1 %v10243_v9 }
 0x675   : > { %7603 = vmatprep.subr.bf16.mxu1 %v13999_v22 }
 0x678   : > { %7604 = vmatpush2.bf16.msra.mxu1 %v10244_v63 }
 0x679   : > { %9190 = vmatprep.subr.bf16.mxu1 %v10310_v52 }
 0x67b   : > { %7606 = vmatmul.mubr.bf16.vlgmr.msra.gmra.mxu1 %v13540_v4 }
 0x67c   : > { %9171 = vmatprep.mubr.msk.bf16.mxu1 %vm6746_vm6, %v13522_v5 }
 0x683   : > { %7614 = vmatmul.mubr.bf16.gmra.mxu1 %v13518_v54 }
 0x684   : > { %9194 = vmatprep.mubr.msk.bf16.mxu1 %vm10311_vm7, %v10310_v52 }
 0x691   : > { %v7104_v45 = vpop.f32.mrf.mxu0 }
 0x693   : > { %v6787_v37 = vpop.f32.mrf.mxu1  ;;  %v7106_v21 = vpop.f32.mrf.mxu0 }
 0x695   : > { %v6789_v57 = vpop.f32.mrf.mxu1  ;;  %v7107_v10 = vpop.f32.mrf.mxu0 }
 0x697   : > { %v6790_v38 = vpop.f32.mrf.mxu1  ;;  %v7109_v43 = vpop.f32.mrf.mxu0 }
 0x699   : > { %v6792_v50 = vpop.f32.mrf.mxu1  ;;  %v7112_v60 = vpop.f32.mrf.mxu0 }
 0x69b   : > { %v6795_v3 = vpop.f32.mrf.mxu1  ;;  %v7114_v42 = vpop.f32.mrf.mxu0 }
 0x69d   : > { %v6797_v22 = vpop.f32.mrf.mxu1  ;;  %v7115_v62 = vpop.f32.mrf.mxu0 }
 0x69f   : > { %v6798_v35 = vpop.f32.mrf.mxu1  ;;  %v7117_v4 = vpop.f32.mrf.mxu0 }
 0x6a1   : > { %v6800_v46 = vpop.f32.mrf.mxu1 }
 0x6c9   : > { %v7445_v36 = vpop.f32.mrf.mxu0 }
 0x6cb   : > { %v6924_v5 = vpop.f32.mrf.mxu1  ;;  %v7447_v53 = vpop.f32.mrf.mxu0 }
 0x6cc   : > { %v6925_v54 = vadd.f32 %v6924_v5, %v6787_v37 }
 0x6cd   : > { %v6926_v58 = vpop.f32.mrf.mxu1  ;;  %v7448_v8 = vpop.f32.mrf.mxu0 }
 0x6ce   : > { %v7119_v33 = vadd.f32 %v7104_v45, %v6925_v54 }
 0x6cf   : > { %v6927_v41 = vpop.f32.mrf.mxu1  ;;  %v7450_v14 = vpop.f32.mrf.mxu0 }
 0x6d0   : > { %v6928_v29 = vadd.f32 %v6927_v41, %v6790_v38  ;;  %v7129_v1 = vadd.f32 %v9067_v13, %v7119_v33 }
 0x6d1   : > { %v6929_v0 = vpop.f32.mrf.mxu1  ;;  %v7453_v27 = vpop.f32.mrf.mxu0 }
 0x6d2   : > { %v7120_v12 = vadd.f32 %v7107_v10, %v6928_v29  ;;  %v7133_v61 = vmax.f32 %v7129_v1, 0.0  ;;  %v10245_v29 = vld [vmem:[%s13899_s13] sm:$0x7f]  }
 0x6d3   : > { %v6932_v51 = vpop.f32.mrf.mxu1  ;;  %v7455_v56 = vpop.f32.mrf.mxu0  ;;  %v10246_v0 = vld [vmem:[%s13900_s14] sm:$0x7f]  }
 0x6d4   : > { %v6933_v6 = vadd.f32 %v6932_v51, %v6795_v3  ;;  %v7130_v31 = vadd.f32 %v9067_v13, %v7120_v12  ;;  %v7749_v51 = vld [vmem:[%s13901_s15] sm:$0xff] }
 0x6d5   : > { %v6934_v18 = vpop.f32.mrf.mxu1  ;;  %v7456_v25 = vpop.f32.mrf.mxu0 }
 0x6d6   : > { %v7121_v19 = vadd.f32 %v7112_v60, %v6933_v6  ;;  %v7134_v10 = vmax.f32 %v7130_v31, 0.0  ;;  %v9176_v18 = vld [vmem:[%s13901_s15 + $0x10] sm:$0xff] }
 0x6d7   : > { %v6935_v34 = vpop.f32.mrf.mxu1  ;;  %v7458_v23 = vpop.f32.mrf.mxu0 }
 0x6d8   : > { %v6936_v59 = vadd.f32 %v6935_v34, %v6798_v35  ;;  %v7131_v21 = vadd.f32 %v9067_v13, %v7121_v19  ;;  %v7750_v23 = vld [vmem:[%s13901_s15 + $0x8] sm:$0x1f] }
 0x6d9   : > { %v6937_v44 = vpop.f32.mrf.mxu1 }
 0x6da   : > { %v7122_v40 = vadd.f32 %v7115_v62, %v6936_v59  ;;  %v7135_v22 = vmax.f32 %v7131_v21, 0.0 }
 0x6dc   : > { %v7132_v35 = vadd.f32 %v9067_v13, %v7122_v40 }
 0x6de   : > { %v7136_v58 = vmax.f32 %v7132_v35, 0.0 }
 0x703   : > { %v7312_v24 = vpop.f32.mrf.mxu1 }
 0x704   : > { %v7446_v7 = vadd.f32 %v7445_v36, %v7312_v24  ;;  %v9177_v24 = vld [vmem:[%s13901_s15 + $0x18] sm:$0x1f] }
 0x705   : > { %v7314_v30 = vpop.f32.mrf.mxu1 }
 0x707   : > { %v7315_v16 = vpop.f32.mrf.mxu1 }
 0x708   : > { %v7449_v47 = vadd.f32 %v7448_v8, %v7315_v16  ;;  %v9178_v16 = vld [vmem:[%s13901_s15 + $0x20] sm:$0xff] }
 0x709   : > { %v7317_v39 = vpop.f32.mrf.mxu1 }
 0x70b   : > { %v7320_v48 = vpop.f32.mrf.mxu1 }
 0x70c   : > { %v7454_v63 = vadd.f32 %v7453_v27, %v7320_v48 }
 0x70d   : > { %v7322_v20 = vpop.f32.mrf.mxu1 }
 0x70f   : > { %v7323_v26 = vpop.f32.mrf.mxu1 }
 0x710   : > { %v7457_v60 = vadd.f32 %v7456_v25, %v7323_v26 }
 0x711   : > { %v7325_v28 = vpop.f32.mrf.mxu1 }
 0x712   : > { %v9179_v28 = vld [vmem:[%s13901_s15 + $0x28] sm:$0x1f] }
 0x73b   : > { %v7607_v32 = vpop.f32.mrf.mxu1 }
 0x73c   : > { %v7622_v49 = vadd.f32 %v7607_v32, %v7446_v7 }
 0x73d   : > { %v7609_v55 = vpop.f32.mrf.mxu1 }
 0x73e   : > { %v7626_v15 = vadd.f32 %v9067_v13, %v7622_v49 }
 0x73f   : > { %v7610_v11 = vpop.f32.mrf.mxu1 }
 0x740   : > { %v7630_v17 = vmax.f32 %v7626_v15, 0.0  ;;  %v7623_v2 = vadd.f32 %v7610_v11, %v7449_v47 }
 0x741   : > { %v7612_v9 = vpop.f32.mrf.mxu1 }
 0x742   : > { %v7634_v45 = vmax.f32 %v7133_v61, %v7630_v17  ;;  %v7627_v37 = vadd.f32 %v9067_v13, %v7623_v2 }
 0x743   : > { %v7615_v57 = vpop.f32.mrf.mxu1 }
 0x744   : > { %v7631_v38 = vmax.f32 %v7627_v37, 0.0  ;;  %v7624_v43 = vadd.f32 %v7615_v57, %v7454_v63 }
 0x745   : > { %v7617_v50 = vpop.f32.mrf.mxu1 }
 0x746   : > { %v7635_v3 = vmax.f32 %v7134_v10, %v7631_v38  ;;  %v7628_v42 = vadd.f32 %v9067_v13, %v7624_v43 }
 0x747   : > { %v7618_v62 = vpop.f32.mrf.mxu1 }
 0x748   : > { %v7638_v4 = vpack.c.bf16 %v7635_v3, %v7634_v45  ;;  %v7632_v46 = vmax.f32 %v7628_v42, 0.0  ;;  %v7625_v36 = vadd.f32 %v7618_v62, %v7457_v60 }
 0x749   : > { %v7620_v5 = vpop.f32.mrf.mxu1 }
 0x74a   : > { %v7636_v53 = vmax.f32 %v7135_v22, %v7632_v46  ;;  %v7629_v54 = vadd.f32 %v9067_v13, %v7625_v36 }
 0x74c   : > { %v7633_v8 = vmax.f32 %v7629_v54, 0.0 }
 0x74e   : > { %v7637_v33 = vmax.f32 %v7136_v58, %v7633_v8  ;;  %v7811_v8 = vld [vmem:[%s14002_s18] sm:$0x1] }
 0x750   : > { %v7639_v41 = vpack.c.bf16 %v7637_v33, %v7636_v53 }
 0x752   : > { %v7653_v14 = vsel %vm7651_vm8, %v7639_v41, 0 }
 0x753   : > { %9191 = vmatpush3.bf16.msra.mxu1 %v7653_v14  ;;  %9199 = vmatpush3.bf16.msra.mxu0 %v7653_v14 }
 0x754   : > { %9192 = vmatprep.subr.bf16.mxu1 %v10310_v52  ;;  %9200 = vmatprep.subr.bf16.mxu0 %v10310_v52 }
 0x757   : > { %9193 = vmatpush3.bf16.msra.mxu1 %v7638_v4  ;;  %9201 = vmatpush3.bf16.msra.mxu0 %v7638_v4 }
 0x75a   : > { %9195 = vmatmul.mubr.msk.bf16.vlgmr.msra.gmra.mxu1 %vm7647_vm9, %v10245_v29  ;;  %9203 = vmatmul.mubr.msk.bf16.vlgmr.msra.gmra.mxu0 %vm7647_vm9, %v10246_v0 }
 0x81a   : > { %v7689_v27 = vpop.f32.mrf.mxu1  ;;  %v7740_v12 = vpop.f32.mrf.mxu0 }
 0x81b   : > { %v7747_v52 = vmax.f32 %v7689_v27, %v7740_v12 }
 0x81c   : > { %v9196_v56 = vpop.f32.mrf.mxu1  ;;  %v9204_v6 = vpop.f32.mrf.mxu0 }
 0x81d   : > { %v7751_v25 = vmul.f32 %v7749_v51, %v7747_v52  ;;  %v7772_v40 = vmul.f32 %v9176_v18, %v7747_v52  ;;  %v7791_v26 = vmul.f32 %v9178_v16, %v7747_v52 }
 0x81e   : > { %v7692_v19 = vpop.f32.mrf.mxu1  ;;  %v7743_v34 = vpop.f32.mrf.mxu0 }
 0x81f   : > { %v7748_v59 = vmax.f32 %v7692_v19, %v7743_v34  ;;  %v7754_v44 = vsel %vm7753_vm10, %v7751_v25, 0.0  ;;  %v7774_v20 = vsel %vm7753_vm10, %v7772_v40, 0.0  ;;  %v7793_v1 = vsel %vm7753_vm10, %v7791_v26, 0.0 }
 0x820   : > { %7755 = vadd.xlane.f32.xlu1 %v7754_v44  ;;  %v9197_v7 = vpop.f32.mrf.mxu1  ;;  %v9205_v30 = vpop.f32.mrf.mxu0 }
 0x821   : > { %v7752_v47 = vmul.f32 %v7750_v23, %v7748_v59  ;;  %v7773_v48 = vmul.f32 %v9177_v24, %v7748_v59  ;;  %v7792_v32 = vmul.f32 %v9179_v28, %v7748_v59 }
 0x823   : > { %v7758_v39 = vsel %vm7757_vm11, %v7752_v47, 0.0  ;;  %v7777_v13 = vsel %vm7757_vm11, %v7773_v48, 0.0  ;;  %v7796_v49 = vsel %vm7757_vm11, %v7792_v32, 0.0 }
 0x824   : > { %7759 = vadd.xlane.f32.xlu0 %v7758_v39  ;;  %7775 = vadd.xlane.f32.xlu1 %v7774_v20 }
 0x828   : > { %7778 = vadd.xlane.f32.xlu0 %v7777_v13  ;;  %7794 = vadd.xlane.f32.xlu1 %v7793_v1 }
 0x82c   : > { %7797 = vadd.xlane.f32.xlu0 %v7796_v49 }
 0x8a9   : > { %v7756_v55 = vpop.xlane.xlu1 %7755 }
 0x8ad   : > { %v7760_v15 = vpop.xlane.xlu0 %7759  ;;  %v7776_v31 = vpop.xlane.xlu1 %7775 }
 0x8ae   : > { %v7761_v11 = vsel %vm7651_vm8, %v7760_v15, 0.0 }
 0x8af   : > { %v7762_v61 = vadd.f32 %v7761_v11, %v7756_v55 }
 0x8b1   : > { %v7763_v17 = vrot.slane %v7762_v61, 4  ;;  %v7779_v2 = vpop.xlane.xlu0 %7778  ;;  %v7795_v38 = vpop.xlane.xlu1 %7794 }
 0x8b2   : > { %v7780_v9 = vsel %vm7651_vm8, %v7779_v2, 0.0 }
 0x8b3   : > { %v7764_v63 = vadd.f32 %v7763_v17, %v7762_v61  ;;  %v7781_v45 = vadd.f32 %v7780_v9, %v7776_v31 }
 0x8b5   : > { %v7782_v37 = vrot.slane %v7781_v45, 4  ;;  %v7798_v21 = vpop.xlane.xlu0 %7797  ;;  %v7765_v57 = vrot.slane %v7764_v63, 2 }
 0x8b6   : > { %v7799_v10 = vsel %vm7651_vm8, %v7798_v21, 0.0 }
 0x8b7   : > { %v7783_v43 = vadd.f32 %v7782_v37, %v7781_v45  ;;  %v7800_v50 = vadd.f32 %v7799_v10, %v7795_v38  ;;  %v7766_v42 = vadd.f32 %v7765_v57, %v7764_v63 }
 0x8b9   : > { %v7784_v60 = vrot.slane %v7783_v43, 2  ;;  %v7801_v3 = vrot.slane %v7800_v50, 4  ;;  %v7767_v46 = vrot.slane %v7766_v42, 1 }
 0x8bb   : > { %v7785_v22 = vadd.f32 %v7784_v60, %v7783_v43  ;;  %v7802_v62 = vadd.f32 %v7801_v3, %v7800_v50  ;;  %v7768_v54 = vadd.f32 %v7767_v46, %v7766_v42 }
 0x8bd   : > { %v7786_v35 = vrot.slane %v7785_v22, 1  ;;  %v7803_v4 = vrot.slane %v7802_v62, 2 }
 0x8bf   : > { %v7804_v36 = vadd.f32 %v7803_v4, %v7802_v62  ;;  %v7787_v5 = vadd.f32 %v7786_v35, %v7785_v22 }
 0x8c1   : > { %v7805_v53 = vrot.slane %v7804_v36, 1  ;;  %v7808_v33 = vsel %vm7807_vm12, %v7768_v54, %v7787_v5 }
 0x8c3   : > { %v7806_v58 = vadd.f32 %v7805_v53, %v7804_v36 }
 0x8c5   : > { %v7810_v41 = vsel %vm7809_vm13, %v7808_v33, %v7806_v58 }
 0x8c6   : > { %v7812_v14 = vadd.f32 %v7811_v8, %v7810_v41 }
 0x8c8   : > { %7814 = vst.msk [vmem:[%s540_s22] sm:$0x1] %vm7813_vm14, %v7812_v14 }
 0x8c9   : > { %10260 = shalt.err (!%p10257_p3)
}
 0x8ca   : > { %s10261_s18 = scalar_lea.hbm %s7826_s0, 16  ;;  %s10265_s22 = scalar_lea.hbm %s14004_s21, 32 }
 0x8cb   : > { %p10262_p4 = scmp.ne.s32.totalorder %s7826_s0, %s10261_s18  ;;  %p10266_p9 = scmp.lt.s32.totalorder %s7826_s0, %s14004_s21 }
 0x8cc   : > { %p10267_p10 = scmp.lt.s32.totalorder %s10265_s22, %s10261_s18 }
 0x8cd   : > { %p10263_p7 = pnand %p10262_p4, %p10441_p5 }
 0x8ce   : > { %p10268_p11 = por %p10267_p10, %p10266_p9 }
 0x8cf   : > { %p10264_p8 = pneg %p10263_p7 }
 0x8d1   : > { %p10269_p12 = pnand %p10268_p11, %p10264_p8 }
 0x8d3   : > { %10272 = shalt.err (!%p10269_p12)
}
 0x8d4   : > { %9206 = dma.vmem_to_hbm [thread:$0]  (%p10441_p5), %s7829_s27, 16, %s7826_s0, %s7816_s16  }
 0x8d5 PF: > { %s14005_s2 = sld [smem:[#allocation7_spill]] }
 0x8d6   : > { %s14006_s26 = sld [smem:[#allocation5_spill]] }
 0x8db   : > { %p9212_p13 = scmp.ge.s32.totalorder %s14005_s2, 2 }
 0x8dc   : > { %s7840_s28 = sand.u32 1, %s14006_s26  }
 0x8dd   : > { %p9209_p0 = pnand %p9212_p13, %p10445_p6  ;;  %s7841_s24 = scalar_lea.sflag [#allocation3], %s7840_s28 }
 0x8df   : > { %p9210_p1 = pneg %p9209_p0 }
 0x8e1   : > { %10290 = dma.done.wait (%p9210_p1), %s7841_s24, 16  }
 0x8e2   : > { %10292 = vsyncadd (%p9210_p1), %s7841_s24, 4294967280  ;;  %s14008_s27 = sld [smem:[#allocation8_spill]]  ;;  %s14011_s24 = smov %s10299_s25 }
 0x8e3   : > { %s14009_s18 = sld [smem:[#allocation6_spill]] }
 0x8e4   : > { %s14010_s26 = sld [smem:[#allocation9_spill]] }
 0x8e8   : > { %p27_p2 = scmp.ge.s32.totalorder %s14008_s27, 4  }
 0x8e9   : > { %s14012_s25 = smov %s14009_s18 }
 0x8ea   :  { %29 = sbr.rel (!%p27_p2) target bundleno = 9 (0x9), region = 137 }
 0x8ef   :  { %7845 = vsyncpa [#allocation3], 1 }
 0x8f0   :  { %7847 = vsyncpa [#allocation3 + $0x1], 1 }

</bundles_post_ra>
